<compile_context>
chip_gen: v7x
topology: tpu7x:2x2x1
jax: 0.10.0
libtpu: 0.0.40
codegen_flags: <defaults>
</compile_context>

<pallas_src>
import functools

import jax
import jax.numpy as jnp
from jax import lax
from jax.experimental import pallas as pl
from jax.experimental.pallas import tpu as pltpu


def _dwsep_kernel(x_ref, wdw_ref, wpw_ref, o_ref,
                  xpad_ref, xshift_ref, dw_ref, *, K, P, use_bf16_mxu):
    """Fused depthwise KxK (stride 1, pad P) + pointwise 1x1 for a block of NB images.

    x_ref:      (NB, H, W, Cin)          input block (NHWC)
    wdw_ref:    (K*K, Cin)               depthwise weights, row dy*K+dx = per-channel taps
    wpw_ref:    (Cin, Cout)              pointwise weights
    xpad_ref:   (H+2P, W+2P, Cin)        VMEM scratch: zero-padded image (reused per image)
    xshift_ref: (H+2P, Wout, Cin)        VMEM scratch: dx-shifted slab (aligned dy reads)
    dw_ref:     (NB*Hout*Wout, Cin)      VMEM scratch: depthwise result (MXU LHS)
    o_ref:      (NB, Hout, Wout, Cout)   output block
    """
    NB, H, W, Cin = x_ref.shape
    _, Hout, Wout, Cout = o_ref.shape
    Hp = H + 2 * P
    Wp = W + 2 * P
    M = Hout * Wout

    # Zero ONLY the P-wide border strips (not the whole padded buffer); the interior is
    # fully overwritten below.  Done once: the border stays zero while the scratch is
    # reused for every image in the block.
    if P > 0:
        xpad_ref[:P, :, :] = jnp.zeros((P, Wp, Cin), jnp.float32)
        xpad_ref[P + H:, :, :] = jnp.zeros((P, Wp, Cin), jnp.float32)
        xpad_ref[:, :P, :] = jnp.zeros((Hp, P, Cin), jnp.float32)
        xpad_ref[:, P + W:, :] = jnp.zeros((Hp, P, Cin), jnp.float32)

    for b in range(NB):
        # Padded image for this batch element (interior only; border already zero).
        xpad_ref[P:P + H, P:P + W, :] = x_ref[b].astype(jnp.float32)

        # Depthwise KxK, stride 1, dx-major: stage the dx-shifted slab once per dx so the
        # inner dy loop only does aligned reads (offsets along the leading/major axis).
        for dx in range(K):
            xshift_ref[...] = xpad_ref[:, dx:dx + Wout, :]
            contrib = xshift_ref[0:Hout, :, :] * wdw_ref[dx, :]
            for dy in range(1, K):
                contrib = contrib + (xshift_ref[dy:dy + Hout, :, :]
                                     * wdw_ref[dy * K + dx, :])
            # Accumulate into the 2-D VMEM staging buffer (keeps vreg pressure low and
            # makes the reshape feeding the MXU a pure re-indexing).
            flat = contrib.reshape(M, Cin)
            if dx == 0:
                dw_ref[b * M:(b + 1) * M, :] = flat
            else:
                dw_ref[b * M:(b + 1) * M, :] += flat

    # Pointwise 1x1 conv == (NB*Hout*Wout, Cin) @ (Cin, Cout): one MXU matmul whose LHS
    # streams straight from the VMEM staging buffer.
    lhs = dw_ref[...]
    rhs = wpw_ref[...]
    if use_bf16_mxu:
        # Single-pass MXU issue on v6e/v7x; accumulation stays f32.  Off by default
        # (marginal against tight numerical tolerances).
        lhs = lhs.astype(jnp.bfloat16)
        rhs = rhs.astype(jnp.bfloat16)
    y = jnp.dot(lhs, rhs, preferred_element_type=jnp.float32)
    o_ref[...] = y.reshape(NB, Hout, Wout, Cout).astype(o_ref.dtype)


def depthwise_separable_conv2d_nhwc(x_nhwc, wdw, wpw, *, padding=1,
                                    batch_block=None, use_bf16_mxu=False):
    """Transpose-free NHWC entry point (preferred: keep the surrounding model NHWC).

    x_nhwc: (N, H, W, Cin) float32
    wdw:    (K*K, Cin)   depthwise weights (PyTorch (Cin,1,K,K) -> (K,K,Cin) -> flat taps)
    wpw:    (Cin, Cout)  pointwise weights (PyTorch (Cout,Cin,1,1) transposed)
    """
    N, H, W, Cin = x_nhwc.shape
    KK = wdw.shape[0]
    K = int(round(KK ** 0.5))
    Cout = wpw.shape[1]
    Hout = H + 2 * padding - K + 1
    Wout = W + 2 * padding - K + 1

    # Batch-folding policy:
    #   * v5e / v6e (single TensorCore): fold the whole batch into one grid step (default)
    #     -> no per-step pipeline overhead, bigger MXU M-fill (M = N*Hout*Wout).
    #   * v7x (2 TCs): pass batch_block=1 so grid=(N,), marked "parallel", shards the
    #     images across both cores.
    if batch_block is None:
        batch_block = N
    assert N % batch_block == 0, "batch_block must divide N"
    NB = batch_block

    kernel = functools.partial(_dwsep_kernel, K=K, P=padding, use_bf16_mxu=use_bf16_mxu)
    out = pl.pallas_call(
        kernel,
        out_shape=jax.ShapeDtypeStruct((N, Hout, Wout, Cout), x_nhwc.dtype),
        grid=(N // NB,),
        in_specs=[
            pl.BlockSpec((NB, H, W, Cin), lambda n: (n, 0, 0, 0)),
            pl.BlockSpec((KK, Cin), lambda n: (0, 0)),
            pl.BlockSpec((Cin, Cout), lambda n: (0, 0)),
        ],
        out_specs=pl.BlockSpec((NB, Hout, Wout, Cout), lambda n: (n, 0, 0, 0)),
        scratch_shapes=[
            pltpu.VMEM((H + 2 * padding, W + 2 * padding, Cin), jnp.float32),  # padded img
            pltpu.VMEM((H + 2 * padding, Wout, Cin), jnp.float32),             # dx slab
            pltpu.VMEM((NB * Hout * Wout, Cin), jnp.float32),                  # depthwise out
        ],
        compiler_params=pltpu.CompilerParams(
            dimension_semantics=("parallel",)),  # batch axis -> both TCs on v7x
    )(x_nhwc, wdw, wpw)
    return out


def depthwise_separable_conv2d(x_nchw, wdw, wpw, *, padding=1,
                               batch_block=None, use_bf16_mxu=False):
    """PyTorch-compatible (NCHW) forward of DepthewiseSeperableConv2d.

    NOTE: the two boundary transposes below are pure layout plumbing for the PyTorch NCHW
    contract; an NHWC end-to-end model should call depthwise_separable_conv2d_nhwc and pay
    zero transposes.
    TODO(synk): folding the NCHW->NHWC relayout into the kernel (major->lane channel move)
                needs an in-kernel XLU transpose; kept wrapper-side for robustness.
    """
    x = jnp.transpose(x_nchw, (0, 2, 3, 1))  # -> NHWC (channels on lanes)
    out = depthwise_separable_conv2d_nhwc(
        x, wdw, wpw, padding=padding, batch_block=batch_block,
        use_bf16_mxu=use_bf16_mxu)
    return jnp.transpose(out, (0, 3, 1, 2))  # -> NCHW


def depthwise_separable_conv2d_ref(x_nchw, wdw, wpw, *, padding=1):
    """Pure-JAX reference (lax convs) for numerical validation."""
    N, Cin, H, W = x_nchw.shape
    KK = wdw.shape[0]
    K = int(round(KK ** 0.5))
    Cout = wpw.shape[1]

    x = jnp.transpose(x_nchw, (0, 2, 3, 1))  # NHWC
    dn_dw = lax.conv_dimension_numbers(x.shape, (K, K, 1, Cin), ("NHWC", "HWIO", "NHWC"))
    dw = lax.conv_general_dilated(
        x, wdw.reshape(K, K, 1, Cin), (1, 1),
        ((padding, padding), (padding, padding)),
        dimension_numbers=dn_dw, feature_group_count=Cin)

    dn_pw = lax.conv_dimension_numbers(dw.shape, (1, 1, Cin, Cout), ("NHWC", "HWIO", "NHWC"))
    pw = lax.conv_general_dilated(
        dw, wpw.reshape(1, 1, Cin, Cout), (1, 1), "VALID", dimension_numbers=dn_pw)
    return jnp.transpose(pw, (0, 3, 1, 2))


if __name__ == "__main__":
    key = jax.random.PRNGKey(0)
    k_x, k_dw, k_pw = jax.random.split(key, 3)

    N, Cin, Cout, H, W, K = 2, 64, 128, 16, 16, 3
    x = jax.random.normal(k_x, (N, Cin, H, W), jnp.float32)
    wdw = jax.random.normal(k_dw, (K * K, Cin), jnp.float32) * 0.1   # depthwise taps
    wpw = jax.random.normal(k_pw, (Cin, Cout), jnp.float32) * 0.05   # pointwise weights

    run = jax.jit(depthwise_separable_conv2d, static_argnames=("padding", "batch_block"))

    # Common usage: kernel_size=3, padding=1 (spatial-preserving), batch folded (v5e/v6e).
    out = jax.block_until_ready(run(x, wdw, wpw, padding=1))
    ref = jax.block_until_ready(depthwise_separable_conv2d_ref(x, wdw, wpw, padding=1))
    assert out.shape == (N, Cout, H, W)
    assert jnp.allclose(out, ref, rtol=1e-4, atol=1e-3), float(jnp.max(jnp.abs(out - ref)))

    # PyTorch default kwargs: padding=0 ("valid").
    out0 = jax.block_until_ready(run(x, wdw, wpw, padding=0))
    ref0 = jax.block_until_ready(depthwise_separable_conv2d_ref(x, wdw, wpw, padding=0))
    assert out0.shape == (N, Cout, H - K + 1, W - K + 1)
    assert jnp.allclose(out0, ref0, rtol=1e-4, atol=1e-3), float(jnp.max(jnp.abs(out0 - ref0)))

    # v7x-style configuration: one image per grid step on the "parallel" batch axis.
    out1 = jax.block_until_ready(run(x, wdw, wpw, padding=1, batch_block=1))
    assert jnp.allclose(out1, ref, rtol=1e-4, atol=1e-3), float(jnp.max(jnp.abs(out1 - ref)))

    print("KERNEL_OK")
</pallas_src>

<mosaic_0001>
module attributes {stable_mosaic.version = 11 : i64} {
  func.func @_dwsep_kernel(%arg0: i32, %arg1: memref<2x16x16x64xf32, #tpu.memory_space<vmem>>, %arg2: memref<9x64xf32, #tpu.memory_space<vmem>>, %arg3: memref<64x128xf32, #tpu.memory_space<vmem>>, %arg4: memref<2x16x16x128xf32, #tpu.memory_space<vmem>>, %arg5: memref<18x18x64xf32, #tpu.memory_space<vmem>>, %arg6: memref<18x16x64xf32, #tpu.memory_space<vmem>>, %arg7: memref<512x64xf32, #tpu.memory_space<vmem>>) attributes {dimension_semantics = [#tpu.dimension_semantics<parallel>], iteration_bounds = array<i64: 1>, scalar_prefetch = 0 : i64, scratch_operands = 3 : i64, tpu.core_type = #tpu.core_type<tc>, window_params = [{transform_indices = @transform_0, window_bounds = array<i64: 2, 16, 16, 64>}, {pipeline_mode = #tpu.pipeline_mode<synchronous>, transform_indices = @transform_1, window_bounds = array<i64: 9, 64>}, {pipeline_mode = #tpu.pipeline_mode<synchronous>, transform_indices = @transform_2, window_bounds = array<i64: 64, 128>}, {transform_indices = @transform_3, window_bounds = array<i64: 2, 16, 16, 128>}]} {
    %cst = arith.constant 0.000000e+00 : f32
    %0 = vector.broadcast %cst : f32 to vector<1x18x64xf32>
    %c0 = arith.constant 0 : index
    %c0_0 = arith.constant 0 : index
    %c0_1 = arith.constant 0 : index
    %1 = vector.load %arg5[%c0, %c0_0, %c0_1] : memref<18x18x64xf32, #tpu.memory_space<vmem>>, vector<1x18x64xf32>
    tpu.vector_store %arg5[%c0, %c0_0, %c0_1], %0 {strides = array<i32>} : memref<18x18x64xf32, #tpu.memory_space<vmem>>, vector<1x18x64xf32>,
    %cst_2 = arith.constant 0.000000e+00 : f32
    %2 = vector.broadcast %cst_2 : f32 to vector<1x18x64xf32>
    %c17 = arith.constant 17 : index
    %c0_3 = arith.constant 0 : index
    %c0_4 = arith.constant 0 : index
    %3 = vector.load %arg5[%c17, %c0_3, %c0_4] : memref<18x18x64xf32, #tpu.memory_space<vmem>>, vector<1x18x64xf32>
    tpu.vector_store %arg5[%c17, %c0_3, %c0_4], %2 {strides = array<i32>} : memref<18x18x64xf32, #tpu.memory_space<vmem>>, vector<1x18x64xf32>,
    %cst_5 = arith.constant 0.000000e+00 : f32
    %4 = vector.broadcast %cst_5 : f32 to vector<18x1x64xf32>
    %c0_6 = arith.constant 0 : index
    %c0_7 = arith.constant 0 : index
    %c0_8 = arith.constant 0 : index
    %5 = vector.load %arg5[%c0_6, %c0_7, %c0_8] : memref<18x18x64xf32, #tpu.memory_space<vmem>>, vector<18x1x64xf32>
    tpu.vector_store %arg5[%c0_6, %c0_7, %c0_8], %4 {strides = array<i32>} : memref<18x18x64xf32, #tpu.memory_space<vmem>>, vector<18x1x64xf32>,
    %cst_9 = arith.constant 0.000000e+00 : f32
    %6 = vector.broadcast %cst_9 : f32 to vector<18x1x64xf32>
    %c0_10 = arith.constant 0 : index
    %c17_11 = arith.constant 17 : index
    %c0_12 = arith.constant 0 : index
    %7 = vector.load %arg5[%c0_10, %c17_11, %c0_12] : memref<18x18x64xf32, #tpu.memory_space<vmem>>, vector<18x1x64xf32>
    tpu.vector_store %arg5[%c0_10, %c17_11, %c0_12], %6 {strides = array<i32>} : memref<18x18x64xf32, #tpu.memory_space<vmem>>, vector<18x1x64xf32>,
    %c0_13 = arith.constant 0 : index
    %c0_14 = arith.constant 0 : index
    %c0_15 = arith.constant 0 : index
    %c0_16 = arith.constant 0 : index
    %8 = vector.load %arg1[%c0_13, %c0_14, %c0_15, %c0_16] : memref<2x16x16x64xf32, #tpu.memory_space<vmem>>, vector<1x16x16x64xf32>
    %9 = vector.shape_cast %8 : vector<1x16x16x64xf32> to vector<16x16x64xf32>
    %c1 = arith.constant 1 : index
    %c1_17 = arith.constant 1 : index
    %c0_18 = arith.constant 0 : index
    %10 = vector.load %arg5[%c1, %c1_17, %c0_18] : memref<18x18x64xf32, #tpu.memory_space<vmem>>, vector<16x16x64xf32>
    tpu.vector_store %arg5[%c1, %c1_17, %c0_18], %9 {strides = array<i32>} : memref<18x18x64xf32, #tpu.memory_space<vmem>>, vector<16x16x64xf32>,
    %c0_19 = arith.constant 0 : index
    %c0_20 = arith.constant 0 : index
    %c0_21 = arith.constant 0 : index
    %11 = vector.load %arg5[%c0_19, %c0_20, %c0_21] : memref<18x18x64xf32, #tpu.memory_space<vmem>>, vector<18x16x64xf32>
    %c0_22 = arith.constant 0 : index
    %c0_23 = arith.constant 0 : index
    %c0_24 = arith.constant 0 : index
    %12 = vector.load %arg6[%c0_22, %c0_23, %c0_24] : memref<18x16x64xf32, #tpu.memory_space<vmem>>, vector<18x16x64xf32>
    tpu.vector_store %arg6[%c0_22, %c0_23, %c0_24], %11 {strides = array<i32>} : memref<18x16x64xf32, #tpu.memory_space<vmem>>, vector<18x16x64xf32>,
    %c0_25 = arith.constant 0 : index
    %c0_26 = arith.constant 0 : index
    %c0_27 = arith.constant 0 : index
    %13 = vector.load %arg6[%c0_25, %c0_26, %c0_27] : memref<18x16x64xf32, #tpu.memory_space<vmem>>, vector<16x16x64xf32>
    %c0_28 = arith.constant 0 : index
    %c0_29 = arith.constant 0 : index
    %14 = vector.load %arg2[%c0_28, %c0_29] : memref<9x64xf32, #tpu.memory_space<vmem>>, vector<1x64xf32>
    %15 = vector.shape_cast %14 : vector<1x64xf32> to vector<64xf32>
    %16 = vector.shape_cast %15 : vector<64xf32> to vector<1x1x64xf32>
    %17 = vector.broadcast %16 : vector<1x1x64xf32> to vector<16x16x64xf32>
    %18 = arith.mulf %13, %17 : vector<16x16x64xf32>
    %c1_30 = arith.constant 1 : index
    %c0_31 = arith.constant 0 : index
    %c0_32 = arith.constant 0 : index
    %19 = vector.load %arg6[%c1_30, %c0_31, %c0_32] : memref<18x16x64xf32, #tpu.memory_space<vmem>>, vector<16x16x64xf32>
    %c3 = arith.constant 3 : index
    %c0_33 = arith.constant 0 : index
    %20 = vector.load %arg2[%c3, %c0_33] : memref<9x64xf32, #tpu.memory_space<vmem>>, vector<1x64xf32>
    %21 = vector.shape_cast %20 : vector<1x64xf32> to vector<64xf32>
    %22 = vector.shape_cast %21 : vector<64xf32> to vector<1x1x64xf32>
    %23 = vector.broadcast %22 : vector<1x1x64xf32> to vector<16x16x64xf32>
    %24 = arith.mulf %19, %23 : vector<16x16x64xf32>
    %25 = arith.addf %18, %24 : vector<16x16x64xf32>
    %c2 = arith.constant 2 : index
    %c0_34 = arith.constant 0 : index
    %c0_35 = arith.constant 0 : index
    %26 = vector.load %arg6[%c2, %c0_34, %c0_35] : memref<18x16x64xf32, #tpu.memory_space<vmem>>, vector<16x16x64xf32>
    %c6 = arith.constant 6 : index
    %c0_36 = arith.constant 0 : index
    %27 = vector.load %arg2[%c6, %c0_36] : memref<9x64xf32, #tpu.memory_space<vmem>>, vector<1x64xf32>
    %28 = vector.shape_cast %27 : vector<1x64xf32> to vector<64xf32>
    %29 = vector.shape_cast %28 : vector<64xf32> to vector<1x1x64xf32>
    %30 = vector.broadcast %29 : vector<1x1x64xf32> to vector<16x16x64xf32>
    %31 = arith.mulf %26, %30 : vector<16x16x64xf32>
    %32 = arith.addf %25, %31 : vector<16x16x64xf32>
    %33 = vector.shape_cast %32 : vector<16x16x64xf32> to vector<256x64xf32>
    %c0_37 = arith.constant 0 : index
    %c0_38 = arith.constant 0 : index
    %34 = vector.load %arg7[%c0_37, %c0_38] : memref<512x64xf32, #tpu.memory_space<vmem>>, vector<256x64xf32>
    tpu.vector_store %arg7[%c0_37, %c0_38], %33 {strides = array<i32>} : memref<512x64xf32, #tpu.memory_space<vmem>>, vector<256x64xf32>,
    %c0_39 = arith.constant 0 : index
    %c1_40 = arith.constant 1 : index
    %c0_41 = arith.constant 0 : index
    %35 = vector.load %arg5[%c0_39, %c1_40, %c0_41] : memref<18x18x64xf32, #tpu.memory_space<vmem>>, vector<18x16x64xf32>
    %c0_42 = arith.constant 0 : index
    %c0_43 = arith.constant 0 : index
    %c0_44 = arith.constant 0 : index
    %36 = vector.load %arg6[%c0_42, %c0_43, %c0_44] : memref<18x16x64xf32, #tpu.memory_space<vmem>>, vector<18x16x64xf32>
    tpu.vector_store %arg6[%c0_42, %c0_43, %c0_44], %35 {strides = array<i32>} : memref<18x16x64xf32, #tpu.memory_space<vmem>>, vector<18x16x64xf32>,
    %c0_45 = arith.constant 0 : index
    %c0_46 = arith.constant 0 : index
    %c0_47 = arith.constant 0 : index
    %37 = vector.load %arg6[%c0_45, %c0_46, %c0_47] : memref<18x16x64xf32, #tpu.memory_space<vmem>>, vector<16x16x64xf32>
    %c1_48 = arith.constant 1 : index
    %c0_49 = arith.constant 0 : index
    %38 = vector.load %arg2[%c1_48, %c0_49] : memref<9x64xf32, #tpu.memory_space<vmem>>, vector<1x64xf32>
    %39 = vector.shape_cast %38 : vector<1x64xf32> to vector<64xf32>
    %40 = vector.shape_cast %39 : vector<64xf32> to vector<1x1x64xf32>
    %41 = vector.broadcast %40 : vector<1x1x64xf32> to vector<16x16x64xf32>
    %42 = arith.mulf %37, %41 : vector<16x16x64xf32>
    %c1_50 = arith.constant 1 : index
    %c0_51 = arith.constant 0 : index
    %c0_52 = arith.constant 0 : index
    %43 = vector.load %arg6[%c1_50, %c0_51, %c0_52] : memref<18x16x64xf32, #tpu.memory_space<vmem>>, vector<16x16x64xf32>
    %c4 = arith.constant 4 : index
    %c0_53 = arith.constant 0 : index
    %44 = vector.load %arg2[%c4, %c0_53] : memref<9x64xf32, #tpu.memory_space<vmem>>, vector<1x64xf32>
    %45 = vector.shape_cast %44 : vector<1x64xf32> to vector<64xf32>
    %46 = vector.shape_cast %45 : vector<64xf32> to vector<1x1x64xf32>
    %47 = vector.broadcast %46 : vector<1x1x64xf32> to vector<16x16x64xf32>
    %48 = arith.mulf %43, %47 : vector<16x16x64xf32>
    %49 = arith.addf %42, %48 : vector<16x16x64xf32>
    %c2_54 = arith.constant 2 : index
    %c0_55 = arith.constant 0 : index
    %c0_56 = arith.constant 0 : index
    %50 = vector.load %arg6[%c2_54, %c0_55, %c0_56] : memref<18x16x64xf32, #tpu.memory_space<vmem>>, vector<16x16x64xf32>
    %c7 = arith.constant 7 : index
    %c0_57 = arith.constant 0 : index
    %51 = vector.load %arg2[%c7, %c0_57] : memref<9x64xf32, #tpu.memory_space<vmem>>, vector<1x64xf32>
    %52 = vector.shape_cast %51 : vector<1x64xf32> to vector<64xf32>
    %53 = vector.shape_cast %52 : vector<64xf32> to vector<1x1x64xf32>
    %54 = vector.broadcast %53 : vector<1x1x64xf32> to vector<16x16x64xf32>
    %55 = arith.mulf %50, %54 : vector<16x16x64xf32>
    %56 = arith.addf %49, %55 : vector<16x16x64xf32>
    %57 = vector.shape_cast %56 : vector<16x16x64xf32> to vector<256x64xf32>
    %c0_58 = arith.constant 0 : index
    %c0_59 = arith.constant 0 : index
    %58 = vector.load %arg7[%c0_58, %c0_59] : memref<512x64xf32, #tpu.memory_space<vmem>>, vector<256x64xf32>
    %59 = arith.addf %58, %57 : vector<256x64xf32>
    %c0_60 = arith.constant 0 : index
    %c0_61 = arith.constant 0 : index
    %60 = vector.load %arg7[%c0_60, %c0_61] : memref<512x64xf32, #tpu.memory_space<vmem>>, vector<256x64xf32>
    tpu.vector_store %arg7[%c0_60, %c0_61], %59 {strides = array<i32>} : memref<512x64xf32, #tpu.memory_space<vmem>>, vector<256x64xf32>,
    %c0_62 = arith.constant 0 : index
    %c2_63 = arith.constant 2 : index
    %c0_64 = arith.constant 0 : index
    %61 = vector.load %arg5[%c0_62, %c2_63, %c0_64] : memref<18x18x64xf32, #tpu.memory_space<vmem>>, vector<18x16x64xf32>
    %c0_65 = arith.constant 0 : index
    %c0_66 = arith.constant 0 : index
    %c0_67 = arith.constant 0 : index
    %62 = vector.load %arg6[%c0_65, %c0_66, %c0_67] : memref<18x16x64xf32, #tpu.memory_space<vmem>>, vector<18x16x64xf32>
    tpu.vector_store %arg6[%c0_65, %c0_66, %c0_67], %61 {strides = array<i32>} : memref<18x16x64xf32, #tpu.memory_space<vmem>>, vector<18x16x64xf32>,
    %c0_68 = arith.constant 0 : index
    %c0_69 = arith.constant 0 : index
    %c0_70 = arith.constant 0 : index
    %63 = vector.load %arg6[%c0_68, %c0_69, %c0_70] : memref<18x16x64xf32, #tpu.memory_space<vmem>>, vector<16x16x64xf32>
    %c2_71 = arith.constant 2 : index
    %c0_72 = arith.constant 0 : index
    %64 = vector.load %arg2[%c2_71, %c0_72] : memref<9x64xf32, #tpu.memory_space<vmem>>, vector<1x64xf32>
    %65 = vector.shape_cast %64 : vector<1x64xf32> to vector<64xf32>
    %66 = vector.shape_cast %65 : vector<64xf32> to vector<1x1x64xf32>
    %67 = vector.broadcast %66 : vector<1x1x64xf32> to vector<16x16x64xf32>
    %68 = arith.mulf %63, %67 : vector<16x16x64xf32>
    %c1_73 = arith.constant 1 : index
    %c0_74 = arith.constant 0 : index
    %c0_75 = arith.constant 0 : index
    %69 = vector.load %arg6[%c1_73, %c0_74, %c0_75] : memref<18x16x64xf32, #tpu.memory_space<vmem>>, vector<16x16x64xf32>
    %c5 = arith.constant 5 : index
    %c0_76 = arith.constant 0 : index
    %70 = vector.load %arg2[%c5, %c0_76] : memref<9x64xf32, #tpu.memory_space<vmem>>, vector<1x64xf32>
    %71 = vector.shape_cast %70 : vector<1x64xf32> to vector<64xf32>
    %72 = vector.shape_cast %71 : vector<64xf32> to vector<1x1x64xf32>
    %73 = vector.broadcast %72 : vector<1x1x64xf32> to vector<16x16x64xf32>
    %74 = arith.mulf %69, %73 : vector<16x16x64xf32>
    %75 = arith.addf %68, %74 : vector<16x16x64xf32>
    %c2_77 = arith.constant 2 : index
    %c0_78 = arith.constant 0 : index
    %c0_79 = arith.constant 0 : index
    %76 = vector.load %arg6[%c2_77, %c0_78, %c0_79] : memref<18x16x64xf32, #tpu.memory_space<vmem>>, vector<16x16x64xf32>
    %c8 = arith.constant 8 : index
    %c0_80 = arith.constant 0 : index
    %77 = vector.load %arg2[%c8, %c0_80] : memref<9x64xf32, #tpu.memory_space<vmem>>, vector<1x64xf32>
    %78 = vector.shape_cast %77 : vector<1x64xf32> to vector<64xf32>
    %79 = vector.shape_cast %78 : vector<64xf32> to vector<1x1x64xf32>
    %80 = vector.broadcast %79 : vector<1x1x64xf32> to vector<16x16x64xf32>
    %81 = arith.mulf %76, %80 : vector<16x16x64xf32>
    %82 = arith.addf %75, %81 : vector<16x16x64xf32>
    %83 = vector.shape_cast %82 : vector<16x16x64xf32> to vector<256x64xf32>
    %c0_81 = arith.constant 0 : index
    %c0_82 = arith.constant 0 : index
    %84 = vector.load %arg7[%c0_81, %c0_82] : memref<512x64xf32, #tpu.memory_space<vmem>>, vector<256x64xf32>
    %85 = arith.addf %84, %83 : vector<256x64xf32>
    %c0_83 = arith.constant 0 : index
    %c0_84 = arith.constant 0 : index
    %86 = vector.load %arg7[%c0_83, %c0_84] : memref<512x64xf32, #tpu.memory_space<vmem>>, vector<256x64xf32>
    tpu.vector_store %arg7[%c0_83, %c0_84], %85 {strides = array<i32>} : memref<512x64xf32, #tpu.memory_space<vmem>>, vector<256x64xf32>,
    %c1_85 = arith.constant 1 : index
    %c0_86 = arith.constant 0 : index
    %c0_87 = arith.constant 0 : index
    %c0_88 = arith.constant 0 : index
    %87 = vector.load %arg1[%c1_85, %c0_86, %c0_87, %c0_88] : memref<2x16x16x64xf32, #tpu.memory_space<vmem>>, vector<1x16x16x64xf32>
    %88 = vector.shape_cast %87 : vector<1x16x16x64xf32> to vector<16x16x64xf32>
    %c1_89 = arith.constant 1 : index
    %c1_90 = arith.constant 1 : index
    %c0_91 = arith.constant 0 : index
    %89 = vector.load %arg5[%c1_89, %c1_90, %c0_91] : memref<18x18x64xf32, #tpu.memory_space<vmem>>, vector<16x16x64xf32>
    tpu.vector_store %arg5[%c1_89, %c1_90, %c0_91], %88 {strides = array<i32>} : memref<18x18x64xf32, #tpu.memory_space<vmem>>, vector<16x16x64xf32>,
    %c0_92 = arith.constant 0 : index
    %c0_93 = arith.constant 0 : index
    %c0_94 = arith.constant 0 : index
    %90 = vector.load %arg5[%c0_92, %c0_93, %c0_94] : memref<18x18x64xf32, #tpu.memory_space<vmem>>, vector<18x16x64xf32>
    %c0_95 = arith.constant 0 : index
    %c0_96 = arith.constant 0 : index
    %c0_97 = arith.constant 0 : index
    %91 = vector.load %arg6[%c0_95, %c0_96, %c0_97] : memref<18x16x64xf32, #tpu.memory_space<vmem>>, vector<18x16x64xf32>
    tpu.vector_store %arg6[%c0_95, %c0_96, %c0_97], %90 {strides = array<i32>} : memref<18x16x64xf32, #tpu.memory_space<vmem>>, vector<18x16x64xf32>,
    %c0_98 = arith.constant 0 : index
    %c0_99 = arith.constant 0 : index
    %c0_100 = arith.constant 0 : index
    %92 = vector.load %arg6[%c0_98, %c0_99, %c0_100] : memref<18x16x64xf32, #tpu.memory_space<vmem>>, vector<16x16x64xf32>
    %c0_101 = arith.constant 0 : index
    %c0_102 = arith.constant 0 : index
    %93 = vector.load %arg2[%c0_101, %c0_102] : memref<9x64xf32, #tpu.memory_space<vmem>>, vector<1x64xf32>
    %94 = vector.shape_cast %93 : vector<1x64xf32> to vector<64xf32>
    %95 = vector.shape_cast %94 : vector<64xf32> to vector<1x1x64xf32>
    %96 = vector.broadcast %95 : vector<1x1x64xf32> to vector<16x16x64xf32>
    %97 = arith.mulf %92, %96 : vector<16x16x64xf32>
    %c1_103 = arith.constant 1 : index
    %c0_104 = arith.constant 0 : index
    %c0_105 = arith.constant 0 : index
    %98 = vector.load %arg6[%c1_103, %c0_104, %c0_105] : memref<18x16x64xf32, #tpu.memory_space<vmem>>, vector<16x16x64xf32>
    %c3_106 = arith.constant 3 : index
    %c0_107 = arith.constant 0 : index
    %99 = vector.load %arg2[%c3_106, %c0_107] : memref<9x64xf32, #tpu.memory_space<vmem>>, vector<1x64xf32>
    %100 = vector.shape_cast %99 : vector<1x64xf32> to vector<64xf32>
    %101 = vector.shape_cast %100 : vector<64xf32> to vector<1x1x64xf32>
    %102 = vector.broadcast %101 : vector<1x1x64xf32> to vector<16x16x64xf32>
    %103 = arith.mulf %98, %102 : vector<16x16x64xf32>
    %104 = arith.addf %97, %103 : vector<16x16x64xf32>
    %c2_108 = arith.constant 2 : index
    %c0_109 = arith.constant 0 : index
    %c0_110 = arith.constant 0 : index
    %105 = vector.load %arg6[%c2_108, %c0_109, %c0_110] : memref<18x16x64xf32, #tpu.memory_space<vmem>>, vector<16x16x64xf32>
    %c6_111 = arith.constant 6 : index
    %c0_112 = arith.constant 0 : index
    %106 = vector.load %arg2[%c6_111, %c0_112] : memref<9x64xf32, #tpu.memory_space<vmem>>, vector<1x64xf32>
    %107 = vector.shape_cast %106 : vector<1x64xf32> to vector<64xf32>
    %108 = vector.shape_cast %107 : vector<64xf32> to vector<1x1x64xf32>
    %109 = vector.broadcast %108 : vector<1x1x64xf32> to vector<16x16x64xf32>
    %110 = arith.mulf %105, %109 : vector<16x16x64xf32>
    %111 = arith.addf %104, %110 : vector<16x16x64xf32>
    %112 = vector.shape_cast %111 : vector<16x16x64xf32> to vector<256x64xf32>
    %c256 = arith.constant 256 : index
    %c0_113 = arith.constant 0 : index
    %113 = vector.load %arg7[%c256, %c0_113] : memref<512x64xf32, #tpu.memory_space<vmem>>, vector<256x64xf32>
    tpu.vector_store %arg7[%c256, %c0_113], %112 {strides = array<i32>} : memref<512x64xf32, #tpu.memory_space<vmem>>, vector<256x64xf32>,
    %c0_114 = arith.constant 0 : index
    %c1_115 = arith.constant 1 : index
    %c0_116 = arith.constant 0 : index
    %114 = vector.load %arg5[%c0_114, %c1_115, %c0_116] : memref<18x18x64xf32, #tpu.memory_space<vmem>>, vector<18x16x64xf32>
    %c0_117 = arith.constant 0 : index
    %c0_118 = arith.constant 0 : index
    %c0_119 = arith.constant 0 : index
    %115 = vector.load %arg6[%c0_117, %c0_118, %c0_119] : memref<18x16x64xf32, #tpu.memory_space<vmem>>, vector<18x16x64xf32>
    tpu.vector_store %arg6[%c0_117, %c0_118, %c0_119], %114 {strides = array<i32>} : memref<18x16x64xf32, #tpu.memory_space<vmem>>, vector<18x16x64xf32>,
    %c0_120 = arith.constant 0 : index
    %c0_121 = arith.constant 0 : index
    %c0_122 = arith.constant 0 : index
    %116 = vector.load %arg6[%c0_120, %c0_121, %c0_122] : memref<18x16x64xf32, #tpu.memory_space<vmem>>, vector<16x16x64xf32>
    %c1_123 = arith.constant 1 : index
    %c0_124 = arith.constant 0 : index
    %117 = vector.load %arg2[%c1_123, %c0_124] : memref<9x64xf32, #tpu.memory_space<vmem>>, vector<1x64xf32>
    %118 = vector.shape_cast %117 : vector<1x64xf32> to vector<64xf32>
    %119 = vector.shape_cast %118 : vector<64xf32> to vector<1x1x64xf32>
    %120 = vector.broadcast %119 : vector<1x1x64xf32> to vector<16x16x64xf32>
    %121 = arith.mulf %116, %120 : vector<16x16x64xf32>
    %c1_125 = arith.constant 1 : index
    %c0_126 = arith.constant 0 : index
    %c0_127 = arith.constant 0 : index
    %122 = vector.load %arg6[%c1_125, %c0_126, %c0_127] : memref<18x16x64xf32, #tpu.memory_space<vmem>>, vector<16x16x64xf32>
    %c4_128 = arith.constant 4 : index
    %c0_129 = arith.constant 0 : index
    %123 = vector.load %arg2[%c4_128, %c0_129] : memref<9x64xf32, #tpu.memory_space<vmem>>, vector<1x64xf32>
    %124 = vector.shape_cast %123 : vector<1x64xf32> to vector<64xf32>
    %125 = vector.shape_cast %124 : vector<64xf32> to vector<1x1x64xf32>
    %126 = vector.broadcast %125 : vector<1x1x64xf32> to vector<16x16x64xf32>
    %127 = arith.mulf %122, %126 : vector<16x16x64xf32>
    %128 = arith.addf %121, %127 : vector<16x16x64xf32>
    %c2_130 = arith.constant 2 : index
    %c0_131 = arith.constant 0 : index
    %c0_132 = arith.constant 0 : index
    %129 = vector.load %arg6[%c2_130, %c0_131, %c0_132] : memref<18x16x64xf32, #tpu.memory_space<vmem>>, vector<16x16x64xf32>
    %c7_133 = arith.constant 7 : index
    %c0_134 = arith.constant 0 : index
    %130 = vector.load %arg2[%c7_133, %c0_134] : memref<9x64xf32, #tpu.memory_space<vmem>>, vector<1x64xf32>
    %131 = vector.shape_cast %130 : vector<1x64xf32> to vector<64xf32>
    %132 = vector.shape_cast %131 : vector<64xf32> to vector<1x1x64xf32>
    %133 = vector.broadcast %132 : vector<1x1x64xf32> to vector<16x16x64xf32>
    %134 = arith.mulf %129, %133 : vector<16x16x64xf32>
    %135 = arith.addf %128, %134 : vector<16x16x64xf32>
    %136 = vector.shape_cast %135 : vector<16x16x64xf32> to vector<256x64xf32>
    %c256_135 = arith.constant 256 : index
    %c0_136 = arith.constant 0 : index
    %137 = vector.load %arg7[%c256_135, %c0_136] : memref<512x64xf32, #tpu.memory_space<vmem>>, vector<256x64xf32>
    %138 = arith.addf %137, %136 : vector<256x64xf32>
    %c256_137 = arith.constant 256 : index
    %c0_138 = arith.constant 0 : index
    %139 = vector.load %arg7[%c256_137, %c0_138] : memref<512x64xf32, #tpu.memory_space<vmem>>, vector<256x64xf32>
    tpu.vector_store %arg7[%c256_137, %c0_138], %138 {strides = array<i32>} : memref<512x64xf32, #tpu.memory_space<vmem>>, vector<256x64xf32>,
    %c0_139 = arith.constant 0 : index
    %c2_140 = arith.constant 2 : index
    %c0_141 = arith.constant 0 : index
    %140 = vector.load %arg5[%c0_139, %c2_140, %c0_141] : memref<18x18x64xf32, #tpu.memory_space<vmem>>, vector<18x16x64xf32>
    %c0_142 = arith.constant 0 : index
    %c0_143 = arith.constant 0 : index
    %c0_144 = arith.constant 0 : index
    %141 = vector.load %arg6[%c0_142, %c0_143, %c0_144] : memref<18x16x64xf32, #tpu.memory_space<vmem>>, vector<18x16x64xf32>
    tpu.vector_store %arg6[%c0_142, %c0_143, %c0_144], %140 {strides = array<i32>} : memref<18x16x64xf32, #tpu.memory_space<vmem>>, vector<18x16x64xf32>,
    %c0_145 = arith.constant 0 : index
    %c0_146 = arith.constant 0 : index
    %c0_147 = arith.constant 0 : index
    %142 = vector.load %arg6[%c0_145, %c0_146, %c0_147] : memref<18x16x64xf32, #tpu.memory_space<vmem>>, vector<16x16x64xf32>
    %c2_148 = arith.constant 2 : index
    %c0_149 = arith.constant 0 : index
    %143 = vector.load %arg2[%c2_148, %c0_149] : memref<9x64xf32, #tpu.memory_space<vmem>>, vector<1x64xf32>
    %144 = vector.shape_cast %143 : vector<1x64xf32> to vector<64xf32>
    %145 = vector.shape_cast %144 : vector<64xf32> to vector<1x1x64xf32>
    %146 = vector.broadcast %145 : vector<1x1x64xf32> to vector<16x16x64xf32>
    %147 = arith.mulf %142, %146 : vector<16x16x64xf32>
    %c1_150 = arith.constant 1 : index
    %c0_151 = arith.constant 0 : index
    %c0_152 = arith.constant 0 : index
    %148 = vector.load %arg6[%c1_150, %c0_151, %c0_152] : memref<18x16x64xf32, #tpu.memory_space<vmem>>, vector<16x16x64xf32>
    %c5_153 = arith.constant 5 : index
    %c0_154 = arith.constant 0 : index
    %149 = vector.load %arg2[%c5_153, %c0_154] : memref<9x64xf32, #tpu.memory_space<vmem>>, vector<1x64xf32>
    %150 = vector.shape_cast %149 : vector<1x64xf32> to vector<64xf32>
    %151 = vector.shape_cast %150 : vector<64xf32> to vector<1x1x64xf32>
    %152 = vector.broadcast %151 : vector<1x1x64xf32> to vector<16x16x64xf32>
    %153 = arith.mulf %148, %152 : vector<16x16x64xf32>
    %154 = arith.addf %147, %153 : vector<16x16x64xf32>
    %c2_155 = arith.constant 2 : index
    %c0_156 = arith.constant 0 : index
    %c0_157 = arith.constant 0 : index
    %155 = vector.load %arg6[%c2_155, %c0_156, %c0_157] : memref<18x16x64xf32, #tpu.memory_space<vmem>>, vector<16x16x64xf32>
    %c8_158 = arith.constant 8 : index
    %c0_159 = arith.constant 0 : index
    %156 = vector.load %arg2[%c8_158, %c0_159] : memref<9x64xf32, #tpu.memory_space<vmem>>, vector<1x64xf32>
    %157 = vector.shape_cast %156 : vector<1x64xf32> to vector<64xf32>
    %158 = vector.shape_cast %157 : vector<64xf32> to vector<1x1x64xf32>
    %159 = vector.broadcast %158 : vector<1x1x64xf32> to vector<16x16x64xf32>
    %160 = arith.mulf %155, %159 : vector<16x16x64xf32>
    %161 = arith.addf %154, %160 : vector<16x16x64xf32>
    %162 = vector.shape_cast %161 : vector<16x16x64xf32> to vector<256x64xf32>
    %c256_160 = arith.constant 256 : index
    %c0_161 = arith.constant 0 : index
    %163 = vector.load %arg7[%c256_160, %c0_161] : memref<512x64xf32, #tpu.memory_space<vmem>>, vector<256x64xf32>
    %164 = arith.addf %163, %162 : vector<256x64xf32>
    %c256_162 = arith.constant 256 : index
    %c0_163 = arith.constant 0 : index
    %165 = vector.load %arg7[%c256_162, %c0_163] : memref<512x64xf32, #tpu.memory_space<vmem>>, vector<256x64xf32>
    tpu.vector_store %arg7[%c256_162, %c0_163], %164 {strides = array<i32>} : memref<512x64xf32, #tpu.memory_space<vmem>>, vector<256x64xf32>,
    %c0_164 = arith.constant 0 : index
    %c0_165 = arith.constant 0 : index
    %166 = vector.load %arg7[%c0_164, %c0_165] : memref<512x64xf32, #tpu.memory_space<vmem>>, vector<512x64xf32>
    %c0_166 = arith.constant 0 : index
    %c0_167 = arith.constant 0 : index
    %167 = vector.load %arg3[%c0_166, %c0_167] : memref<64x128xf32, #tpu.memory_space<vmem>>, vector<64x128xf32>
    %cst_168 = arith.constant dense<0.000000e+00> : vector<512x128xf32>
    %168 = tpu.matmul %166, %167, %cst_168 {dimension_numbers = #tpu.dot_dimension_numbers<[1], [0], [0], [1], [0, 0, 1, 1], [], []>} : vector<512x64xf32>, vector<64x128xf32>, vector<512x128xf32> -> vector<512x128xf32>
    %169 = vector.shape_cast %168 : vector<512x128xf32> to vector<2x16x16x128xf32>
    %c0_169 = arith.constant 0 : index
    %c0_170 = arith.constant 0 : index
    %c0_171 = arith.constant 0 : index
    %c0_172 = arith.constant 0 : index
    %170 = vector.load %arg4[%c0_169, %c0_170, %c0_171, %c0_172] : memref<2x16x16x128xf32, #tpu.memory_space<vmem>>, vector<2x16x16x128xf32>
    tpu.vector_store %arg4[%c0_169, %c0_170, %c0_171, %c0_172], %169 {strides = array<i32>} : memref<2x16x16x128xf32, #tpu.memory_space<vmem>>, vector<2x16x16x128xf32>,
    return
  }
  func.func @transform_0(%arg0: i32) -> (i32, i32, i32, i32) {
    %c0_i32 = arith.constant 0 : i32
    %c0_i32_0 = arith.constant 0 : i32
    %c0_i32_1 = arith.constant 0 : i32
    %c0_i32_2 = arith.constant 0 : i32
    return %arg0, %c0_i32, %c0_i32_0, %c0_i32_1 : i32, i32, i32, i32
  }
  func.func @transform_1(%arg0: i32) -> (i32, i32) {
    %c0_i32 = arith.constant 0 : i32
    %c0_i32_0 = arith.constant 0 : i32
    %c0_i32_1 = arith.constant 0 : i32
    return %c0_i32, %c0_i32_0 : i32, i32
  }
  func.func @transform_2(%arg0: i32) -> (i32, i32) {
    %c0_i32 = arith.constant 0 : i32
    %c0_i32_0 = arith.constant 0 : i32
    %c0_i32_1 = arith.constant 0 : i32
    return %c0_i32, %c0_i32_0 : i32, i32
  }
  func.func @transform_3(%arg0: i32) -> (i32, i32, i32, i32) {
    %c0_i32 = arith.constant 0 : i32
    %c0_i32_0 = arith.constant 0 : i32
    %c0_i32_1 = arith.constant 0 : i32
    %c0_i32_2 = arith.constant 0 : i32
    return %arg0, %c0_i32, %c0_i32_0, %c0_i32_1 : i32, i32, i32, i32
  }
}

</mosaic_0001>

<bundles_post_ra>
// kernel: depthwise_separable_conv2d.1
= control target key start
LH: loop header
LB: loop body
LE: loop exit
PB: predicated region body
PF: predicated region fallthrough
CT: control target
= control target key end

     0   :  { %8 = vsyncpa [#allocation6], 0  ;;  %s6431_s0 = inlined_call_operand.hbm [shape: f32[2,16,16,64], index: 0, kind: input, shape index: {}]   ;;  %s6432_s1 = inlined_call_operand.hbm [shape: f32[9,64], index: 1, kind: input, shape index: {}]   ;;  %s6433_s2 = inlined_call_operand.hbm [shape: f32[64,128], index: 2, kind: input, shape index: {}]   ;;  %s6434_s3 = inlined_call_operand.hbm [shape: f32[2,16,16,128], index: 3, kind: output, shape index: {}]  }
   0x1   :  { %9 = vsyncpa [#allocation9], 0 }
   0x2   :  { %10 = vsyncpa [#allocation7], 0  ;;  %s3897_s12 = smov [#allocation8]   ;;  %s3898_s14 = smov [#allocation5]  }
   0x3   :  { %s28_s13 = sshll.u32 %s3897_s12, 4  ;;  %s16_s15 = sshll.u32 %s3898_s14, 4  ;;  %s29_s13 = int_to_ptr.vmem [resolvable:$true] %s28_s13  ;;  %s3924_s15 = int_to_ptr.vmem [resolvable:$true] %s16_s15 }
   0x4   :  { %s3803_s18 = scalar_lea.hbm %s6432_s1, 256 }
   0x5   :  { %p3804_p0 = scmp.ne.s32.totalorder %s6432_s1, %s3803_s18  ;;  %p3807_p1 = scmp.lt.u32.totalorder %s3803_s18, %s6432_s1 }
   0x7   :  { %p3809_p2 = pnand %p3807_p1, %p3804_p0 }
   0x9   :  { %3812 = shalt.err (!%p3809_p2)
}
   0xa   :  { %s3813_s23 = scalar_lea.vmem %s29_s13, 256  ;;  %p3818_p4 = scmp.lt.s32.totalorder %s29_s13, %s29_s13 }
   0xb   :  { %p3814_p3 = scmp.ne.s32.totalorder %s29_s13, %s3813_s23  ;;  %p3819_p5 = scmp.lt.s32.totalorder %s3813_s23, %s3813_s23 }
   0xd   :  { %p3820_p6 = por %p3819_p5, %p3818_p4 }
   0xf   :  { %p3821_p7 = pnand %p3820_p6, %p3814_p3 }
  0x11   :  { %3824 = shalt.err (!%p3821_p7)
}
  0x12   :  { %s3899_s24 = smov 128   ;;  %s3900_s25 = smov 8  }
  0x13   :  { %34 = dma.hbm_to_vmem [thread:$0]  %s6432_s1, 256, %s29_s13, [#allocation9], %s3899_s24, %s3899_s24, %s3900_s25  }
  0x14   :  { %s3825_s30 = scalar_lea.hbm %s6431_s0, 8192 }
  0x15   :  { %p3826_p8 = scmp.ne.s32.totalorder %s6431_s0, %s3825_s30  ;;  %p3829_p9 = scmp.lt.u32.totalorder %s3825_s30, %s6431_s0 }
  0x17   :  { %p3831_p10 = pnand %p3829_p9, %p3826_p8 }
  0x19   :  { %3834 = shalt.err (!%p3831_p10)
}
  0x1a   :  { %s3835_s8 = scalar_lea.vmem %s3924_s15, 8192  ;;  %p3840_p12 = scmp.lt.s32.totalorder %s3924_s15, %s3924_s15 }
  0x1b   :  { %p3836_p11 = scmp.ne.s32.totalorder %s3924_s15, %s3835_s8  ;;  %p3841_p13 = scmp.lt.s32.totalorder %s3835_s8, %s3835_s8 }
  0x1d   :  { %p3842_p0 = por %p3841_p13, %p3840_p12 }
  0x1f   :  { %p3843_p1 = pnand %p3842_p0, %p3836_p11 }
  0x21   :  { %3846 = shalt.err (!%p3843_p1)
}
  0x22   :  { %22 = dma.hbm_to_vmem [thread:$0]  %s6431_s0, 8192, %s3924_s15, [#allocation6], %s3899_s24, %s3899_s24, %s3900_s25  }
  0x23   :  { %s3901_s10 = smov [#allocation10]   ;;  %s3847_s14 = scalar_lea.hbm %s6433_s2, 1024 }
  0x24   :  { %s40_s11 = sshll.u32 %s3901_s10, 4  ;;  %p3848_p2 = scmp.ne.s32.totalorder %s6433_s2, %s3847_s14  ;;  %s41_s11 = int_to_ptr.vmem [resolvable:$true] %s40_s11 }
  0x25   :  { %p3851_p3 = scmp.lt.u32.totalorder %s3847_s14, %s6433_s2 }
  0x27   :  { %p3853_p4 = pnand %p3851_p3, %p3848_p2 }
  0x29   :  { %3856 = shalt.err (!%p3853_p4)
}
  0x2a   :  { %s3857_s20 = scalar_lea.vmem %s41_s11, 1024  ;;  %p3862_p6 = scmp.lt.s32.totalorder %s41_s11, %s41_s11 }
  0x2b   :  { %p3858_p5 = scmp.ne.s32.totalorder %s41_s11, %s3857_s20  ;;  %p3863_p7 = scmp.lt.s32.totalorder %s3857_s20, %s3857_s20 }
  0x2d   :  { %p3864_p8 = por %p3863_p7, %p3862_p6 }
  0x2f   :  { %p3865_p9 = pnand %p3864_p8, %p3858_p5 }
  0x31   :  { %3868 = shalt.err (!%p3865_p9)
}
  0x32   :  { %46 = dma.hbm_to_vmem [thread:$0]  %s6433_s2, 1024, %s41_s11, [#allocation9], %s3899_s24, %s3899_s24, %s3900_s25  }
  0x33   :  { %3891 = dma.done.wait [#allocation6], 8192  }
  0x34   :  { %3892 = vsyncadd [#allocation6], 4294959104 }
  0x35   :  { %3893 = dma.done.wait [#allocation9], 1280  }
  0x36   :  { %3894 = vsyncadd [#allocation9], 4294966016  ;;  %vm56_vm0 = vcmask 523264   ;;  %vm65_vm1 = vcmask 516096   ;;  %vm59_vm2 = vcmask 517120   ;;  %v3902_v0 = vmov 0.0  }
  0x37   :  { %57 = vst.msk [vmem:[#allocation2] sm:$0xff] %vm56_vm0, %v3902_v0  ;;  %58 = vst.msk [vmem:[#allocation2 + $0x8] sm:$0xff] %vm56_vm0, %v3902_v0  ;;  %v2804_v1 = vld [vmem:[#allocation10] sm:$0xff]  ;;  %v2805_v2 = vld [vmem:[#allocation10 + $0x8] sm:$0xff]  ;;  %s3903_s2 = smov [#allocation11]  }
  0x38   :  { %67 = vst.msk [vmem:[#allocation2 + $0x18] sm:$0x1] %vm65_vm1, %v3902_v0  ;;  %68 = vst.msk [vmem:[#allocation2 + $0x30] sm:$0x1] %vm65_vm1, %v3902_v0  ;;  %v2806_v3 = vld [vmem:[#allocation10 + $0x10] sm:$0xff]  ;;  %v3737_v4 = vpack.c.bf16 %v2805_v2, %v2804_v1  ;;  %v2807_v5 = vld [vmem:[#allocation10 + $0x18] sm:$0xff] }
  0x39   :  { %62 = vst.msk [vmem:[#allocation2 + $0x198] sm:$0xff] %vm56_vm0, %v3902_v0  ;;  %63 = vst.msk [vmem:[#allocation2 + $0x1a0] sm:$0xff] %vm56_vm0, %v3902_v0  ;;  %v3741_v6 = vpack.c.bf16 %v2807_v5, %v2806_v3  ;;  %v2808_v7 = vld [vmem:[#allocation10 + $0x20] sm:$0xff]  ;;  %v2809_v8 = vld [vmem:[#allocation10 + $0x28] sm:$0xff]  ;;  %s3458_s21 = sshll.u32 %s3903_s2, 4  ;;  %s3459_s21 = int_to_ptr.vmem [resolvable:$true] %s3458_s21 }
  0x3a   :  { %69 = vst.msk [vmem:[#allocation2 + $0x48] sm:$0x1] %vm65_vm1, %v3902_v0  ;;  %70 = vst.msk [vmem:[#allocation2 + $0x60] sm:$0x1] %vm65_vm1, %v3902_v0  ;;  %v102_v9 = vld [vmem:[#allocation5] sm:$0xff]  ;;  %3738 = vmatprep.subr.bf16.mxu0 %v3737_v4  ;;  %3753 = vmatprep.subr.bf16.mxu1 %v3737_v4  ;;  %v103_v10 = vld [vmem:[#allocation5 + $0x8] sm:$0xff]  ;;  %v3745_v14 = vpack.c.bf16 %v2809_v8, %v2808_v7  ;;  %p3874_p11 = scmp.lt.s32.totalorder %s3459_s21, %s3459_s21 }
  0x3b   :  { %71 = vst.msk [vmem:[#allocation2 + $0x78] sm:$0x1] %vm65_vm1, %v3902_v0  ;;  %72 = vst.msk [vmem:[#allocation2 + $0x90] sm:$0x1] %vm65_vm1, %v3902_v0  ;;  %v104_v11 = vld [vmem:[#allocation5 + $0x10] sm:$0xff]  ;;  %v105_v12 = vld [vmem:[#allocation5 + $0x18] sm:$0xff]  ;;  %3740 = vmatpush3.bf16.msra.mxu0 %v3737_v4  ;;  %3757 = vmatpush3.bf16.msra.mxu1 %v3737_v4 }
  0x3c   :  { %73 = vst.msk [vmem:[#allocation2 + $0xa8] sm:$0x1] %vm65_vm1, %v3902_v0  ;;  %74 = vst.msk [vmem:[#allocation2 + $0xc0] sm:$0x1] %vm65_vm1, %v3902_v0  ;;  %3742 = vmatprep.subr.bf16.mxu0 %v3741_v6  ;;  %3754 = vmatprep.subr.bf16.mxu1 %v3741_v6  ;;  %v2810_v15 = vld [vmem:[#allocation10 + $0x30] sm:$0xff]  ;;  %v2811_v16 = vld [vmem:[#allocation10 + $0x38] sm:$0xff] }
  0x3d   :  { %75 = vst.msk [vmem:[#allocation2 + $0xd8] sm:$0x1] %vm65_vm1, %v3902_v0  ;;  %76 = vst.msk [vmem:[#allocation2 + $0xf0] sm:$0x1] %vm65_vm1, %v3902_v0  ;;  %v3749_v18 = vpack.c.bf16 %v2811_v16, %v2810_v15  ;;  %v1423_v20 = vld [vmem:[#allocation5 + $0x100] sm:$0xff]  ;;  %v1425_v21 = vld [vmem:[#allocation5 + $0x110] sm:$0xff] }
  0x3e   :  { %77 = vst.msk [vmem:[#allocation2 + $0x108] sm:$0x1] %vm65_vm1, %v3902_v0  ;;  %78 = vst.msk [vmem:[#allocation2 + $0x120] sm:$0x1] %vm65_vm1, %v3902_v0  ;;  %v4026_v17 = vld [vmem:[#allocation2 + $0x8] sm:$0xff]  ;;  %v1424_v24 = vld [vmem:[#allocation5 + $0x108] sm:$0xff] }
  0x3f   :  { %79 = vst.msk [vmem:[#allocation2 + $0x138] sm:$0x1] %vm65_vm1, %v3902_v0  ;;  %80 = vst.msk [vmem:[#allocation2 + $0x150] sm:$0x1] %vm65_vm1, %v3902_v0  ;;  %3744 = vmatpush3.bf16.msra.mxu0 %v3741_v6  ;;  %3758 = vmatpush3.bf16.msra.mxu1 %v3741_v6  ;;  %v4028_v19 = vld [vmem:[#allocation2 + $0x1] sm:$0xff]  ;;  %v106_v39 = vld [vmem:[#allocation5 + $0x20] sm:$0xff] }
  0x40   :  { %81 = vst.msk [vmem:[#allocation2 + $0x168] sm:$0x1] %vm65_vm1, %v3902_v0  ;;  %82 = vst.msk [vmem:[#allocation2 + $0x180] sm:$0x1] %vm65_vm1, %v3902_v0  ;;  %3746 = vmatprep.subr.bf16.mxu0 %v3745_v14  ;;  %3755 = vmatprep.subr.bf16.mxu1 %v3745_v14  ;;  %v1426_v25 = vld [vmem:[#allocation5 + $0x118] sm:$0xff]  ;;  %v107_v41 = vld [vmem:[#allocation5 + $0x28] sm:$0xff] }
  0x41   :  { %85 = vst.msk [vmem:[#allocation2 + $0x29] sm:$0x1] %vm65_vm1, %v3902_v0  ;;  %86 = vst.msk [vmem:[#allocation2 + $0x41] sm:$0x1] %vm65_vm1, %v3902_v0  ;;  %v4034_v30 = vld [vmem:[#allocation8] ss:$0 sm:$0xff] }
  0x42   :  { %87 = vst.msk [vmem:[#allocation2 + $0x59] sm:$0x1] %vm65_vm1, %v3902_v0  ;;  %88 = vst.msk [vmem:[#allocation2 + $0x71] sm:$0x1] %vm65_vm1, %v3902_v0  ;;  %v4052_v40 = vld [vmem:[#allocation8 + $0x3] ss:$0 sm:$0xff] }
  0x43   :  { %89 = vst.msk [vmem:[#allocation2 + $0x89] sm:$0x1] %vm65_vm1, %v3902_v0  ;;  %90 = vst.msk [vmem:[#allocation2 + $0xa1] sm:$0x1] %vm65_vm1, %v3902_v0  ;;  %3748 = vmatpush3.bf16.msra.mxu0 %v3745_v14  ;;  %3759 = vmatpush3.bf16.msra.mxu1 %v3745_v14  ;;  %v108_v43 = vld [vmem:[#allocation5 + $0x30] sm:$0xff]  ;;  %v109_v44 = vld [vmem:[#allocation5 + $0x38] sm:$0xff] }
  0x44   :  { %91 = vst.msk [vmem:[#allocation2 + $0xb9] sm:$0x1] %vm65_vm1, %v3902_v0  ;;  %92 = vst.msk [vmem:[#allocation2 + $0xd1] sm:$0x1] %vm65_vm1, %v3902_v0  ;;  %3750 = vmatprep.subr.bf16.mxu0 %v3749_v18  ;;  %3756 = vmatprep.subr.bf16.mxu1 %v3749_v18  ;;  %v4059_v46 = vld [vmem:[#allocation8 + $0x6] ss:$0 sm:$0xff] }
  0x45   :  { %93 = vst.msk [vmem:[#allocation2 + $0xe9] sm:$0x1] %vm65_vm1, %v3902_v0  ;;  %94 = vst.msk [vmem:[#allocation2 + $0x101] sm:$0x1] %vm65_vm1, %v3902_v0  ;;  %v110_v47 = vld [vmem:[#allocation5 + $0x40] sm:$0xff]  ;;  %v4065_v49 = vld [vmem:[#allocation2 + $0x2] sm:$0xff] }
  0x46   :  { %95 = vst.msk [vmem:[#allocation2 + $0x119] sm:$0x1] %vm65_vm1, %v3902_v0  ;;  %96 = vst.msk [vmem:[#allocation2 + $0x131] sm:$0x1] %vm65_vm1, %v3902_v0  ;;  %v111_v51 = vld [vmem:[#allocation5 + $0x48] sm:$0xff]  ;;  %v1427_v5 = vld [vmem:[#allocation5 + $0x120] sm:$0xff] }
  0x47   :  { %97 = vst.msk [vmem:[#allocation2 + $0x149] sm:$0x1] %vm65_vm1, %v3902_v0  ;;  %98 = vst.msk [vmem:[#allocation2 + $0x161] sm:$0x1] %vm65_vm1, %v3902_v0  ;;  %3752 = vmatpush3.bf16.msra.mxu0 %v3749_v18  ;;  %3760 = vmatpush3.bf16.msra.mxu1 %v3749_v18  ;;  %v4086_v61 = vld [vmem:[#allocation8 + $0x1] ss:$0 sm:$0xff] }
  0x48   :  { %99 = vst.msk [vmem:[#allocation2 + $0x179] sm:$0x1] %vm65_vm1, %v3902_v0  ;;  %100 = vst.msk [vmem:[#allocation2 + $0x191] sm:$0x1] %vm65_vm1, %v3902_v0  ;;  %v4090_v1 = vld [vmem:[#allocation8 + $0x4] ss:$0 sm:$0xff] }
  0x49   :  { %60 = vst.msk [vmem:[#allocation2 + $0x10] sm:$0x3] %vm59_vm2, %v3902_v0  ;;  %64 = vst.msk [vmem:[#allocation2 + $0x1a8] sm:$0x3] %vm59_vm2, %v3902_v0  ;;  %v4092_v2 = vld [vmem:[#allocation8 + $0x7] ss:$0 sm:$0xff] }
  0x4a   :  { %66 = vst.msk [vmem:[#allocation2] sm:$0x1] %vm65_vm1, %v3902_v0  ;;  %84 = vst.msk [vmem:[#allocation2 + $0x11] sm:$0x1] %vm65_vm1, %v3902_v0  ;;  %v1428_v6 = vld [vmem:[#allocation5 + $0x128] sm:$0xff]  ;;  %v1430_v18 = vld [vmem:[#allocation5 + $0x138] sm:$0xff] }
  0x4b   :  { %83 = vst.msk [vmem:[#allocation2 + $0x198] sm:$0x1] %vm65_vm1, %v3902_v0  ;;  %101 = vst.msk [vmem:[#allocation2 + $0x1a9] sm:$0x1] %vm65_vm1, %v3902_v0  ;;  %s3869_s22 = scalar_lea.vmem %s3459_s21, 8192 }
  0x4c   :  { %135 = vst.msk [vmem:[#allocation2 + $0x19] sm:$0xff] %vm56_vm0, %v102_v9  ;;  %136 = vst.msk [vmem:[#allocation2 + $0x21] sm:$0xff] %vm56_vm0, %v103_v10  ;;  %p3870_p10 = scmp.ne.s32.totalorder %s3459_s21, %s3869_s22  ;;  %p3875_p12 = scmp.lt.s32.totalorder %s3869_s22, %s3869_s22 }
  0x4d   :  { %137 = vst.msk [vmem:[#allocation2 + $0x31] sm:$0xff] %vm56_vm0, %v104_v11  ;;  %138 = vst.msk [vmem:[#allocation2 + $0x39] sm:$0xff] %vm56_vm0, %v105_v12  ;;  %v1429_v11 = vld [vmem:[#allocation5 + $0x130] sm:$0xff] }
  0x4e   :  { %204 = vst.msk [vmem:[#allocation3 + $0x8] sm:$0xff] %vm56_vm0, %v4026_v17  ;;  %139 = vst.msk [vmem:[#allocation2 + $0x49] sm:$0xff] %vm56_vm0, %v106_v39  ;;  %p3876_p13 = por %p3875_p12, %p3874_p11 }
  0x4f   :  { %140 = vst.msk [vmem:[#allocation2 + $0x51] sm:$0xff] %vm56_vm0, %v107_v41  ;;  %141 = vst.msk [vmem:[#allocation2 + $0x61] sm:$0xff] %vm56_vm0, %v108_v43 }
  0x50   :  { %v4040_v33 = vld [vmem:[#allocation2 + $0x9] sm:$0xff]  ;;  %142 = vst.msk [vmem:[#allocation2 + $0x69] sm:$0xff] %vm56_vm0, %v109_v44  ;;  %143 = vst.msk [vmem:[#allocation2 + $0x79] sm:$0xff] %vm56_vm0, %v110_v47  ;;  %p3877_p0 = pnand %p3876_p13, %p3870_p10 }
  0x51   :  { %v4022_v13 = vld [vmem:[#allocation2] sm:$0xff]  ;;  %144 = vst.msk [vmem:[#allocation2 + $0x81] sm:$0xff] %vm56_vm0, %v111_v51  ;;  %v4088_v63 = vld [vmem:[#allocation2 + $0xa] sm:$0xff] }
  0x52   :  { %203 = vst.msk [vmem:[#allocation3] sm:$0xff] %vm56_vm0, %v4022_v13 }
  0x53   :  { %v169_v22 = vld [vmem:[#allocation2 + $0x18] sm:$0xff]  ;;  %v170_v26 = vld [vmem:[#allocation2 + $0x20] sm:$0xff] }
  0x54   :  { %v546_v23 = vld [vmem:[#allocation2 + $0x19] sm:$0xff]  ;;  %v171_v27 = vld [vmem:[#allocation2 + $0x30] sm:$0xff]  ;;  %205 = vst.msk [vmem:[#allocation3 + $0x10] sm:$0xff] %vm56_vm0, %v169_v22  ;;  %206 = vst.msk [vmem:[#allocation3 + $0x18] sm:$0xff] %vm56_vm0, %v170_v26 }
  0x55   :  { %v172_v28 = vld [vmem:[#allocation2 + $0x38] sm:$0xff]  ;;  %207 = vst.msk [vmem:[#allocation3 + $0x20] sm:$0xff] %vm56_vm0, %v171_v27  ;;  %v547_v35 = vld [vmem:[#allocation2 + $0x21] sm:$0xff]  ;;  %v4098_v10 = vld [vmem:[#allocation2 + $0x49] sm:$0xff] }
  0x56   :  { %v548_v31 = vld [vmem:[#allocation2 + $0x31] sm:$0xff]  ;;  %v4036_v32 = vld [vmem:[#allocation2 + $0x1a] sm:$0xff]  ;;  %208 = vst.msk [vmem:[#allocation3 + $0x28] sm:$0xff] %vm56_vm0, %v172_v28  ;;  %v4048_v37 = vld [vmem:[#allocation2 + $0x22] sm:$0xff] }
  0x57   :  { %v4044_v34 = vld [vmem:[#allocation2 + $0x32] sm:$0xff]  ;;  %1455 = vst.msk [vmem:[#allocation2 + $0x19] sm:$0xff] %vm56_vm0, %v1423_v20  ;;  %v4050_v38 = vld [vmem:[#allocation2 + $0x3a] sm:$0xff]  ;;  %1456 = vst.msk [vmem:[#allocation2 + $0x21] sm:$0xff] %vm56_vm0, %v1424_v24 }
  0x58   :  { %v549_v36 = vld [vmem:[#allocation2 + $0x39] sm:$0xff]  ;;  %1457 = vst.msk [vmem:[#allocation2 + $0x31] sm:$0xff] %vm56_vm0, %v1425_v21  ;;  %v173_v8 = vld [vmem:[#allocation2 + $0x48] sm:$0xff]  ;;  %v174_v9 = vld [vmem:[#allocation2 + $0x50] sm:$0xff] }
  0x59   :  { %v239_v29 = vld [vmem:[#allocation3] sm:$0xff]  ;;  %1458 = vst.msk [vmem:[#allocation2 + $0x39] sm:$0xff] %vm56_vm0, %v1426_v25  ;;  %v240_v42 = vld [vmem:[#allocation3 + $0x8] sm:$0xff]  ;;  %209 = vst.msk [vmem:[#allocation3 + $0x30] sm:$0xff] %vm56_vm0, %v173_v8 }
  0x5a   :  { %580 = vst.msk [vmem:[#allocation3] sm:$0xff] %vm56_vm0, %v4028_v19  ;;  %v276_v45 = vmul.f32 %v4034_v30, %v239_v29  ;;  %581 = vst.msk [vmem:[#allocation3 + $0x8] sm:$0xff] %vm56_vm0, %v4040_v33  ;;  %v277_v50 = vmul.f32 %v4034_v30, %v240_v42  ;;  %v4103_v15 = vld [vmem:[#allocation2 + $0x4a] sm:$0xff]  ;;  %v4113_v22 = vld [vmem:[#allocation8 + $0x2] ss:$0 sm:$0xff] }
  0x5b   :  { %v241_v48 = vld [vmem:[#allocation3 + $0x10] sm:$0xff]  ;;  %v242_v54 = vld [vmem:[#allocation3 + $0x18] sm:$0xff]  ;;  %210 = vst.msk [vmem:[#allocation3 + $0x38] sm:$0xff] %vm56_vm0, %v174_v9  ;;  %v4106_v16 = vld [vmem:[#allocation2 + $0x51] sm:$0xff] }
  0x5c   :  { %v4069_v52 = vld [vmem:[#allocation3 + $0x20] sm:$0xff]  ;;  %v346_v53 = vmul.f32 %v4052_v40, %v241_v48  ;;  %582 = vst.msk [vmem:[#allocation3 + $0x10] sm:$0xff] %vm56_vm0, %v546_v23  ;;  %v347_v58 = vmul.f32 %v4052_v40, %v242_v54  ;;  %583 = vst.msk [vmem:[#allocation3 + $0x18] sm:$0xff] %vm56_vm0, %v547_v35  ;;  %v278_v25 = vmul.f32 %v4034_v30, %v241_v48  ;;  %v175_v41 = vld [vmem:[#allocation2 + $0x60] sm:$0xff] }
  0x5d   :  { %v4073_v55 = vld [vmem:[#allocation3 + $0x28] sm:$0xff]  ;;  %v448_v56 = vmul.f32 %v4059_v46, %v4069_v52  ;;  %584 = vst.msk [vmem:[#allocation3 + $0x20] sm:$0xff] %vm56_vm0, %v548_v31  ;;  %v348_v26 = vmul.f32 %v4052_v40, %v4069_v52  ;;  %1459 = vst.msk [vmem:[#allocation2 + $0x49] sm:$0xff] %vm56_vm0, %v1427_v5  ;;  %v279_v27 = vmul.f32 %v4034_v30, %v242_v54  ;;  %v1431_v28 = vld [vmem:[#allocation5 + $0x140] sm:$0xff] }
  0x5e   :  { %v449_v59 = vmul.f32 %v4059_v46, %v4073_v55  ;;  %585 = vst.msk [vmem:[#allocation3 + $0x28] sm:$0xff] %vm56_vm0, %v549_v36  ;;  %v378_v60 = vadd.f32 %v346_v53, %v276_v45  ;;  %v379_v62 = vadd.f32 %v347_v58, %v277_v50  ;;  %v349_v36 = vmul.f32 %v4052_v40, %v4073_v55  ;;  %v4135_v39 = vld [vmem:[#allocation2 + $0x52] sm:$0xff]  ;;  %v4146_v44 = vld [vmem:[#allocation2 + $0x62] sm:$0xff]  ;;  %v4154_v50 = vld [vmem:[#allocation2 + $0x6a] sm:$0xff] }
  0x5f   :  { %1460 = vst.msk [vmem:[#allocation2 + $0x51] sm:$0xff] %vm56_vm0, %v1428_v6  ;;  %211 = vst.msk [vmem:[#allocation3 + $0x40] sm:$0xff] %vm56_vm0, %v175_v41  ;;  %v4148_v45 = vld [vmem:[#allocation8 + $0x5] ss:$0 sm:$0xff]  ;;  %v1489_v47 = vld [vmem:[#allocation2 + $0x18] sm:$0xff]  ;;  %v380_v58 = vadd.f32 %v348_v26, %v278_v25 }
  0x60   :  { %v480_v0 = vadd.f32 %v448_v56, %v378_v60  ;;  %v481_v3 = vadd.f32 %v449_v59, %v379_v62  ;;  %v177_v51 = vld [vmem:[#allocation2 + $0x78] sm:$0xff]  ;;  %v1491_v56 = vld [vmem:[#allocation2 + $0x30] sm:$0xff]  ;;  %v280_v59 = vmul.f32 %v4034_v30, %v4069_v52  ;;  %v4162_v60 = vmul.f32 %v4034_v30, %v4073_v55  ;;  %v178_v62 = vld [vmem:[#allocation2 + $0x80] sm:$0xff] }
  0x61   :  { %v616_v57 = vld [vmem:[#allocation3] sm:$0xff]  ;;  %v617_v4 = vld [vmem:[#allocation3 + $0x8] sm:$0xff]  ;;  %213 = vst.msk [vmem:[#allocation3 + $0x50] sm:$0xff] %vm56_vm0, %v177_v51  ;;  %v381_v52 = vadd.f32 %v349_v36, %v279_v27  ;;  %214 = vst.msk [vmem:[#allocation3 + $0x58] sm:$0xff] %vm56_vm0, %v178_v62 }
  0x62   :  { %1019 = vst.msk [vmem:[#allocation3] sm:$0xff] %vm56_vm0, %v4065_v49  ;;  %512 = vst.msk [vmem:[#allocation4] sm:$0xff] %vm56_vm0, %v480_v0  ;;  %v653_v7 = vmul.f32 %v4086_v61, %v616_v57  ;;  %v654_v14 = vmul.f32 %v4086_v61, %v617_v4  ;;  %v4156_v54 = vld [vmem:[#allocation8 + $0x8] ss:$0 sm:$0xff]  ;;  %v1490_v57 = vld [vmem:[#allocation2 + $0x20] sm:$0xff] }
  0x63   :  { %1020 = vst.msk [vmem:[#allocation3 + $0x8] sm:$0xff] %vm56_vm0, %v4088_v63  ;;  %v618_v12 = vld [vmem:[#allocation3 + $0x10] sm:$0xff]  ;;  %513 = vst.msk [vmem:[#allocation4 + $0x8] sm:$0xff] %vm56_vm0, %v481_v3  ;;  %v619_v23 = vld [vmem:[#allocation3 + $0x18] sm:$0xff] }
  0x64   :  { %v4108_v20 = vld [vmem:[#allocation3 + $0x20] sm:$0xff]  ;;  %v722_v21 = vmul.f32 %v4090_v1, %v618_v12  ;;  %1021 = vst.msk [vmem:[#allocation3 + $0x10] sm:$0xff] %vm56_vm0, %v4036_v32  ;;  %v723_v32 = vmul.f32 %v4090_v1, %v619_v23  ;;  %1022 = vst.msk [vmem:[#allocation3 + $0x18] sm:$0xff] %vm56_vm0, %v4048_v37  ;;  %v176_v37 = vld [vmem:[#allocation2 + $0x68] sm:$0xff]  ;;  %v656_v9 = vmul.f32 %v4086_v61, %v619_v23 }
  0x65   :  { %v4115_v24 = vld [vmem:[#allocation3 + $0x28] sm:$0xff]  ;;  %v823_v29 = vmul.f32 %v4092_v2, %v4108_v20  ;;  %1023 = vst.msk [vmem:[#allocation3 + $0x20] sm:$0xff] %vm56_vm0, %v4044_v34  ;;  %v655_v34 = vmul.f32 %v4086_v61, %v618_v12  ;;  %v724_v43 = vmul.f32 %v4090_v1, %v4108_v20  ;;  %212 = vst.msk [vmem:[#allocation3 + $0x48] sm:$0xff] %vm56_vm0, %v176_v37 }
  0x66   :  { %v824_v35 = vmul.f32 %v4092_v2, %v4115_v24  ;;  %1024 = vst.msk [vmem:[#allocation3 + $0x28] sm:$0xff] %vm56_vm0, %v4050_v38  ;;  %v754_v42 = vadd.f32 %v722_v21, %v653_v7  ;;  %v4144_v38 = vld [vmem:[#allocation2 + $0x61] sm:$0xff]  ;;  %v755_v48 = vadd.f32 %v723_v32, %v654_v14  ;;  %v4166_v0 = vld [vmem:[#allocation2 + $0x79] sm:$0xff]  ;;  %v725_v25 = vmul.f32 %v4090_v1, %v4115_v24  ;;  %v4218_v51 = vld [vmem:[#allocation3 + $0x40] sm:$0xff] }
  0x67   :  { %1461 = vst.msk [vmem:[#allocation2 + $0x61] sm:$0xff] %vm56_vm0, %v1429_v11  ;;  %v4168_v3 = vld [vmem:[#allocation2 + $0x7a] sm:$0xff]  ;;  %v4179_v21 = vld [vmem:[#allocation3 + $0x38] sm:$0xff]  ;;  %6558 = vst [vmem:[#allocation15_spill] sm:$0xff] %v4218_v51 }
  0x68   :  { %v855_v53 = vadd.f32 %v823_v29, %v754_v42  ;;  %v856_v6 = vadd.f32 %v824_v35, %v755_v48  ;;  %v1492_v8 = vld [vmem:[#allocation2 + $0x38] sm:$0xff]  ;;  %1463 = vst.msk [vmem:[#allocation2 + $0x79] sm:$0xff] %vm56_vm0, %v1431_v28  ;;  %v245_v14 = vld [vmem:[#allocation3 + $0x30] sm:$0xff]  ;;  %v451_v28 = vmul.f32 %v4059_v46, %v4179_v21  ;;  %587 = vst.msk [vmem:[#allocation3 + $0x38] sm:$0xff] %vm56_vm0, %v4106_v16 }
  0x69   :  { %v1055_v31 = vld [vmem:[#allocation3] sm:$0xff]  ;;  %v450_v27 = vmul.f32 %v4059_v46, %v245_v14  ;;  %586 = vst.msk [vmem:[#allocation3 + $0x30] sm:$0xff] %vm56_vm0, %v4098_v10  ;;  %v4198_v10 = vmul.f32 %v4086_v61, %v4108_v20  ;;  %v351_v36 = vmul.f32 %v4052_v40, %v4179_v21  ;;  %v4204_v16 = vmul.f32 %v4086_v61, %v4115_v24 }
  0x6a   :  { %1523 = vst.msk [vmem:[#allocation3] sm:$0xff] %vm56_vm0, %v4022_v13  ;;  %v4152_v13 = vld [vmem:[#allocation2 + $0x69] sm:$0xff]  ;;  %v1092_v5 = vmul.f32 %v4113_v22, %v1055_v31  ;;  %v1056_v7 = vld [vmem:[#allocation3 + $0x8] sm:$0xff]  ;;  %v483_v48 = vadd.f32 %v451_v28, %v381_v52  ;;  %588 = vst.msk [vmem:[#allocation3 + $0x40] sm:$0xff] %vm56_vm0, %v4144_v38 }
  0x6b   :  { %1462 = vst.msk [vmem:[#allocation2 + $0x69] sm:$0xff] %vm56_vm0, %v1430_v18  ;;  %v887_v4 = vld [vmem:[#allocation4] sm:$0xff]  ;;  %v888_v11 = vld [vmem:[#allocation4 + $0x8] sm:$0xff]  ;;  %v1093_v12 = vmul.f32 %v4113_v22, %v1056_v7  ;;  %1524 = vst.msk [vmem:[#allocation3 + $0x8] sm:$0xff] %vm56_vm0, %v4026_v17  ;;  %v4177_v18 = vadd.f32 %v724_v43, %v655_v34  ;;  %v350_v17 = vmul.f32 %v4052_v40, %v245_v14 }
  0x6c   :  { %v919_v55 = vadd.f32 %v887_v4, %v855_v53  ;;  %v1057_v23 = vld [vmem:[#allocation3 + $0x10] sm:$0xff]  ;;  %v920_v26 = vadd.f32 %v888_v11, %v856_v6  ;;  %v1059_v29 = vld [vmem:[#allocation3 + $0x20] sm:$0xff]  ;;  %v1058_v32 = vld [vmem:[#allocation3 + $0x18] sm:$0xff]  ;;  %v482_v43 = vadd.f32 %v450_v27, %v380_v58  ;;  %515 = vst.msk [vmem:[#allocation4 + $0x18] sm:$0xff] %vm56_vm0, %v483_v48  ;;  %v757_v7 = vadd.f32 %v725_v25, %v656_v9 }
  0x6d   :  { %v1161_v31 = vmul.f32 %v4148_v45, %v1057_v23  ;;  %1525 = vst.msk [vmem:[#allocation3 + $0x10] sm:$0xff] %vm56_vm0, %v1489_v47  ;;  %v4194_v35 = vld [vmem:[#allocation3 + $0x28] sm:$0xff]  ;;  %v1262_v41 = vmul.f32 %v4156_v54, %v1059_v29  ;;  %1527 = vst.msk [vmem:[#allocation3 + $0x20] sm:$0xff] %vm56_vm0, %v1491_v56  ;;  %v1162_v42 = vmul.f32 %v4148_v45, %v1058_v32  ;;  %v1865_v6 = vld [vmem:[#allocation2 + $0x21] sm:$0xff] }
  0x6e   :  { %951 = vst.msk [vmem:[#allocation4] sm:$0xff] %vm56_vm0, %v919_v55  ;;  %952 = vst.msk [vmem:[#allocation4 + $0x8] sm:$0xff] %vm56_vm0, %v920_v26  ;;  %v1263_v34 = vmul.f32 %v4156_v54, %v4194_v35  ;;  %v1094_v24 = vmul.f32 %v4113_v22, %v1057_v23  ;;  %v1163_v47 = vmul.f32 %v4148_v45, %v1059_v29  ;;  %v1864_v4 = vld [vmem:[#allocation2 + $0x19] sm:$0xff]  ;;  %v555_v9 = vld [vmem:[#allocation2 + $0x81] sm:$0xff] }
  0x6f   :  { %1526 = vst.msk [vmem:[#allocation3 + $0x18] sm:$0xff] %vm56_vm0, %v1490_v57  ;;  %1528 = vst.msk [vmem:[#allocation3 + $0x28] sm:$0xff] %vm56_vm0, %v1492_v8  ;;  %v1193_v37 = vadd.f32 %v1161_v31, %v1092_v5  ;;  %v1194_v53 = vadd.f32 %v1162_v42, %v1093_v12  ;;  %v1095_v56 = vmul.f32 %v4113_v22, %v1058_v32  ;;  %v1866_v5 = vld [vmem:[#allocation2 + $0x31] sm:$0xff]  ;;  %v4240_v23 = vld [vmem:[#allocation3 + $0x50] sm:$0xff] }
  0x70   :  { %514 = vst.msk [vmem:[#allocation4 + $0x10] sm:$0xff] %vm56_vm0, %v482_v43  ;;  %v1164_v57 = vmul.f32 %v4148_v45, %v4194_v35  ;;  %v382_v58 = vadd.f32 %v350_v17, %v280_v59  ;;  %v452_v8 = vmul.f32 %v4059_v46, %v4218_v51  ;;  %v4234_v59 = vmul.f32 %v4034_v30, %v245_v14  ;;  %v1432_v25 = vld [vmem:[#allocation5 + $0x148] sm:$0xff]  ;;  %v4248_v27 = vld [vmem:[#allocation3 + $0x38] sm:$0xff] }
  0x71   :  { %v1559_v20 = vld [vmem:[#allocation3] sm:$0xff]  ;;  %v1294_v62 = vadd.f32 %v1262_v41, %v1193_v37  ;;  %v1295_v52 = vadd.f32 %v1263_v34, %v1194_v53  ;;  %v383_v11 = vadd.f32 %v351_v36, %v4162_v60  ;;  %6559 = vst [vmem:[#allocation16_spill] sm:$0xff] %v4240_v23  ;;  %v1867_v26 = vld [vmem:[#allocation2 + $0x39] sm:$0xff]  ;;  %v4246_v14 = vadd.f32 %v1163_v47, %v1094_v24  ;;  %v4266_v42 = vld [vmem:[#allocation3 + $0x58] sm:$0xff] }
  0x72   :  { %1898 = vst.msk [vmem:[#allocation3] sm:$0xff] %vm56_vm0, %v4028_v19  ;;  %v4226_v19 = vld [vmem:[#allocation3 + $0x48] sm:$0xff]  ;;  %v1596_v38 = vmul.f32 %v4034_v30, %v1559_v20  ;;  %v4250_v28 = vadd.f32 %v1164_v57, %v1095_v56  ;;  %v484_v60 = vadd.f32 %v452_v8, %v382_v58  ;;  %v4253_v17 = vmul.f32 %v4113_v22, %v1059_v29  ;;  %v4287_v58 = vld [vmem:[#allocation2 + $0x82] sm:$0xff] }
  0x73   :  { %589 = vst.msk [vmem:[#allocation3 + $0x48] sm:$0xff] %vm56_vm0, %v4152_v13  ;;  %v1560_v55 = vld [vmem:[#allocation3 + $0x8] sm:$0xff]  ;;  %v453_v12 = vmul.f32 %v4059_v46, %v4226_v19  ;;  %v4244_v13 = vld [vmem:[#allocation3 + $0x30] sm:$0xff]  ;;  %590 = vst.msk [vmem:[#allocation3 + $0x50] sm:$0xff] %vm56_vm0, %v4166_v0  ;;  %v826_v41 = vmul.f32 %v4092_v2, %v4248_v27 }
  0x74   :  { %1899 = vst.msk [vmem:[#allocation3 + $0x8] sm:$0xff] %vm56_vm0, %v4040_v33  ;;  %v1561_v32 = vld [vmem:[#allocation3 + $0x10] sm:$0xff]  ;;  %v1597_v36 = vmul.f32 %v4034_v30, %v1560_v55  ;;  %v825_v33 = vmul.f32 %v4092_v2, %v4244_v13  ;;  %1025 = vst.msk [vmem:[#allocation3 + $0x30] sm:$0xff] %vm56_vm0, %v4103_v15  ;;  %v4268_v20 = vld [vmem:[#allocation3 + $0x20] sm:$0xff]  ;;  %v726_v15 = vmul.f32 %v4090_v1, %v4244_v13 }
  0x75   :  { %v1326_v31 = vld [vmem:[#allocation4] sm:$0xff]  ;;  %1026 = vst.msk [vmem:[#allocation3 + $0x38] sm:$0xff] %vm56_vm0, %v4135_v39  ;;  %v485_v29 = vadd.f32 %v453_v12, %v383_v11  ;;  %v1327_v34 = vld [vmem:[#allocation4 + $0x8] sm:$0xff]  ;;  %v1665_v43 = vmul.f32 %v4052_v40, %v1561_v32  ;;  %1900 = vst.msk [vmem:[#allocation3 + $0x10] sm:$0xff] %vm56_vm0, %v1864_v4  ;;  %v727_v39 = vmul.f32 %v4090_v1, %v4248_v27 }
  0x76   :  { %v1358_v0 = vadd.f32 %v1326_v31, %v1294_v62  ;;  %v1562_v37 = vld [vmem:[#allocation3 + $0x18] sm:$0xff]  ;;  %516 = vst.msk [vmem:[#allocation4 + $0x20] sm:$0xff] %vm56_vm0, %v484_v60  ;;  %591 = vst.msk [vmem:[#allocation3 + $0x58] sm:$0xff] %vm56_vm0, %v555_v9  ;;  %v1359_v24 = vadd.f32 %v1327_v34, %v1295_v52  ;;  %v1766_v47 = vmul.f32 %v4059_v46, %v4268_v20  ;;  %v4281_v53 = vld [vmem:[#allocation3 + $0x28] sm:$0xff] }
  0x77   :  { %1902 = vst.msk [vmem:[#allocation3 + $0x20] sm:$0xff] %vm56_vm0, %v1866_v5  ;;  %v1666_v56 = vmul.f32 %v4052_v40, %v1562_v37  ;;  %1901 = vst.msk [vmem:[#allocation3 + $0x18] sm:$0xff] %vm56_vm0, %v1865_v6  ;;  %v857_v57 = vadd.f32 %v825_v33, %v4177_v18  ;;  %v1697_v62 = vadd.f32 %v1665_v43, %v1596_v38  ;;  %v889_v5 = vld [vmem:[#allocation4 + $0x10] sm:$0xff]  ;;  %v4296_v18 = vld [vmem:[#allocation3 + $0x40] sm:$0xff] }
  0x78   :  { %517 = vst.msk [vmem:[#allocation4 + $0x28] sm:$0xff] %vm56_vm0, %v485_v29  ;;  %1390 = vst.msk [vmem:[#allocation4] sm:$0xff] %vm56_vm0, %v1358_v0  ;;  %v1767_v4 = vmul.f32 %v4059_v46, %v4281_v53  ;;  %v858_v8 = vadd.f32 %v826_v41, %v757_v7  ;;  %v1598_v6 = vmul.f32 %v4034_v30, %v1561_v32  ;;  %v2303_v52 = vld [vmem:[#allocation2 + $0x1a] sm:$0xff]  ;;  %v890_v11 = vld [vmem:[#allocation4 + $0x18] sm:$0xff] }
  0x79   :  { %v1934_v48 = vld [vmem:[#allocation3] sm:$0xff]  ;;  %1903 = vst.msk [vmem:[#allocation3 + $0x28] sm:$0xff] %vm56_vm0, %v1867_v26  ;;  %1464 = vst.msk [vmem:[#allocation2 + $0x81] sm:$0xff] %vm56_vm0, %v1432_v25  ;;  %v1698_v38 = vadd.f32 %v1666_v56, %v1597_v36  ;;  %v921_v55 = vadd.f32 %v889_v5, %v857_v57  ;;  %v1599_v12 = vmul.f32 %v4034_v30, %v1562_v37  ;;  %v112_v9 = vld [vmem:[#allocation5 + $0x50] sm:$0xff] }
  0x7a   :  { %2337 = vst.msk [vmem:[#allocation3] sm:$0xff] %vm56_vm0, %v4065_v49  ;;  %1391 = vst.msk [vmem:[#allocation4 + $0x8] sm:$0xff] %vm56_vm0, %v1359_v24  ;;  %v1667_v49 = vmul.f32 %v4052_v40, %v4268_v20  ;;  %v4305_v7 = vld [vmem:[#allocation3 + $0x48] sm:$0xff]  ;;  %v1798_v26 = vadd.f32 %v1766_v47, %v1697_v62  ;;  %v2304_v25 = vld [vmem:[#allocation2 + $0x22] sm:$0xff]  ;;  %v922_v32 = vadd.f32 %v890_v11, %v858_v8 }
  0x7b   :  { %1027 = vst.msk [vmem:[#allocation3 + $0x40] sm:$0xff] %vm56_vm0, %v4146_v44  ;;  %v2305_v60 = vld [vmem:[#allocation2 + $0x32] sm:$0xff]  ;;  %v1493_v31 = vld [vmem:[#allocation2 + $0x48] sm:$0xff]  ;;  %v1668_v36 = vmul.f32 %v4052_v40, %v4281_v53  ;;  %v758_v41 = vadd.f32 %v726_v15, %v4198_v10  ;;  %1028 = vst.msk [vmem:[#allocation3 + $0x48] sm:$0xff] %vm56_vm0, %v4154_v50  ;;  %v1799_v44 = vadd.f32 %v1767_v4, %v1698_v38 }
  0x7c   :  { %v1494_v33 = vld [vmem:[#allocation2 + $0x50] sm:$0xff]  ;;  %v113_v29 = vld [vmem:[#allocation5 + $0x58] sm:$0xff]  ;;  %145 = vst.msk [vmem:[#allocation2 + $0x91] sm:$0xff] %vm56_vm0, %v112_v9  ;;  %v1935_v0 = vld [vmem:[#allocation3 + $0x8] sm:$0xff]  ;;  %v827_v43 = vmul.f32 %v4092_v2, %v4296_v18  ;;  %v759_v37 = vadd.f32 %v727_v39, %v4204_v16  ;;  %v4319_v24 = vmul.f32 %v4113_v22, %v4194_v35  ;;  %v1971_v15 = vmul.f32 %v4086_v61, %v1934_v48 }
  0x7d   :  { %v2306_v34 = vld [vmem:[#allocation2 + $0x3a] sm:$0xff]  ;;  %953 = vst.msk [vmem:[#allocation4 + $0x10] sm:$0xff] %vm56_vm0, %v921_v55  ;;  %146 = vst.msk [vmem:[#allocation2 + $0x99] sm:$0xff] %vm56_vm0, %v113_v29  ;;  %v114_v50 = vld [vmem:[#allocation5 + $0x60] sm:$0xff]  ;;  %v4333_v35 = vadd.f32 %v1667_v49, %v1598_v6  ;;  %v828_v56 = vmul.f32 %v4092_v2, %v4305_v7  ;;  %v4339_v57 = vmul.f32 %v4052_v40, %v4218_v51 }
  0x7e   :  { %v4321_v10 = vld [vmem:[#allocation3 + $0x50] sm:$0xff]  ;;  %1830 = vst.msk [vmem:[#allocation4 + $0x100] sm:$0xff] %vm56_vm0, %v1798_v26  ;;  %2338 = vst.msk [vmem:[#allocation3 + $0x8] sm:$0xff] %vm56_vm0, %v4088_v63  ;;  %v4331_v16 = vld [vmem:[#allocation3 + $0x38] sm:$0xff]  ;;  %v1972_v62 = vmul.f32 %v4086_v61, %v1935_v0  ;;  %v859_v8 = vadd.f32 %v827_v43, %v758_v41  ;;  %v4360_v9 = vadd.f32 %v1668_v36, %v1599_v12 }
  0x7f   :  { %6560 = vst [vmem:[#allocation17_spill] sm:$0xff] %v4321_v10  ;;  %v4328_v47 = vld [vmem:[#allocation3 + $0x30] sm:$0xff]  ;;  %954 = vst.msk [vmem:[#allocation4 + $0x18] sm:$0xff] %vm56_vm0, %v922_v32  ;;  %v115_v63 = vld [vmem:[#allocation5 + $0x68] sm:$0xff]  ;;  %v1265_v5 = vmul.f32 %v4156_v54, %v4331_v16  ;;  %v860_v36 = vadd.f32 %v828_v56, %v759_v37 }
  0x80   :  { %6561 = vst [vmem:[#allocation18_spill] sm:$0xff] %v4331_v16  ;;  %v1495_v39 = vld [vmem:[#allocation2 + $0x60] sm:$0xff]  ;;  %1029 = vst.msk [vmem:[#allocation3 + $0x50] sm:$0xff] %vm56_vm0, %v4168_v3  ;;  %v1264_v4 = vmul.f32 %v4156_v54, %v4328_v47  ;;  %v1496_v3 = vld [vmem:[#allocation2 + $0x68] sm:$0xff] }
  0x81   :  { %147 = vst.msk [vmem:[#allocation2 + $0xa9] sm:$0xff] %vm56_vm0, %v114_v50  ;;  %v1936_v48 = vld [vmem:[#allocation3 + $0x10] sm:$0xff]  ;;  %1831 = vst.msk [vmem:[#allocation4 + $0x108] sm:$0xff] %vm56_vm0, %v1799_v44  ;;  %v4352_v6 = vld [vmem:[#allocation3 + $0x58] sm:$0xff] }
  0x82   :  { %1529 = vst.msk [vmem:[#allocation3 + $0x30] sm:$0xff] %vm56_vm0, %v1493_v31  ;;  %1530 = vst.msk [vmem:[#allocation3 + $0x38] sm:$0xff] %vm56_vm0, %v1494_v33  ;;  %v4355_v38 = vld [vmem:[#allocation3 + $0x20] sm:$0xff]  ;;  %v2040_v55 = vmul.f32 %v4090_v1, %v1936_v48  ;;  %v1937_v11 = vld [vmem:[#allocation3 + $0x18] sm:$0xff]  ;;  %v1973_v49 = vmul.f32 %v4086_v61, %v1936_v48  ;;  %v1165_v31 = vmul.f32 %v4148_v45, %v4328_v47 }
  0x83   :  { %6562 = vst [vmem:[#allocation19_spill] sm:$0xff] %v4352_v6  ;;  %148 = vst.msk [vmem:[#allocation2 + $0xb1] sm:$0xff] %vm56_vm0, %v115_v63  ;;  %v891_v26 = vld [vmem:[#allocation4 + $0x20] sm:$0xff]  ;;  %v2141_v33 = vmul.f32 %v4092_v2, %v4355_v38  ;;  %v2041_v29 = vmul.f32 %v4090_v1, %v1937_v11  ;;  %v1296_v12 = vadd.f32 %v1264_v4, %v4246_v14  ;;  %v2741_v44 = vld [vmem:[#allocation4 + $0x8] sm:$0xff] }
  0x84   :  { %2339 = vst.msk [vmem:[#allocation3 + $0x10] sm:$0xff] %vm56_vm0, %v2303_v52  ;;  %1030 = vst.msk [vmem:[#allocation3 + $0x58] sm:$0xff] %vm56_vm0, %v4287_v58  ;;  %v2740_v32 = vld [vmem:[#allocation4] sm:$0xff]  ;;  %v4369_v52 = vld [vmem:[#allocation3 + $0x28] sm:$0xff]  ;;  %v2072_v58 = vadd.f32 %v2040_v55, %v1971_v15  ;;  %v2042_v50 = vmul.f32 %v4090_v1, %v4355_v38  ;;  %v923_v56 = vadd.f32 %v891_v26, %v859_v8 }
  0x85   :  { %2341 = vst.msk [vmem:[#allocation3 + $0x20] sm:$0xff] %vm56_vm0, %v2305_v60  ;;  %v2373_v41 = vld [vmem:[#allocation3] sm:$0xff]  ;;  %2340 = vst.msk [vmem:[#allocation3 + $0x18] sm:$0xff] %vm56_vm0, %v2304_v25  ;;  %3641 = vmatprep.mubr.msk.f32.mxu0 %vm56_vm0, %v2740_v32  ;;  %v2142_v0 = vmul.f32 %v4092_v2, %v4369_v52  ;;  %v1297_v60 = vadd.f32 %v1265_v5, %v4250_v28  ;;  %v892_v25 = vld [vmem:[#allocation4 + $0x28] sm:$0xff]  ;;  %v2073_v14 = vadd.f32 %v2041_v29, %v1972_v62 }
  0x86   :  { %2342 = vst.msk [vmem:[#allocation3 + $0x28] sm:$0xff] %vm56_vm0, %v2306_v34  ;;  %v1868_v43 = vld [vmem:[#allocation2 + $0x49] sm:$0xff]  ;;  %3642 = vmatmul.mubr.msk.f32.vlgmr.msra.gmra.mrb[0].mxu0 %vm56_vm0, %v2741_v44  ;;  %v1869_v37 = vld [vmem:[#allocation2 + $0x51] sm:$0xff]  ;;  %v1166_v34 = vmul.f32 %v4148_v45, %v4331_v16  ;;  %v4391_v28 = vmul.f32 %v4034_v30, %v4268_v20  ;;  %v2173_v4 = vadd.f32 %v2141_v33, %v2072_v58  ;;  %v1328_v55 = vld [vmem:[#allocation4 + $0x10] sm:$0xff] }
  0x87   :  { %v4381_v63 = vld [vmem:[#allocation3 + $0x40] sm:$0xff]  ;;  %v4385_v15 = vld [vmem:[#allocation3 + $0x48] sm:$0xff]  ;;  %v2410_v5 = vmul.f32 %v4113_v22, %v2373_v41  ;;  %v1974_v62 = vmul.f32 %v4086_v61, %v1937_v11  ;;  %v1197_v8 = vadd.f32 %v1165_v31, %v4253_v17  ;;  %v2174_v29 = vadd.f32 %v2142_v0, %v2073_v14  ;;  %v1329_v16 = vld [vmem:[#allocation4 + $0x18] sm:$0xff]  ;;  %955 = vst.msk [vmem:[#allocation4 + $0x20] sm:$0xff] %vm56_vm0, %v923_v56 }
  0x88   :  { %1531 = vst.msk [vmem:[#allocation3 + $0x40] sm:$0xff] %vm56_vm0, %v1495_v39  ;;  %6563 = vst [vmem:[#allocation20_spill] sm:$0xff] %v4385_v15  ;;  %v1497_v48 = vld [vmem:[#allocation2 + $0x78] sm:$0xff]  ;;  %v1498_v39 = vld [vmem:[#allocation2 + $0x80] sm:$0xff]  ;;  %v1360_v51 = vadd.f32 %v1328_v55, %v1296_v12  ;;  %v1266_v20 = vmul.f32 %v4156_v54, %v4381_v63  ;;  %v924_v33 = vadd.f32 %v892_v25, %v860_v36 }
  0x89   :  { %1532 = vst.msk [vmem:[#allocation3 + $0x48] sm:$0xff] %vm56_vm0, %v1496_v3  ;;  %v179_v26 = vld [vmem:[#allocation2 + $0x90] sm:$0xff]  ;;  %v2374_v44 = vld [vmem:[#allocation3 + $0x8] sm:$0xff]  ;;  %v1433_v11 = vld [vmem:[#allocation5 + $0x150] sm:$0xff]  ;;  %v1361_v31 = vadd.f32 %v1329_v16, %v1297_v60  ;;  %v4403_v58 = vadd.f32 %v2042_v50, %v1973_v49  ;;  %v2043_v12 = vmul.f32 %v4090_v1, %v4369_v52 }
  0x8a   :  { %v2205_v32 = vld [vmem:[#allocation4 + $0x100] sm:$0xff]  ;;  %215 = vst.msk [vmem:[#allocation3 + $0x60] sm:$0xff] %vm56_vm0, %v179_v26  ;;  %v2206_v17 = vld [vmem:[#allocation4 + $0x108] sm:$0xff]  ;;  %v4401_v3 = vld [vmem:[#allocation3 + $0x30] sm:$0xff]  ;;  %v2411_v36 = vmul.f32 %v4113_v22, %v2374_v44 }
  0x8b   :  { %v2237_v41 = vadd.f32 %v2205_v32, %v2173_v4  ;;  %6564 = vst [vmem:[#allocation21_spill] sm:$0xff] %v4401_v3  ;;  %v4405_v0 = vld [vmem:[#allocation3 + $0x38] sm:$0xff]  ;;  %v2442_v55 = vld [vmem:[#allocation3 + $0x10] sm:$0xff]  ;;  %v2238_v6 = vadd.f32 %v2206_v17, %v2174_v29  ;;  %1392 = vst.msk [vmem:[#allocation4 + $0x10] sm:$0xff] %vm56_vm0, %v1360_v51  ;;  %v1768_v16 = vmul.f32 %v4059_v46, %v4401_v3 }
  0x8c   :  { %6565 = vst [vmem:[#allocation22_spill] sm:$0xff] %v4405_v0  ;;  %v1870_v14 = vld [vmem:[#allocation2 + $0x61] sm:$0xff]  ;;  %1904 = vst.msk [vmem:[#allocation3 + $0x30] sm:$0xff] %vm56_vm0, %v1868_v43  ;;  %v1769_v49 = vmul.f32 %v4059_v46, %v4405_v0  ;;  %v1871_v60 = vld [vmem:[#allocation2 + $0x69] sm:$0xff]  ;;  %v2479_v51 = vmul.f32 %v4148_v45, %v2442_v55  ;;  %v1198_v43 = vadd.f32 %v1166_v34, %v4319_v24 }
  0x8d   :  { %v1434_v56 = vld [vmem:[#allocation5 + $0x158] sm:$0xff]  ;;  %1905 = vst.msk [vmem:[#allocation3 + $0x38] sm:$0xff] %vm56_vm0, %v1869_v37  ;;  %956 = vst.msk [vmem:[#allocation4 + $0x28] sm:$0xff] %vm56_vm0, %v924_v33  ;;  %v4418_v50 = vld [vmem:[#allocation3 + $0x50] sm:$0xff]  ;;  %v1267_v37 = vmul.f32 %v4156_v54, %v4385_v15  ;;  %v1669_v32 = vmul.f32 %v4052_v40, %v4401_v3  ;;  %v1800_v24 = vadd.f32 %v1768_v16, %v4333_v35 }
  0x8e   :  { %6566 = vst [vmem:[#allocation23_spill] sm:$0xff] %v4418_v50  ;;  %v4420_v25 = vld [vmem:[#allocation3 + $0x58] sm:$0xff]  ;;  %2269 = vst.msk [vmem:[#allocation4 + $0x100] sm:$0xff] %vm56_vm0, %v2237_v41  ;;  %v4424_v4 = vld [vmem:[#allocation3 + $0x20] sm:$0xff]  ;;  %v1298_v34 = vadd.f32 %v1266_v20, %v1197_v8  ;;  %v1801_v50 = vadd.f32 %v1769_v49, %v4360_v9 }
  0x8f   :  { %6567 = vst [vmem:[#allocation24_spill] sm:$0xff] %v4420_v25  ;;  %v2443_v26 = vld [vmem:[#allocation3 + $0x18] sm:$0xff]  ;;  %1393 = vst.msk [vmem:[#allocation4 + $0x18] sm:$0xff] %vm56_vm0, %v1361_v31  ;;  %v180_v29 = vld [vmem:[#allocation2 + $0x98] sm:$0xff]  ;;  %v2580_v44 = vmul.f32 %v4156_v54, %v4424_v4  ;;  %v4462_v9 = vmul.f32 %v4148_v45, %v4424_v4  ;;  %v1299_v49 = vadd.f32 %v1267_v37, %v1198_v43 }
  0x90   :  { %1533 = vst.msk [vmem:[#allocation3 + $0x50] sm:$0xff] %vm56_vm0, %v1497_v48  ;;  %1534 = vst.msk [vmem:[#allocation3 + $0x58] sm:$0xff] %vm56_vm0, %v1498_v39  ;;  %v2480_v33 = vmul.f32 %v4148_v45, %v2443_v26  ;;  %v4438_v41 = vld [vmem:[#allocation3 + $0x28] sm:$0xff]  ;;  %v2511_v48 = vadd.f32 %v2479_v51, %v2410_v5  ;;  %v2307_v25 = vld [vmem:[#allocation2 + $0x4a] sm:$0xff]  ;;  %v4458_v5 = vmul.f32 %v4113_v22, %v2442_v55 }
  0x91   :  { %2270 = vst.msk [vmem:[#allocation4 + $0x108] sm:$0xff] %vm56_vm0, %v2238_v6  ;;  %v556_v17 = vld [vmem:[#allocation2 + $0x91] sm:$0xff]  ;;  %216 = vst.msk [vmem:[#allocation3 + $0x68] sm:$0xff] %vm56_vm0, %v180_v29  ;;  %v2581_v39 = vmul.f32 %v4156_v54, %v4438_v41  ;;  %v4447_v6 = vadd.f32 %v2043_v12, %v1974_v62  ;;  %v4452_v35 = vld [vmem:[#allocation2 + $0x99] sm:$0xff]  ;;  %v4465_v62 = vmul.f32 %v4113_v22, %v2443_v26 }
  0x92   :  { %v4441_v31 = vld [vmem:[#allocation2 + $0x92] sm:$0xff]  ;;  %v4454_v8 = vld [vmem:[#allocation2 + $0x9a] sm:$0xff]  ;;  %v2512_v20 = vadd.f32 %v2480_v33, %v2411_v36  ;;  %1832 = vst.msk [vmem:[#allocation4 + $0x110] sm:$0xff] %vm56_vm0, %v1800_v24  ;;  %v181_v12 = vld [vmem:[#allocation2 + $0xa8] sm:$0xff]  ;;  %v2612_v16 = vadd.f32 %v2580_v44, %v2511_v48  ;;  %v1701_v51 = vadd.f32 %v1669_v32, %v4391_v28  ;;  %v1975_v28 = vmul.f32 %v4086_v61, %v4355_v38 }
  0x93   :  { %v2308_v3 = vld [vmem:[#allocation2 + $0x52] sm:$0xff]  ;;  %1465 = vst.msk [vmem:[#allocation2 + $0x91] sm:$0xff] %vm56_vm0, %v1433_v11  ;;  %1466 = vst.msk [vmem:[#allocation2 + $0x99] sm:$0xff] %vm56_vm0, %v1434_v56  ;;  %v4489_v37 = vld [vmem:[#allocation2 + $0xaa] sm:$0xff]  ;;  %v1670_v38 = vmul.f32 %v4052_v40, %v4405_v0 }
  0x94   :  { %v4449_v15 = vld [vmem:[#allocation3 + $0x40] sm:$0xff]  ;;  %v4468_v11 = vld [vmem:[#allocation3 + $0x48] sm:$0xff]  ;;  %1833 = vst.msk [vmem:[#allocation4 + $0x118] sm:$0xff] %vm56_vm0, %v1801_v50  ;;  %217 = vst.msk [vmem:[#allocation3 + $0x70] sm:$0xff] %vm56_vm0, %v181_v12  ;;  %v2613_v56 = vadd.f32 %v2581_v39, %v2512_v20  ;;  %v4482_v50 = vmul.f32 %v4148_v45, %v4438_v41 }
  0x95   :  { %1906 = vst.msk [vmem:[#allocation3 + $0x40] sm:$0xff] %vm56_vm0, %v1870_v14  ;;  %6568 = vst [vmem:[#allocation25_spill] sm:$0xff] %v4468_v11  ;;  %v182_v36 = vld [vmem:[#allocation2 + $0xb0] sm:$0xff]  ;;  %v1770_v29 = vmul.f32 %v4059_v46, %v4449_v15  ;;  %v1872_v26 = vld [vmem:[#allocation2 + $0x79] sm:$0xff] }
  0x96   :  { %v1330_v55 = vld [vmem:[#allocation4 + $0x20] sm:$0xff]  ;;  %1907 = vst.msk [vmem:[#allocation3 + $0x48] sm:$0xff] %vm56_vm0, %v1871_v60  ;;  %v1873_v14 = vld [vmem:[#allocation2 + $0x81] sm:$0xff]  ;;  %218 = vst.msk [vmem:[#allocation3 + $0x78] sm:$0xff] %vm56_vm0, %v182_v36 }
  0x97   :  { %v4476_v33 = vld [vmem:[#allocation3 + $0x60] sm:$0xff]  ;;  %v1362_v43 = vadd.f32 %v1330_v55, %v1298_v34  ;;  %v2742_v44 = vld [vmem:[#allocation4 + $0x10] sm:$0xff]  ;;  %v4493_v48 = vld [vmem:[#allocation3 + $0x38] sm:$0xff]  ;;  %v1802_v39 = vadd.f32 %v1770_v29, %v1701_v51  ;;  %v1601_v34 = vmul.f32 %v4034_v30, %v4281_v53  ;;  %v1976_v51 = vmul.f32 %v4086_v61, %v4369_v52 }
  0x98   :  { %6569 = vst [vmem:[#allocation26_spill] sm:$0xff] %v4476_v33  ;;  %592 = vst.msk [vmem:[#allocation3 + $0x60] sm:$0xff] %vm56_vm0, %v556_v17  ;;  %v4487_v60 = vld [vmem:[#allocation2 + $0xa9] sm:$0xff]  ;;  %v4491_v24 = vld [vmem:[#allocation3 + $0x30] sm:$0xff]  ;;  %v1771_v17 = vmul.f32 %v4059_v46, %v4468_v11  ;;  %3644 = vmatprep.mubr.msk.f32.mxu0 %vm56_vm0, %v2742_v44  ;;  %v2144_v30 = vmul.f32 %v4092_v2, %v4493_v48 }
  0x99   :  { %v1435_v32 = vld [vmem:[#allocation5 + $0x160] sm:$0xff]  ;;  %v2309_v20 = vld [vmem:[#allocation2 + $0x62] sm:$0xff]  ;;  %v2143_v55 = vmul.f32 %v4092_v2, %v4491_v24  ;;  %2343 = vst.msk [vmem:[#allocation3 + $0x30] sm:$0xff] %vm56_vm0, %v2307_v25  ;;  %2344 = vst.msk [vmem:[#allocation3 + $0x38] sm:$0xff] %vm56_vm0, %v2308_v3  ;;  %v2044_v53 = vmul.f32 %v4090_v1, %v4491_v24  ;;  %v1702_v25 = vadd.f32 %v1670_v38, %v1601_v34 }
  0x9a   :  { %1467 = vst.msk [vmem:[#allocation2 + $0xa9] sm:$0xff] %vm56_vm0, %v1435_v32  ;;  %v2644_v12 = vld [vmem:[#allocation4 + $0x100] sm:$0xff]  ;;  %v2743_v36 = vld [vmem:[#allocation4 + $0x18] sm:$0xff]  ;;  %1394 = vst.msk [vmem:[#allocation4 + $0x20] sm:$0xff] %vm56_vm0, %v1362_v43  ;;  %v2045_v3 = vmul.f32 %v4090_v1, %v4493_v48  ;;  %v2176_v52 = vadd.f32 %v2144_v30, %v4447_v6  ;;  %v454_v38 = vmul.f32 %v4059_v46, %v4240_v23 }
  0x9b   :  { %v1331_v40 = vld [vmem:[#allocation4 + $0x28] sm:$0xff]  ;;  %v2676_v29 = vadd.f32 %v2644_v12, %v2612_v16  ;;  %3645 = vmatmul.mubr.msk.f32.gmra.mrb[2].mxu0 %vm56_vm0, %v2743_v36  ;;  %1834 = vst.msk [vmem:[#allocation4 + $0x120] sm:$0xff] %vm56_vm0, %v1802_v39  ;;  %v4518_v33 = vld [vmem:[#allocation3 + $0x50] sm:$0xff]  ;;  %v4520_v43 = vld [vmem:[#allocation3 + $0x58] sm:$0xff]  ;;  %v2175_v0 = vadd.f32 %v2143_v55, %v4403_v58  ;;  %v2076_v16 = vadd.f32 %v2044_v53, %v1975_v28 }
  0x9c   :  { %v2645_v32 = vld [vmem:[#allocation4 + $0x108] sm:$0xff]  ;;  %v1363_v44 = vadd.f32 %v1331_v40, %v1299_v49  ;;  %v2310_v12 = vld [vmem:[#allocation2 + $0x6a] sm:$0xff]  ;;  %1908 = vst.msk [vmem:[#allocation3 + $0x50] sm:$0xff] %vm56_vm0, %v1872_v26  ;;  %1909 = vst.msk [vmem:[#allocation3 + $0x58] sm:$0xff] %vm56_vm0, %v1873_v14  ;;  %v384_v58 = vadd.f32 %v4339_v57, %v4234_v59  ;;  %v659_v59 = vmul.f32 %v4086_v61, %v4244_v13 }
  0x9d   :  { %v2677_v11 = vadd.f32 %v2645_v32, %v2613_v56  ;;  %v4526_v49 = vld [vmem:[#allocation3 + $0x68] sm:$0xff]  ;;  %2708 = vst.msk [vmem:[#allocation4 + $0x100] sm:$0xff] %vm56_vm0, %v2676_v29  ;;  %v2207_v39 = vld [vmem:[#allocation4 + $0x110] sm:$0xff]  ;;  %v4530_v34 = vld [vmem:[#allocation3 + $0x40] sm:$0xff]  ;;  %v1803_v56 = vadd.f32 %v1771_v17, %v1702_v25  ;;  %v2513_v46 = vadd.f32 %v4462_v9, %v4458_v5  ;;  %v2514_v13 = vadd.f32 %v4482_v50, %v4465_v62 }
  0x9e   :  { %6570 = vst [vmem:[#allocation27_spill] sm:$0xff] %v4526_v49  ;;  %1395 = vst.msk [vmem:[#allocation4 + $0x28] sm:$0xff] %vm56_vm0, %v1363_v44  ;;  %v2239_v6 = vadd.f32 %v2207_v39, %v2175_v0  ;;  %v2208_v26 = vld [vmem:[#allocation4 + $0x118] sm:$0xff]  ;;  %v2145_v14 = vmul.f32 %v4092_v2, %v4530_v34  ;;  %v4540_v28 = vld [vmem:[#allocation3 + $0x48] sm:$0xff]  ;;  %v486_v30 = vadd.f32 %v454_v38, %v384_v58 }
  0x9f   :  { %593 = vst.msk [vmem:[#allocation3 + $0x68] sm:$0xff] %vm56_vm0, %v4452_v35  ;;  %2709 = vst.msk [vmem:[#allocation4 + $0x108] sm:$0xff] %vm56_vm0, %v2677_v11  ;;  %v559_v57 = vld [vmem:[#allocation2 + $0xb1] sm:$0xff]  ;;  %v2240_v17 = vadd.f32 %v2208_v26, %v2176_v52  ;;  %v2077_v35 = vadd.f32 %v2045_v3, %v1976_v51  ;;  %v2146_v0 = vmul.f32 %v4092_v2, %v4540_v28  ;;  %v2312_v40 = vld [vmem:[#allocation2 + $0x82] sm:$0xff] }
  0xa0   :  { %2345 = vst.msk [vmem:[#allocation3 + $0x40] sm:$0xff] %vm56_vm0, %v2309_v20  ;;  %6571 = vst [vmem:[#allocation28_spill] sm:$0xff] %v4540_v28  ;;  %v728_v11 = vmul.f32 %v4090_v1, %v4296_v18  ;;  %v2311_v20 = vld [vmem:[#allocation2 + $0x7a] sm:$0xff]  ;;  %v4552_v36 = vld [vmem:[#allocation3 + $0x60] sm:$0xff]  ;;  %v2177_v55 = vadd.f32 %v2145_v14, %v2076_v16  ;;  %v2414_v9 = vmul.f32 %v4113_v22, %v4424_v4 }
  0xa1   :  { %1835 = vst.msk [vmem:[#allocation4 + $0x128] sm:$0xff] %vm56_vm0, %v1803_v56  ;;  %2346 = vst.msk [vmem:[#allocation3 + $0x48] sm:$0xff] %vm56_vm0, %v2310_v12  ;;  %v4561_v53 = vld [vmem:[#allocation3 + $0x70] sm:$0xff]  ;;  %v4563_v51 = vld [vmem:[#allocation3 + $0x78] sm:$0xff]  ;;  %v2415_v62 = vmul.f32 %v4113_v22, %v4438_v41  ;;  %v2178_v12 = vadd.f32 %v2146_v0, %v2077_v35  ;;  %v1098_v35 = vmul.f32 %v4113_v22, %v4328_v47 }
  0xa2   :  { %2271 = vst.msk [vmem:[#allocation4 + $0x110] sm:$0xff] %vm56_vm0, %v2239_v6  ;;  %1031 = vst.msk [vmem:[#allocation3 + $0x60] sm:$0xff] %vm56_vm0, %v4441_v31  ;;  %v4565_v29 = vld [vmem:[#allocation3 + $0x30] sm:$0xff]  ;;  %v4568_v32 = vld [vmem:[#allocation3 + $0x38] sm:$0xff]  ;;  %v829_v31 = vmul.f32 %v4092_v2, %v4321_v10  ;;  %v1167_v0 = vmul.f32 %v4148_v45, %v4381_v63 }
  0xa3   :  { %6572 = vst [vmem:[#allocation29_spill] sm:$0xff] %v4561_v53  ;;  %6573 = vst [vmem:[#allocation30_spill] sm:$0xff] %v4563_v51  ;;  %v2744_v5 = vld [vmem:[#allocation4 + $0x20] sm:$0xff]  ;;  %v2582_v25 = vmul.f32 %v4156_v54, %v4565_v29  ;;  %v2583_v4 = vmul.f32 %v4156_v54, %v4568_v32  ;;  %v2483_v3 = vmul.f32 %v4148_v45, %v4565_v29  ;;  %v4599_v6 = vld [vmem:[#allocation3 + $0x50] sm:$0xff] }
  0xa4   :  { %2272 = vst.msk [vmem:[#allocation4 + $0x118] sm:$0xff] %vm56_vm0, %v2240_v17  ;;  %v4576_v50 = vld [vmem:[#allocation8] ss:$0 sm:$0xff]  ;;  %594 = vst.msk [vmem:[#allocation3 + $0x70] sm:$0xff] %vm56_vm0, %v4487_v60  ;;  %3647 = vmatprep.mubr.msk.f32.mxu0 %vm56_vm0, %v2744_v5  ;;  %v4591_v52 = vld [vmem:[#allocation2 + $0xb2] sm:$0xff]  ;;  %v2484_v39 = vmul.f32 %v4148_v45, %v4568_v32 }
  0xa5   :  { %v283_v44 = vmul.f32 %v4576_v50, %v4179_v21  ;;  %595 = vst.msk [vmem:[#allocation3 + $0x78] sm:$0xff] %vm56_vm0, %v559_v57  ;;  %v2209_v41 = vld [vmem:[#allocation4 + $0x120] sm:$0xff]  ;;  %518 = vst.msk [vmem:[#allocation4 + $0x30] sm:$0xff] %vm56_vm0, %v486_v30  ;;  %v760_v21 = vadd.f32 %v728_v11, %v659_v59  ;;  %v1436_v60 = vld [vmem:[#allocation5 + $0x168] sm:$0xff]  ;;  %v2614_v59 = vadd.f32 %v2582_v25, %v2513_v46 }
  0xa6   :  { %v2241_v16 = vadd.f32 %v2209_v41, %v2177_v55  ;;  %v4595_v56 = vld [vmem:[#allocation8 + $0x3] ss:$0 sm:$0xff]  ;;  %v4601_v26 = vld [vmem:[#allocation3 + $0x58] sm:$0xff]  ;;  %1468 = vst.msk [vmem:[#allocation2 + $0xb1] sm:$0xff] %vm56_vm0, %v1436_v60  ;;  %v2615_v57 = vadd.f32 %v2583_v4, %v2514_v13  ;;  %v2745_v17 = vld [vmem:[#allocation4 + $0x28] sm:$0xff]  ;;  %v2515_v46 = vadd.f32 %v2483_v3, %v2414_v9  ;;  %v729_v41 = vmul.f32 %v4090_v1, %v4305_v7 }
  0xa7   :  { %v353_v58 = vmul.f32 %v4595_v56, %v4226_v19  ;;  %6574 = vst [vmem:[#allocation31_spill] sm:$0xff] %v4601_v26  ;;  %v1499_v14 = vld [vmem:[#allocation2 + $0x90] sm:$0xff]  ;;  %2347 = vst.msk [vmem:[#allocation3 + $0x50] sm:$0xff] %vm56_vm0, %v2311_v20  ;;  %v4610_v11 = vld [vmem:[#allocation3 + $0x68] sm:$0xff]  ;;  %3648 = vmatmul.mubr.msk.f32.gmra.mrb[4].mxu0 %vm56_vm0, %v2745_v17  ;;  %v861_v9 = vadd.f32 %v829_v31, %v760_v21 }
  0xa8   :  { %v2772_v38 = vld [vmem:[#allocation4 + $0x100] sm:$0xff]  ;;  %2348 = vst.msk [vmem:[#allocation3 + $0x58] sm:$0xff] %vm56_vm0, %v2312_v40  ;;  %v2773_v55 = vld [vmem:[#allocation4 + $0x108] sm:$0xff]  ;;  %2273 = vst.msk [vmem:[#allocation4 + $0x120] sm:$0xff] %vm56_vm0, %v2241_v16  ;;  %v2516_v16 = vadd.f32 %v2484_v39, %v2415_v62 }
  0xa9   :  { %3689 = vmatprep.mubr.msk.f32.mxu1 %vm56_vm0, %v2772_v38  ;;  %v4615_v13 = vld [vmem:[#allocation3 + $0x40] sm:$0xff]  ;;  %v385_v47 = vadd.f32 %v353_v58, %v283_v44  ;;  %1032 = vst.msk [vmem:[#allocation3 + $0x68] sm:$0xff] %vm56_vm0, %v4454_v8  ;;  %v116_v40 = vld [vmem:[#allocation5 + $0x70] sm:$0xff]  ;;  %v2210_v25 = vld [vmem:[#allocation4 + $0x128] sm:$0xff]  ;;  %v660_v44 = vmul.f32 %v4086_v61, %v4248_v27 }
  0xaa   :  { %6575 = vst [vmem:[#allocation32_spill] sm:$0xff] %v4615_v13  ;;  %v4617_v30 = vld [vmem:[#allocation8 + $0x6] ss:$0 sm:$0xff]  ;;  %3690 = vmatmul.mubr.msk.f32.vlgmr.msra.gmra.mrb[0].mxu1 %vm56_vm0, %v2773_v55  ;;  %v2584_v5 = vmul.f32 %v4156_v54, %v4615_v13  ;;  %v4626_v4 = vld [vmem:[#allocation3 + $0x48] sm:$0xff]  ;;  %v117_v3 = vld [vmem:[#allocation5 + $0x78] sm:$0xff]  ;;  %v2242_v60 = vadd.f32 %v2210_v25, %v2178_v12 }
  0xab   :  { %v455_v20 = vmul.f32 %v4617_v30, %v4266_v42  ;;  %149 = vst.msk [vmem:[#allocation2 + $0xc1] sm:$0xff] %vm56_vm0, %v116_v40  ;;  %v2646_v8 = vld [vmem:[#allocation4 + $0x110] sm:$0xff]  ;;  %v4635_v55 = vld [vmem:[#allocation3 + $0x60] sm:$0xff]  ;;  %150 = vst.msk [vmem:[#allocation2 + $0xc9] sm:$0xff] %vm56_vm0, %v117_v3  ;;  %v2585_v61 = vmul.f32 %v4156_v54, %v4626_v4  ;;  %v1773_v53 = vmul.f32 %v4617_v30, %v4520_v43 }
  0xac   :  { %v6576_v38 = vld [vmem:[#allocation19_spill] sm:$0xff]  ;;  %v2678_v31 = vadd.f32 %v2646_v8, %v2614_v59  ;;  %v2647_v21 = vld [vmem:[#allocation4 + $0x118] sm:$0xff]  ;;  %v6577_v1 = vld [vmem:[#allocation18_spill] sm:$0xff]  ;;  %1535 = vst.msk [vmem:[#allocation3 + $0x60] sm:$0xff] %vm56_vm0, %v1499_v14 }
  0xad   :  { %v487_v58 = vadd.f32 %v455_v20, %v385_v47  ;;  %v830_v17 = vmul.f32 %v4092_v2, %v6576_v38  ;;  %v1099_v27 = vmul.f32 %v4113_v22, %v6577_v1  ;;  %v6578_v40 = vld [vmem:[#allocation20_spill] sm:$0xff]  ;;  %v4645_v62 = vld [vmem:[#allocation3 + $0x70] sm:$0xff]  ;;  %v2679_v39 = vadd.f32 %v2647_v21, %v2615_v57  ;;  %2274 = vst.msk [vmem:[#allocation4 + $0x128] sm:$0xff] %vm56_vm0, %v2242_v60  ;;  %v6581_v25 = vld [vmem:[#allocation21_spill] sm:$0xff] }
  0xae   :  { %v1168_v12 = vmul.f32 %v4148_v45, %v6578_v40  ;;  %6579 = vst [vmem:[#allocation19_spill] sm:$0xff] %v4645_v62  ;;  %v4647_v2 = vld [vmem:[#allocation3 + $0x78] sm:$0xff]  ;;  %v2616_v47 = vadd.f32 %v2584_v5, %v2515_v46  ;;  %v893_v59 = vld [vmem:[#allocation4 + $0x30] sm:$0xff]  ;;  %v761_v20 = vadd.f32 %v729_v41, %v660_v44  ;;  %v1602_v22 = vmul.f32 %v4576_v50, %v6581_v25  ;;  %v118_v45 = vld [vmem:[#allocation5 + $0x80] sm:$0xff] }
  0xaf   :  { %6580 = vst [vmem:[#allocation18_spill] sm:$0xff] %v4647_v2  ;;  %519 = vst.msk [vmem:[#allocation4 + $0x38] sm:$0xff] %vm56_vm0, %v487_v58  ;;  %v925_v14 = vadd.f32 %v893_v59, %v861_v9  ;;  %v1671_v57 = vmul.f32 %v4595_v56, %v4449_v15  ;;  %v1500_v46 = vld [vmem:[#allocation2 + $0x98] sm:$0xff]  ;;  %v1199_v5 = vadd.f32 %v1167_v0, %v1098_v35  ;;  %v6582_v44 = vld [vmem:[#allocation23_spill] sm:$0xff] }
  0xb0   :  { %1033 = vst.msk [vmem:[#allocation3 + $0x70] sm:$0xff] %vm56_vm0, %v4489_v37  ;;  %1034 = vst.msk [vmem:[#allocation3 + $0x78] sm:$0xff] %vm56_vm0, %v4591_v52  ;;  %v1268_v41 = vmul.f32 %v4156_v54, %v6582_v44  ;;  %v6583_v37 = vld [vmem:[#allocation24_spill] sm:$0xff]  ;;  %v1772_v52 = vmul.f32 %v4617_v30, %v4518_v33  ;;  %v1874_v8 = vld [vmem:[#allocation2 + $0x91] sm:$0xff]  ;;  %v1200_v58 = vadd.f32 %v1168_v12, %v1099_v27 }
  0xb1   :  { %2710 = vst.msk [vmem:[#allocation4 + $0x110] sm:$0xff] %vm56_vm0, %v2678_v31  ;;  %151 = vst.msk [vmem:[#allocation2 + $0xd9] sm:$0xff] %vm56_vm0, %v118_v45  ;;  %v1269_v3 = vmul.f32 %v4156_v54, %v6583_v37  ;;  %v1437_v9 = vld [vmem:[#allocation5 + $0x170] sm:$0xff]  ;;  %v2648_v60 = vld [vmem:[#allocation4 + $0x120] sm:$0xff]  ;;  %v1703_v31 = vadd.f32 %v1671_v57, %v1602_v22  ;;  %v2617_v45 = vadd.f32 %v2585_v61, %v2516_v16 }
  0xb2   :  { %2711 = vst.msk [vmem:[#allocation4 + $0x118] sm:$0xff] %vm56_vm0, %v2679_v39  ;;  %957 = vst.msk [vmem:[#allocation4 + $0x30] sm:$0xff] %vm56_vm0, %v925_v14  ;;  %v4669_v21 = vld [vmem:[#allocation8 + $0x1] ss:$0 sm:$0xff]  ;;  %v4673_v0 = vld [vmem:[#allocation8 + $0x4] ss:$0 sm:$0xff]  ;;  %v2680_v25 = vadd.f32 %v2648_v60, %v2616_v47  ;;  %v862_v2 = vadd.f32 %v830_v17, %v761_v20  ;;  %v1300_v61 = vadd.f32 %v1268_v41, %v1199_v5 }
  0xb3   :  { %v1977_v35 = vmul.f32 %v4669_v21, %v4491_v24  ;;  %v2046_v54 = vmul.f32 %v4673_v0, %v4530_v34  ;;  %v4677_v1 = vld [vmem:[#allocation3 + $0x68] sm:$0xff]  ;;  %v1501_v39 = vld [vmem:[#allocation2 + $0xa8] sm:$0xff]  ;;  %v1502_v12 = vld [vmem:[#allocation2 + $0xb0] sm:$0xff]  ;;  %v1804_v57 = vadd.f32 %v1772_v52, %v1703_v31  ;;  %v2047_v52 = vmul.f32 %v4673_v0, %v4540_v28 }
  0xb4   :  { %6584 = vst [vmem:[#allocation20_spill] sm:$0xff] %v4677_v1  ;;  %v119_v59 = vld [vmem:[#allocation5 + $0x88] sm:$0xff]  ;;  %1536 = vst.msk [vmem:[#allocation3 + $0x68] sm:$0xff] %vm56_vm0, %v1500_v46  ;;  %v183_v22 = vld [vmem:[#allocation2 + $0xc0] sm:$0xff]  ;;  %v1978_v46 = vmul.f32 %v4669_v21, %v4493_v48  ;;  %v4707_v41 = vadd.f32 %v1269_v3, %v1200_v58 }
  0xb5   :  { %v6585_v14 = vld [vmem:[#allocation22_spill] sm:$0xff]  ;;  %v1438_v24 = vld [vmem:[#allocation5 + $0x178] sm:$0xff]  ;;  %152 = vst.msk [vmem:[#allocation2 + $0xe1] sm:$0xff] %vm56_vm0, %v119_v59  ;;  %v6586_v51 = vld [vmem:[#allocation25_spill] sm:$0xff]  ;;  %v2078_v48 = vadd.f32 %v2046_v54, %v1977_v35 }
  0xb6   :  { %v1603_v27 = vmul.f32 %v4576_v50, %v6585_v14  ;;  %v1672_v62 = vmul.f32 %v4595_v56, %v6586_v51  ;;  %v184_v47 = vld [vmem:[#allocation2 + $0xc8] sm:$0xff]  ;;  %219 = vst.msk [vmem:[#allocation3 + $0x80] sm:$0xff] %vm56_vm0, %v183_v22  ;;  %2712 = vst.msk [vmem:[#allocation4 + $0x120] sm:$0xff] %vm56_vm0, %v2680_v25  ;;  %v4693_v20 = vld [vmem:[#allocation3 + $0x50] sm:$0xff] }
  0xb7   :  { %v4688_v16 = vld [vmem:[#allocation2 + $0xc1] sm:$0xff]  ;;  %6587 = vst [vmem:[#allocation21_spill] sm:$0xff] %v4693_v20  ;;  %v4699_v60 = vld [vmem:[#allocation3 + $0x60] sm:$0xff]  ;;  %220 = vst.msk [vmem:[#allocation3 + $0x88] sm:$0xff] %vm56_vm0, %v184_v47 }
  0xb8   :  { %v4690_v17 = vld [vmem:[#allocation2 + $0xc2] sm:$0xff]  ;;  %v4705_v59 = vld [vmem:[#allocation2 + $0xca] sm:$0xff]  ;;  %v2649_v25 = vld [vmem:[#allocation4 + $0x128] sm:$0xff]  ;;  %1836 = vst.msk [vmem:[#allocation4 + $0x130] sm:$0xff] %vm56_vm0, %v1804_v57  ;;  %v1704_v1 = vadd.f32 %v1672_v62, %v1603_v27 }
  0xb9   :  { %1469 = vst.msk [vmem:[#allocation2 + $0xc1] sm:$0xff] %vm56_vm0, %v1437_v9  ;;  %v4703_v31 = vld [vmem:[#allocation2 + $0xc9] sm:$0xff]  ;;  %6588 = vst [vmem:[#allocation23_spill] sm:$0xff] %v4705_v59  ;;  %v4710_v14 = vld [vmem:[#allocation8 + $0x7] ss:$0 sm:$0xff]  ;;  %v2681_v3 = vadd.f32 %v2649_v25, %v2617_v45  ;;  %v354_v25 = vmul.f32 %v4595_v56, %v4240_v23 }
  0xba   :  { %v894_v5 = vld [vmem:[#allocation4 + $0x38] sm:$0xff]  ;;  %v2147_v22 = vmul.f32 %v4710_v14, %v4599_v6  ;;  %1910 = vst.msk [vmem:[#allocation3 + $0x60] sm:$0xff] %vm56_vm0, %v1874_v8  ;;  %v1875_v9 = vld [vmem:[#allocation2 + $0x99] sm:$0xff]  ;;  %1470 = vst.msk [vmem:[#allocation2 + $0xc9] sm:$0xff] %vm56_vm0, %v1438_v24  ;;  %v1805_v45 = vadd.f32 %v1773_v53, %v1704_v1  ;;  %v2079_v1 = vadd.f32 %v2047_v52, %v1978_v46 }
  0xbb   :  { %v4715_v47 = vld [vmem:[#allocation3 + $0x70] sm:$0xff]  ;;  %v1439_v37 = vld [vmem:[#allocation5 + $0x180] sm:$0xff]  ;;  %v926_v58 = vadd.f32 %v894_v5, %v862_v2  ;;  %v4727_v8 = vld [vmem:[#allocation3 + $0x78] sm:$0xff]  ;;  %v2148_v2 = vmul.f32 %v4710_v14, %v4601_v26  ;;  %2713 = vst.msk [vmem:[#allocation4 + $0x128] sm:$0xff] %vm56_vm0, %v2681_v3 }
  0xbc   :  { %6589 = vst [vmem:[#allocation22_spill] sm:$0xff] %v4715_v47  ;;  %v2774_v59 = vld [vmem:[#allocation4 + $0x110] sm:$0xff]  ;;  %v4718_v28 = vld [vmem:[#allocation8 + $0x2] ss:$0 sm:$0xff]  ;;  %v4722_v54 = vld [vmem:[#allocation8 + $0x5] ss:$0 sm:$0xff] }
  0xbd   :  { %v2416_v35 = vmul.f32 %v4718_v28, %v4565_v29  ;;  %v2485_v62 = vmul.f32 %v4722_v54, %v4615_v13  ;;  %1537 = vst.msk [vmem:[#allocation3 + $0x70] sm:$0xff] %vm56_vm0, %v1501_v39  ;;  %6590 = vst [vmem:[#allocation25_spill] sm:$0xff] %v4727_v8  ;;  %v185_v27 = vld [vmem:[#allocation2 + $0xd8] sm:$0xff]  ;;  %3692 = vmatprep.mubr.msk.f32.mxu1 %vm56_vm0, %v2774_v59  ;;  %v2775_v24 = vld [vmem:[#allocation4 + $0x118] sm:$0xff]  ;;  %v661_v8 = vmul.f32 %v4669_v21, %v4296_v18 }
  0xbe   :  { %v6591_v57 = vld [vmem:[#allocation15_spill] sm:$0xff]  ;;  %1538 = vst.msk [vmem:[#allocation3 + $0x78] sm:$0xff] %vm56_vm0, %v1502_v12  ;;  %221 = vst.msk [vmem:[#allocation3 + $0x90] sm:$0xff] %vm56_vm0, %v185_v27  ;;  %v1440_v39 = vld [vmem:[#allocation5 + $0x188] sm:$0xff]  ;;  %3693 = vmatmul.mubr.msk.f32.gmra.mrb[2].mxu1 %vm56_vm0, %v2775_v24  ;;  %v730_v12 = vmul.f32 %v4673_v0, %v4321_v10  ;;  %v2179_v24 = vadd.f32 %v2147_v22, %v2078_v48  ;;  %v2486_v48 = vmul.f32 %v4722_v54, %v4626_v4 }
  0xbf   :  { %v284_v29 = vmul.f32 %v4576_v50, %v6591_v57  ;;  %v120_v5 = vld [vmem:[#allocation5 + $0x90] sm:$0xff]  ;;  %958 = vst.msk [vmem:[#allocation4 + $0x38] sm:$0xff] %vm56_vm0, %v926_v58  ;;  %v6592_v59 = vld [vmem:[#allocation26_spill] sm:$0xff]  ;;  %v121_v23 = vld [vmem:[#allocation5 + $0x98] sm:$0xff] }
  0xc0   :  { %v1332_v53 = vld [vmem:[#allocation4 + $0x30] sm:$0xff]  ;;  %v456_v57 = vmul.f32 %v4617_v30, %v6592_v59  ;;  %v2313_v27 = vld [vmem:[#allocation2 + $0x92] sm:$0xff]  ;;  %153 = vst.msk [vmem:[#allocation2 + $0xf1] sm:$0xff] %vm56_vm0, %v120_v5  ;;  %1837 = vst.msk [vmem:[#allocation4 + $0x138] sm:$0xff] %vm56_vm0, %v1805_v45  ;;  %v762_v22 = vadd.f32 %v730_v12, %v661_v8  ;;  %v831_v5 = vmul.f32 %v4710_v14, %v4552_v36 }
  0xc1   :  { %v4747_v47 = vld [vmem:[#allocation2 + $0xd9] sm:$0xff]  ;;  %v1364_v3 = vadd.f32 %v1332_v53, %v1300_v61  ;;  %v4750_v13 = vld [vmem:[#allocation8 + $0x8] ss:$0 sm:$0xff]  ;;  %v386_v18 = vadd.f32 %v354_v25, %v284_v29  ;;  %v1876_v58 = vld [vmem:[#allocation2 + $0xa9] sm:$0xff]  ;;  %154 = vst.msk [vmem:[#allocation2 + $0xf9] sm:$0xff] %vm56_vm0, %v121_v23  ;;  %v2417_v61 = vmul.f32 %v4718_v28, %v4568_v32  ;;  %v285_v53 = vmul.f32 %v4576_v50, %v4226_v19 }
  0xc2   :  { %v4754_v46 = vmul.f32 %v4750_v13, %v4693_v20  ;;  %v4757_v52 = vld [vmem:[#allocation3 + $0x68] sm:$0xff]  ;;  %v186_v10 = vld [vmem:[#allocation2 + $0xe0] sm:$0xff]  ;;  %v4769_v45 = vld [vmem:[#allocation3 + $0x80] sm:$0xff]  ;;  %v1100_v19 = vmul.f32 %v4718_v28, %v4381_v63 }
  0xc3   :  { %v4759_v59 = vld [vmem:[#allocation2 + $0xda] sm:$0xff]  ;;  %1911 = vst.msk [vmem:[#allocation3 + $0x68] sm:$0xff] %vm56_vm0, %v1875_v9  ;;  %6593 = vst [vmem:[#allocation15_spill] sm:$0xff] %v4769_v45  ;;  %v4775_v23 = vld [vmem:[#allocation2 + $0xe2] sm:$0xff]  ;;  %v488_v8 = vadd.f32 %v456_v57, %v386_v18  ;;  %v355_v9 = vmul.f32 %v4595_v56, %v4266_v42  ;;  %v2517_v57 = vadd.f32 %v2485_v62, %v2416_v35 }
  0xc4   :  { %1471 = vst.msk [vmem:[#allocation2 + $0xd9] sm:$0xff] %vm56_vm0, %v1439_v37  ;;  %222 = vst.msk [vmem:[#allocation3 + $0x98] sm:$0xff] %vm56_vm0, %v186_v10  ;;  %v4773_v29 = vld [vmem:[#allocation2 + $0xe1] sm:$0xff]  ;;  %v2776_v32 = vld [vmem:[#allocation4 + $0x120] sm:$0xff]  ;;  %v457_v37 = vmul.f32 %v4617_v30, %v4526_v49  ;;  %v1169_v18 = vmul.f32 %v4722_v54, %v6582_v44  ;;  %v662_v35 = vmul.f32 %v4669_v21, %v4305_v7 }
  0xc5   :  { %1396 = vst.msk [vmem:[#allocation4 + $0x30] sm:$0xff] %vm56_vm0, %v1364_v3  ;;  %v4778_v25 = vld [vmem:[#allocation3 + $0x58] sm:$0xff]  ;;  %596 = vst.msk [vmem:[#allocation3 + $0x80] sm:$0xff] %vm56_vm0, %v4688_v16  ;;  %v4788_v10 = vld [vmem:[#allocation3 + $0x88] sm:$0xff]  ;;  %3695 = vmatprep.mubr.msk.f32.mxu1 %vm56_vm0, %v2776_v32  ;;  %v2180_v3 = vadd.f32 %v2148_v2, %v2079_v1  ;;  %v731_v62 = vmul.f32 %v4673_v0, %v6576_v38  ;;  %v2518_v2 = vadd.f32 %v2486_v48, %v2417_v61 }
  0xc6   :  { %6594 = vst [vmem:[#allocation33_spill] sm:$0xff] %v4788_v10  ;;  %1472 = vst.msk [vmem:[#allocation2 + $0xe1] sm:$0xff] %vm56_vm0, %v1440_v39  ;;  %v2211_v12 = vld [vmem:[#allocation4 + $0x130] sm:$0xff]  ;;  %v4796_v45 = vld [vmem:[#allocation3 + $0x60] sm:$0xff]  ;;  %v387_v39 = vadd.f32 %v355_v9, %v285_v53  ;;  %v2587_v1 = vmul.f32 %v4750_v13, %v4778_v25  ;;  %v863_v32 = vadd.f32 %v831_v5, %v762_v22 }
  0xc7   :  { %v1877_v49 = vld [vmem:[#allocation2 + $0xb1] sm:$0xff]  ;;  %597 = vst.msk [vmem:[#allocation3 + $0x88] sm:$0xff] %vm56_vm0, %v4703_v31  ;;  %v2243_v16 = vadd.f32 %v2211_v12, %v2179_v24  ;;  %520 = vst.msk [vmem:[#allocation4 + $0x40] sm:$0xff] %vm56_vm0, %v488_v8  ;;  %v4806_v63 = vld [vmem:[#allocation3 + $0x70] sm:$0xff]  ;;  %v1270_v31 = vmul.f32 %v4750_v13, %v4635_v55  ;;  %v1604_v61 = vmul.f32 %v4576_v50, %v4449_v15 }
  0xc8   :  { %2349 = vst.msk [vmem:[#allocation3 + $0x60] sm:$0xff] %vm56_vm0, %v2313_v27  ;;  %v2314_v24 = vld [vmem:[#allocation2 + $0x9a] sm:$0xff]  ;;  %1912 = vst.msk [vmem:[#allocation3 + $0x70] sm:$0xff] %vm56_vm0, %v1876_v58  ;;  %v4813_v8 = vld [vmem:[#allocation3 + $0x78] sm:$0xff]  ;;  %v489_v27 = vadd.f32 %v457_v37, %v387_v39  ;;  %v1673_v48 = vmul.f32 %v4595_v56, %v4518_v33  ;;  %v1774_v22 = vmul.f32 %v4617_v30, %v4699_v60 }
  0xc9   :  { %v2777_v7 = vld [vmem:[#allocation4 + $0x128] sm:$0xff]  ;;  %v1333_v53 = vld [vmem:[#allocation4 + $0x38] sm:$0xff]  ;;  %2275 = vst.msk [vmem:[#allocation4 + $0x130] sm:$0xff] %vm56_vm0, %v2243_v16  ;;  %1913 = vst.msk [vmem:[#allocation3 + $0x78] sm:$0xff] %vm56_vm0, %v1877_v49  ;;  %v1201_v12 = vadd.f32 %v1169_v18, %v1100_v19  ;;  %v832_v37 = vmul.f32 %v4710_v14, %v4610_v11  ;;  %v1979_v15 = vmul.f32 %v4669_v21, %v4530_v34 }
  0xca   :  { %v4823_v5 = vld [vmem:[#allocation3 + $0x90] sm:$0xff]  ;;  %3696 = vmatmul.mubr.msk.f32.gmra.mrb[4].mxu1 %vm56_vm0, %v2777_v7  ;;  %v1365_v58 = vadd.f32 %v1333_v53, %v4707_v41  ;;  %v2212_v9 = vld [vmem:[#allocation4 + $0x138] sm:$0xff]  ;;  %v187_v16 = vld [vmem:[#allocation2 + $0xf0] sm:$0xff]  ;;  %521 = vst.msk [vmem:[#allocation4 + $0x48] sm:$0xff] %vm56_vm0, %v489_v27  ;;  %v1705_v7 = vadd.f32 %v1673_v48, %v1604_v61  ;;  %v2048_v41 = vmul.f32 %v4673_v0, %v4599_v6 }
  0xcb   :  { %6595 = vst [vmem:[#allocation34_spill] sm:$0xff] %v4823_v5  ;;  %598 = vst.msk [vmem:[#allocation3 + $0x90] sm:$0xff] %vm56_vm0, %v4747_v47  ;;  %v188_v39 = vld [vmem:[#allocation2 + $0xf8] sm:$0xff]  ;;  %v2244_v49 = vadd.f32 %v2212_v9, %v2180_v3  ;;  %v763_v5 = vadd.f32 %v731_v62, %v662_v35  ;;  %v4838_v18 = vld [vmem:[#allocation3 + $0x98] sm:$0xff]  ;;  %v2618_v47 = vadd.f32 %v4754_v46, %v2517_v57 }
  0xcc   :  { %v4836_v19 = vld [vmem:[#allocation3 + $0x68] sm:$0xff]  ;;  %6597 = vst [vmem:[#allocation36_spill] sm:$0xff] %v4838_v18  ;;  %223 = vst.msk [vmem:[#allocation3 + $0xa0] sm:$0xff] %vm56_vm0, %v187_v16  ;;  %v2746_v34 = vld [vmem:[#allocation4 + $0x30] sm:$0xff]  ;;  %v4844_v3 = vadd.f32 %v2587_v1, %v2518_v2  ;;  %v1605_v35 = vmul.f32 %v4576_v50, %v6586_v51  ;;  %v4857_v53 = vmul.f32 %v4718_v28, %v6578_v40 }
  0xcd   :  { %6596 = vst [vmem:[#allocation35_spill] sm:$0xff] %v4836_v19  ;;  %224 = vst.msk [vmem:[#allocation3 + $0xa8] sm:$0xff] %vm56_vm0, %v188_v39  ;;  %v4849_v62 = vld [vmem:[#allocation3 + $0x80] sm:$0xff]  ;;  %3650 = vmatprep.mubr.msk.f32.mxu0 %vm56_vm0, %v2746_v34  ;;  %v1806_v46 = vadd.f32 %v1774_v22, %v1705_v7  ;;  %v1674_v57 = vmul.f32 %v4595_v56, %v4520_v43  ;;  %v1775_v51 = vmul.f32 %v4617_v30, %v4757_v52  ;;  %v6600_v40 = vld [vmem:[#allocation28_spill] sm:$0xff] }
  0xce   :  { %1397 = vst.msk [vmem:[#allocation4 + $0x38] sm:$0xff] %vm56_vm0, %v1365_v58  ;;  %2350 = vst.msk [vmem:[#allocation3 + $0x68] sm:$0xff] %vm56_vm0, %v2314_v24  ;;  %v2315_v2 = vld [vmem:[#allocation2 + $0xaa] sm:$0xff]  ;;  %v2080_v24 = vadd.f32 %v2048_v41, %v1979_v15  ;;  %v2149_v27 = vmul.f32 %v4710_v14, %v4796_v45  ;;  %v1980_v61 = vmul.f32 %v4669_v21, %v6600_v40  ;;  %v2316_v22 = vld [vmem:[#allocation2 + $0xb2] sm:$0xff] }
  0xcf   :  { %6598 = vst [vmem:[#allocation37_spill] sm:$0xff] %v4849_v62  ;;  %599 = vst.msk [vmem:[#allocation3 + $0x98] sm:$0xff] %vm56_vm0, %v4773_v29  ;;  %v4865_v29 = vld [vmem:[#allocation3 + $0x88] sm:$0xff]  ;;  %v895_v1 = vld [vmem:[#allocation4 + $0x40] sm:$0xff]  ;;  %v2049_v48 = vmul.f32 %v4673_v0, %v4601_v26  ;;  %v864_v39 = vadd.f32 %v832_v37, %v763_v5 }
  0xd0   :  { %2276 = vst.msk [vmem:[#allocation4 + $0x138] sm:$0xff] %vm56_vm0, %v2244_v49  ;;  %1035 = vst.msk [vmem:[#allocation3 + $0x80] sm:$0xff] %vm56_vm0, %v4690_v17  ;;  %v6601_v58 = vld [vmem:[#allocation23_spill] sm:$0xff]  ;;  %v927_v16 = vadd.f32 %v895_v1, %v863_v32  ;;  %v4875_v17 = vadd.f32 %v1270_v31, %v1201_v12  ;;  %v4878_v15 = vld [vmem:[#allocation3 + $0x60] sm:$0xff]  ;;  %v1706_v49 = vadd.f32 %v1674_v57, %v1605_v35 }
  0xd1   :  { %6599 = vst [vmem:[#allocation38_spill] sm:$0xff] %v4865_v29  ;;  %1036 = vst.msk [vmem:[#allocation3 + $0x88] sm:$0xff] %vm56_vm0, %v6601_v58  ;;  %v1441_v9 = vld [vmem:[#allocation5 + $0x190] sm:$0xff]  ;;  %v564_v41 = vld [vmem:[#allocation2 + $0xf1] sm:$0xff]  ;;  %v2487_v32 = vmul.f32 %v4722_v54, %v4693_v20  ;;  %v2150_v20 = vmul.f32 %v4710_v14, %v4836_v19 }
  0xd2   :  { %1838 = vst.msk [vmem:[#allocation4 + $0x140] sm:$0xff] %vm56_vm0, %v1806_v46  ;;  %6602 = vst [vmem:[#allocation28_spill] sm:$0xff] %v4878_v15  ;;  %v4880_v7 = vld [vmem:[#allocation3 + $0x70] sm:$0xff]  ;;  %v6603_v40 = vld [vmem:[#allocation24_spill] sm:$0xff] }
  0xd3   :  { %v2650_v34 = vld [vmem:[#allocation4 + $0x130] sm:$0xff]  ;;  %v1170_v18 = vmul.f32 %v4722_v54, %v6603_v40  ;;  %v6604_v29 = vld [vmem:[#allocation32_spill] sm:$0xff]  ;;  %2351 = vst.msk [vmem:[#allocation3 + $0x70] sm:$0xff] %vm56_vm0, %v2315_v2  ;;  %v4893_v35 = vld [vmem:[#allocation2 + $0xf2] sm:$0xff] }
  0xd4   :  { %v2418_v58 = vmul.f32 %v4718_v28, %v6604_v29  ;;  %v6605_v31 = vld [vmem:[#allocation16_spill] sm:$0xff]  ;;  %v1503_v37 = vld [vmem:[#allocation2 + $0xc0] sm:$0xff]  ;;  %v2682_v46 = vadd.f32 %v2650_v34, %v2618_v47  ;;  %959 = vst.msk [vmem:[#allocation4 + $0x40] sm:$0xff] %vm56_vm0, %v927_v16  ;;  %v1807_v29 = vadd.f32 %v1775_v51, %v1706_v49  ;;  %v6608_v62 = vld [vmem:[#allocation26_spill] sm:$0xff]  ;;  %v2181_v34 = vadd.f32 %v2149_v27, %v2080_v24 }
  0xd5   :  { %v286_v5 = vmul.f32 %v4576_v50, %v6605_v31  ;;  %v4891_v12 = vld [vmem:[#allocation3 + $0x78] sm:$0xff]  ;;  %v356_v10 = vmul.f32 %v4595_v56, %v6608_v62  ;;  %v4903_v31 = vld [vmem:[#allocation3 + $0x90] sm:$0xff]  ;;  %1473 = vst.msk [vmem:[#allocation2 + $0xf1] sm:$0xff] %vm56_vm0, %v1441_v9  ;;  %v896_v47 = vld [vmem:[#allocation4 + $0x48] sm:$0xff]  ;;  %v2081_v16 = vadd.f32 %v2049_v48, %v1980_v61  ;;  %v732_v48 = vmul.f32 %v4673_v0, %v4552_v36 }
  0xd6   :  { %6606 = vst [vmem:[#allocation23_spill] sm:$0xff] %v4891_v12  ;;  %v6607_v57 = vld [vmem:[#allocation20_spill] sm:$0xff]  ;;  %2352 = vst.msk [vmem:[#allocation3 + $0x78] sm:$0xff] %vm56_vm0, %v2316_v22  ;;  %v565_v2 = vld [vmem:[#allocation2 + $0xf9] sm:$0xff] }
  0xd7   :  { %v4898_v1 = vmul.f32 %v4750_v13, %v6607_v57  ;;  %6609 = vst [vmem:[#allocation24_spill] sm:$0xff] %v4903_v31  ;;  %v4906_v12 = vld [vmem:[#allocation2 + $0xfa] sm:$0xff]  ;;  %v6610_v26 = vld [vmem:[#allocation29_spill] sm:$0xff]  ;;  %1037 = vst.msk [vmem:[#allocation3 + $0x90] sm:$0xff] %vm56_vm0, %v4759_v59  ;;  %v928_v31 = vadd.f32 %v896_v47, %v864_v39  ;;  %v388_v24 = vadd.f32 %v356_v10, %v286_v5 }
  0xd8   :  { %v458_v51 = vmul.f32 %v4617_v30, %v6610_v26  ;;  %v4914_v22 = vld [vmem:[#allocation3 + $0xa0] sm:$0xff]  ;;  %v4916_v49 = vld [vmem:[#allocation3 + $0xa8] sm:$0xff]  ;;  %v2747_v9 = vld [vmem:[#allocation4 + $0x38] sm:$0xff]  ;;  %2714 = vst.msk [vmem:[#allocation4 + $0x130] sm:$0xff] %vm56_vm0, %v2682_v46  ;;  %v1202_v39 = vadd.f32 %v1170_v18, %v4857_v53  ;;  %v2519_v46 = vadd.f32 %v2487_v32, %v2418_v58  ;;  %v2588_v10 = vmul.f32 %v4750_v13, %v4878_v15 }
  0xd9   :  { %6611 = vst [vmem:[#allocation32_spill] sm:$0xff] %v4914_v22  ;;  %6612 = vst [vmem:[#allocation16_spill] sm:$0xff] %v4916_v49  ;;  %v6613_v27 = vld [vmem:[#allocation17_spill] sm:$0xff]  ;;  %v1504_v26 = vld [vmem:[#allocation2 + $0xc8] sm:$0xff]  ;;  %3651 = vmatmul.mubr.msk.f32.gmra.mrb[6].mxu0 %vm56_vm0, %v2747_v9  ;;  %v2419_v5 = vmul.f32 %v4718_v28, %v4626_v4  ;;  %v2488_v18 = vmul.f32 %v4722_v54, %v4778_v25  ;;  %v287_v58 = vmul.f32 %v4576_v50, %v4266_v42 }
  0xda   :  { %1839 = vst.msk [vmem:[#allocation4 + $0x148] sm:$0xff] %vm56_vm0, %v1807_v29  ;;  %v663_v61 = vmul.f32 %v4669_v21, %v6613_v27  ;;  %v4924_v62 = vld [vmem:[#allocation3 + $0x98] sm:$0xff]  ;;  %600 = vst.msk [vmem:[#allocation3 + $0xa0] sm:$0xff] %vm56_vm0, %v564_v41  ;;  %v4934_v29 = vld [vmem:[#allocation3 + $0x80] sm:$0xff]  ;;  %v490_v53 = vadd.f32 %v458_v51, %v388_v24  ;;  %v2182_v9 = vadd.f32 %v2150_v20, %v2081_v16 }
  0xdb   :  { %6614 = vst [vmem:[#allocation17_spill] sm:$0xff] %v4924_v62  ;;  %601 = vst.msk [vmem:[#allocation3 + $0xa8] sm:$0xff] %vm56_vm0, %v565_v2  ;;  %v2651_v59 = vld [vmem:[#allocation4 + $0x138] sm:$0xff]  ;;  %v4945_v4 = vld [vmem:[#allocation3 + $0x88] sm:$0xff]  ;;  %v733_v16 = vmul.f32 %v4673_v0, %v4610_v11  ;;  %v4964_v62 = vadd.f32 %v2588_v10, %v2519_v46 }
  0xdc   :  { %1038 = vst.msk [vmem:[#allocation3 + $0x98] sm:$0xff] %vm56_vm0, %v4775_v23  ;;  %v1442_v41 = vld [vmem:[#allocation5 + $0x198] sm:$0xff]  ;;  %v2683_v2 = vadd.f32 %v2651_v59, %v4844_v3  ;;  %960 = vst.msk [vmem:[#allocation4 + $0x48] sm:$0xff] %vm56_vm0, %v928_v31  ;;  %v122_v32 = vld [vmem:[#allocation5 + $0xa0] sm:$0xff]  ;;  %v764_v20 = vadd.f32 %v732_v48, %v663_v61  ;;  %v1102_v48 = vmul.f32 %v4718_v28, %v6582_v44 }
  0xdd   :  { %1539 = vst.msk [vmem:[#allocation3 + $0x80] sm:$0xff] %vm56_vm0, %v1503_v37  ;;  %6615 = vst [vmem:[#allocation39_spill] sm:$0xff] %v4945_v4  ;;  %v123_v23 = vld [vmem:[#allocation5 + $0xa8] sm:$0xff]  ;;  %v2213_v47 = vld [vmem:[#allocation4 + $0x140] sm:$0xff]  ;;  %v664_v37 = vmul.f32 %v4669_v21, %v6576_v38  ;;  %v4970_v38 = vadd.f32 %v2488_v18, %v2419_v5  ;;  %v1675_v5 = vmul.f32 %v4595_v56, %v4699_v60 }
  0xde   :  { %1474 = vst.msk [vmem:[#allocation2 + $0xf9] sm:$0xff] %vm56_vm0, %v1442_v41  ;;  %v6616_v3 = vld [vmem:[#allocation19_spill] sm:$0xff]  ;;  %v6618_v51 = vld [vmem:[#allocation30_spill] sm:$0xff]  ;;  %1540 = vst.msk [vmem:[#allocation3 + $0x88] sm:$0xff] %vm56_vm0, %v1504_v26  ;;  %v2245_v42 = vadd.f32 %v2213_v47, %v2181_v34  ;;  %v1776_v18 = vmul.f32 %v4617_v30, %v4806_v63 }
  0xdf   :  { %v833_v31 = vmul.f32 %v4710_v14, %v6616_v3  ;;  %v6617_v27 = vld [vmem:[#allocation27_spill] sm:$0xff]  ;;  %v459_v24 = vmul.f32 %v4617_v30, %v6618_v51  ;;  %155 = vst.msk [vmem:[#allocation2 + $0x109] sm:$0xff] %vm56_vm0, %v122_v32  ;;  %156 = vst.msk [vmem:[#allocation2 + $0x111] sm:$0xff] %vm56_vm0, %v123_v23  ;;  %v1505_v41 = vld [vmem:[#allocation2 + $0xd8] sm:$0xff]  ;;  %v1303_v32 = vadd.f32 %v4898_v1, %v1202_v39 }
  0xe0   :  { %v357_v59 = vmul.f32 %v4595_v56, %v6617_v27  ;;  %2715 = vst.msk [vmem:[#allocation4 + $0x138] sm:$0xff] %vm56_vm0, %v2683_v2  ;;  %522 = vst.msk [vmem:[#allocation4 + $0x50] sm:$0xff] %vm56_vm0, %v490_v53  ;;  %v124_v49 = vld [vmem:[#allocation5 + $0xb0] sm:$0xff]  ;;  %v125_v22 = vld [vmem:[#allocation5 + $0xb8] sm:$0xff]  ;;  %v1171_v1 = vmul.f32 %v4722_v54, %v4635_v55  ;;  %v765_v47 = vadd.f32 %v733_v16, %v664_v37 }
  0xe1   :  { %v1334_v26 = vld [vmem:[#allocation4 + $0x40] sm:$0xff]  ;;  %v1878_v2 = vld [vmem:[#allocation2 + $0xc1] sm:$0xff]  ;;  %157 = vst.msk [vmem:[#allocation2 + $0x121] sm:$0xff] %vm56_vm0, %v124_v49  ;;  %158 = vst.msk [vmem:[#allocation2 + $0x129] sm:$0xff] %vm56_vm0, %v125_v22 }
  0xe2   :  { %v389_v23 = vadd.f32 %v357_v59, %v287_v58  ;;  %v1366_v34 = vadd.f32 %v1334_v26, %v4875_v17  ;;  %2277 = vst.msk [vmem:[#allocation4 + $0x140] sm:$0xff] %vm56_vm0, %v2245_v42  ;;  %v4972_v61 = vld [vmem:[#allocation3 + $0x68] sm:$0xff]  ;;  %v4978_v39 = vld [vmem:[#allocation3 + $0x90] sm:$0xff]  ;;  %v1606_v17 = vmul.f32 %v4576_v50, %v4518_v33  ;;  %v4987_v44 = vld [vmem:[#allocation3 + $0xa0] sm:$0xff]  ;;  %v865_v58 = vadd.f32 %v833_v31, %v764_v20 }
  0xe3   :  { %6619 = vst [vmem:[#allocation19_spill] sm:$0xff] %v4978_v39  ;;  %v1506_v46 = vld [vmem:[#allocation2 + $0xe0] sm:$0xff]  ;;  %v2214_v10 = vld [vmem:[#allocation4 + $0x148] sm:$0xff]  ;;  %1541 = vst.msk [vmem:[#allocation3 + $0x90] sm:$0xff] %vm56_vm0, %v1505_v41  ;;  %v1981_v31 = vmul.f32 %v4669_v21, %v4599_v6  ;;  %v2050_v20 = vmul.f32 %v4673_v0, %v4796_v45  ;;  %v1203_v16 = vadd.f32 %v1171_v1, %v1102_v48 }
  0xe4   :  { %v2778_v49 = vld [vmem:[#allocation4 + $0x130] sm:$0xff]  ;;  %v491_v22 = vadd.f32 %v459_v24, %v389_v23  ;;  %6620 = vst [vmem:[#allocation27_spill] sm:$0xff] %v4987_v44  ;;  %1398 = vst.msk [vmem:[#allocation4 + $0x40] sm:$0xff] %vm56_vm0, %v1366_v34  ;;  %v2246_v53 = vadd.f32 %v2214_v10, %v2182_v9  ;;  %v6621_v59 = vld [vmem:[#allocation18_spill] sm:$0xff]  ;;  %v2589_v23 = vmul.f32 %v4750_v13, %v4972_v61 }
  0xe5   :  { %3698 = vmatprep.mubr.msk.f32.mxu1 %vm56_vm0, %v2778_v49  ;;  %v834_v33 = vmul.f32 %v4710_v14, %v6621_v59  ;;  %v1879_v24 = vld [vmem:[#allocation2 + $0xc9] sm:$0xff]  ;;  %1039 = vst.msk [vmem:[#allocation3 + $0xa0] sm:$0xff] %vm56_vm0, %v4893_v35  ;;  %v4997_v26 = vld [vmem:[#allocation3 + $0xa8] sm:$0xff]  ;;  %v1707_v9 = vadd.f32 %v1675_v5, %v1606_v17  ;;  %v1103_v6 = vmul.f32 %v4718_v28, %v6603_v40 }
  0xe6   :  { %v4993_v42 = vld [vmem:[#allocation3 + $0x98] sm:$0xff]  ;;  %6623 = vst [vmem:[#allocation18_spill] sm:$0xff] %v4997_v26  ;;  %v1335_v41 = vld [vmem:[#allocation4 + $0x48] sm:$0xff]  ;;  %523 = vst.msk [vmem:[#allocation4 + $0x58] sm:$0xff] %vm56_vm0, %v491_v22  ;;  %v1607_v48 = vmul.f32 %v4576_v50, %v4520_v43  ;;  %v1676_v1 = vmul.f32 %v4595_v56, %v4757_v52 }
  0xe7   :  { %6622 = vst [vmem:[#allocation30_spill] sm:$0xff] %v4993_v42  ;;  %v5006_v37 = vld [vmem:[#allocation3 + $0x80] sm:$0xff]  ;;  %1542 = vst.msk [vmem:[#allocation3 + $0x98] sm:$0xff] %vm56_vm0, %v1506_v46  ;;  %v1367_v35 = vadd.f32 %v1335_v41, %v1303_v32  ;;  %v6625_v34 = vld [vmem:[#allocation22_spill] sm:$0xff]  ;;  %v1808_v32 = vadd.f32 %v1776_v18, %v1707_v9  ;;  %v2151_v41 = vmul.f32 %v4710_v14, %v4880_v7 }
  0xe8   :  { %6624 = vst [vmem:[#allocation40_spill] sm:$0xff] %v5006_v37  ;;  %1040 = vst.msk [vmem:[#allocation3 + $0xa8] sm:$0xff] %vm56_vm0, %v4906_v12  ;;  %v1272_v49 = vmul.f32 %v4750_v13, %v6625_v34  ;;  %v5017_v10 = vld [vmem:[#allocation3 + $0x88] sm:$0xff]  ;;  %v1443_v17 = vld [vmem:[#allocation5 + $0x1a0] sm:$0xff]  ;;  %v1172_v12 = vmul.f32 %v4722_v54, %v6607_v57  ;;  %v1777_v18 = vmul.f32 %v4617_v30, %v4813_v8 }
  0xe9   :  { %2278 = vst.msk [vmem:[#allocation4 + $0x148] sm:$0xff] %vm56_vm0, %v2246_v53  ;;  %1914 = vst.msk [vmem:[#allocation3 + $0x80] sm:$0xff] %vm56_vm0, %v1878_v2  ;;  %v1880_v22 = vld [vmem:[#allocation2 + $0xd9] sm:$0xff]  ;;  %v2779_v5 = vld [vmem:[#allocation4 + $0x138] sm:$0xff]  ;;  %v866_v53 = vadd.f32 %v834_v33, %v765_v47  ;;  %v1708_v4 = vadd.f32 %v1676_v1, %v1607_v48  ;;  %v2051_v47 = vmul.f32 %v4673_v0, %v4836_v19 }
  0xea   :  { %6626 = vst [vmem:[#allocation22_spill] sm:$0xff] %v5017_v10  ;;  %v1444_v46 = vld [vmem:[#allocation5 + $0x1a8] sm:$0xff]  ;;  %v897_v26 = vld [vmem:[#allocation4 + $0x50] sm:$0xff]  ;;  %1915 = vst.msk [vmem:[#allocation3 + $0x88] sm:$0xff] %vm56_vm0, %v1879_v24  ;;  %3699 = vmatmul.mubr.msk.f32.gmra.mrb[6].mxu1 %vm56_vm0, %v2779_v5  ;;  %v2082_v5 = vadd.f32 %v2050_v20, %v1981_v31  ;;  %v2621_v31 = vadd.f32 %v2589_v23, %v4970_v38  ;;  %v5048_v20 = vadd.f32 %v1272_v49, %v1203_v16 }
  0xeb   :  { %v1507_v40 = vld [vmem:[#allocation2 + $0xf0] sm:$0xff]  ;;  %1399 = vst.msk [vmem:[#allocation4 + $0x48] sm:$0xff] %vm56_vm0, %v1367_v35  ;;  %v929_v2 = vadd.f32 %v897_v26, %v865_v58  ;;  %v1881_v9 = vld [vmem:[#allocation2 + $0xe1] sm:$0xff]  ;;  %v1508_v43 = vld [vmem:[#allocation2 + $0xf8] sm:$0xff]  ;;  %v1809_v23 = vadd.f32 %v1777_v18, %v1708_v4  ;;  %v2489_v18 = vmul.f32 %v4722_v54, %v4878_v15 }
  0xec   :  { %v189_v44 = vld [vmem:[#allocation2 + $0x108] sm:$0xff]  ;;  %v190_v42 = vld [vmem:[#allocation2 + $0x110] sm:$0xff]  ;;  %1840 = vst.msk [vmem:[#allocation4 + $0x150] sm:$0xff] %vm56_vm0, %v1808_v32  ;;  %v6627_v35 = vld [vmem:[#allocation31_spill] sm:$0xff] }
  0xed   :  { %v5032_v39 = vld [vmem:[#allocation2 + $0x109] sm:$0xff]  ;;  %v1982_v58 = vmul.f32 %v4669_v21, %v6627_v35  ;;  %225 = vst.msk [vmem:[#allocation3 + $0xb0] sm:$0xff] %vm56_vm0, %v189_v44  ;;  %226 = vst.msk [vmem:[#allocation3 + $0xb8] sm:$0xff] %vm56_vm0, %v190_v42  ;;  %v5043_v57 = vld [vmem:[#allocation2 + $0x111] sm:$0xff] }
  0xee   :  { %v2652_v24 = vld [vmem:[#allocation4 + $0x140] sm:$0xff]  ;;  %v2317_v33 = vld [vmem:[#allocation2 + $0xc2] sm:$0xff]  ;;  %961 = vst.msk [vmem:[#allocation4 + $0x50] sm:$0xff] %vm56_vm0, %v929_v2  ;;  %v6632_v2 = vld [vmem:[#allocation26_spill] sm:$0xff] }
  0xef   :  { %v5040_v26 = vld [vmem:[#allocation2 + $0x10a] sm:$0xff]  ;;  %v2684_v10 = vadd.f32 %v2652_v24, %v4964_v62  ;;  %v5050_v32 = vld [vmem:[#allocation3 + $0x70] sm:$0xff]  ;;  %v5055_v44 = vld [vmem:[#allocation2 + $0x112] sm:$0xff]  ;;  %v288_v16 = vmul.f32 %v4576_v50, %v6632_v2  ;;  %1841 = vst.msk [vmem:[#allocation4 + $0x158] sm:$0xff] %vm56_vm0, %v1809_v23  ;;  %v2083_v15 = vadd.f32 %v2051_v47, %v1982_v58  ;;  %v289_v23 = vmul.f32 %v4576_v50, %v6617_v27 }
  0xf0   :  { %6628 = vst [vmem:[#allocation31_spill] sm:$0xff] %v5040_v26  ;;  %v2318_v48 = vld [vmem:[#allocation2 + $0xca] sm:$0xff]  ;;  %v5052_v1 = vld [vmem:[#allocation3 + $0x90] sm:$0xff]  ;;  %1475 = vst.msk [vmem:[#allocation2 + $0x109] sm:$0xff] %vm56_vm0, %v1443_v17  ;;  %v1204_v26 = vadd.f32 %v1172_v12, %v1103_v6 }
  0xf1   :  { %6629 = vst [vmem:[#allocation41_spill] sm:$0xff] %v5052_v1  ;;  %6630 = vst [vmem:[#allocation42_spill] sm:$0xff] %v5055_v44  ;;  %v191_v42 = vld [vmem:[#allocation2 + $0x120] sm:$0xff]  ;;  %v2748_v19 = vld [vmem:[#allocation4 + $0x40] sm:$0xff] }
  0xf2   :  { %v1445_v35 = vld [vmem:[#allocation5 + $0x1b0] sm:$0xff]  ;;  %v6631_v62 = vld [vmem:[#allocation25_spill] sm:$0xff]  ;;  %1916 = vst.msk [vmem:[#allocation3 + $0x90] sm:$0xff] %vm56_vm0, %v1880_v22  ;;  %1476 = vst.msk [vmem:[#allocation2 + $0x111] sm:$0xff] %vm56_vm0, %v1444_v46  ;;  %3653 = vmatprep.mubr.msk.f32.mxu0 %vm56_vm0, %v2748_v19 }
  0xf3   :  { %v1273_v38 = vmul.f32 %v4750_v13, %v6631_v62  ;;  %v5062_v49 = vld [vmem:[#allocation3 + $0xa0] sm:$0xff]  ;;  %v192_v17 = vld [vmem:[#allocation2 + $0x128] sm:$0xff]  ;;  %227 = vst.msk [vmem:[#allocation3 + $0xc0] sm:$0xff] %vm56_vm0, %v191_v42  ;;  %2716 = vst.msk [vmem:[#allocation4 + $0x140] sm:$0xff] %vm56_vm0, %v2684_v10 }
  0xf4   :  { %6633 = vst [vmem:[#allocation26_spill] sm:$0xff] %v5062_v49  ;;  %v1446_v24 = vld [vmem:[#allocation5 + $0x1b8] sm:$0xff]  ;;  %v6634_v12 = vld [vmem:[#allocation21_spill] sm:$0xff]  ;;  %v6636_v49 = vld [vmem:[#allocation15_spill] sm:$0xff] }
  0xf5   :  { %v898_v6 = vld [vmem:[#allocation4 + $0x58] sm:$0xff]  ;;  %v2420_v4 = vmul.f32 %v4718_v28, %v6634_v12  ;;  %v6635_v22 = vld [vmem:[#allocation29_spill] sm:$0xff]  ;;  %v460_v46 = vmul.f32 %v4617_v30, %v6636_v49  ;;  %1543 = vst.msk [vmem:[#allocation3 + $0xa0] sm:$0xff] %vm56_vm0, %v1507_v40  ;;  %v5079_v19 = vld [vmem:[#allocation3 + $0xa8] sm:$0xff]  ;;  %v2183_v12 = vadd.f32 %v2151_v41, %v2082_v5  ;;  %v734_v41 = vmul.f32 %v4673_v0, %v6616_v3 }
  0xf6   :  { %v358_v2 = vmul.f32 %v4595_v56, %v6635_v22  ;;  %v5076_v1 = vld [vmem:[#allocation3 + $0x98] sm:$0xff]  ;;  %6638 = vst [vmem:[#allocation15_spill] sm:$0xff] %v5079_v19  ;;  %228 = vst.msk [vmem:[#allocation3 + $0xc8] sm:$0xff] %vm56_vm0, %v192_v17  ;;  %v2653_v10 = vld [vmem:[#allocation4 + $0x148] sm:$0xff]  ;;  %v930_v42 = vadd.f32 %v898_v6, %v866_v53  ;;  %v665_v53 = vmul.f32 %v4669_v21, %v4552_v36 }
  0xf7   :  { %6637 = vst [vmem:[#allocation21_spill] sm:$0xff] %v5076_v1  ;;  %v6639_v62 = vld [vmem:[#allocation23_spill] sm:$0xff]  ;;  %v5085_v44 = vld [vmem:[#allocation3 + $0x80] sm:$0xff]  ;;  %1917 = vst.msk [vmem:[#allocation3 + $0x98] sm:$0xff] %vm56_vm0, %v1881_v9  ;;  %v2685_v19 = vadd.f32 %v2653_v10, %v2621_v31  ;;  %v5103_v31 = vadd.f32 %v1273_v38, %v1204_v26  ;;  %v2590_v36 = vmul.f32 %v4750_v13, %v5050_v32 }
  0xf8   :  { %v2152_v22 = vmul.f32 %v4710_v14, %v6639_v62  ;;  %1544 = vst.msk [vmem:[#allocation3 + $0xa8] sm:$0xff] %vm56_vm0, %v1508_v43  ;;  %v5089_v40 = vld [vmem:[#allocation2 + $0x121] sm:$0xff]  ;;  %v390_v1 = vadd.f32 %v358_v2, %v288_v16  ;;  %2353 = vst.msk [vmem:[#allocation3 + $0x80] sm:$0xff] %vm56_vm0, %v2317_v33  ;;  %v5096_v5 = vld [vmem:[#allocation3 + $0x88] sm:$0xff]  ;;  %v2521_v26 = vadd.f32 %v2489_v18, %v2420_v4 }
  0xf9   :  { %v2319_v58 = vld [vmem:[#allocation2 + $0xda] sm:$0xff]  ;;  %v5098_v47 = vld [vmem:[#allocation2 + $0x122] sm:$0xff]  ;;  %962 = vst.msk [vmem:[#allocation4 + $0x58] sm:$0xff] %vm56_vm0, %v930_v42  ;;  %2354 = vst.msk [vmem:[#allocation3 + $0x88] sm:$0xff] %vm56_vm0, %v2318_v48  ;;  %v359_v6 = vmul.f32 %v4595_v56, %v6618_v51  ;;  %v735_v56 = vmul.f32 %v4673_v0, %v6621_v59  ;;  %v766_v18 = vadd.f32 %v734_v41, %v665_v53 }
  0xfa   :  { %v5100_v9 = vld [vmem:[#allocation2 + $0x129] sm:$0xff]  ;;  %v2749_v43 = vld [vmem:[#allocation4 + $0x48] sm:$0xff]  ;;  %1477 = vst.msk [vmem:[#allocation2 + $0x121] sm:$0xff] %vm56_vm0, %v1445_v35  ;;  %2717 = vst.msk [vmem:[#allocation4 + $0x148] sm:$0xff] %vm56_vm0, %v2685_v19  ;;  %v492_v38 = vadd.f32 %v460_v46, %v390_v1  ;;  %v2184_v19 = vadd.f32 %v2152_v22, %v2083_v15  ;;  %v666_v1 = vmul.f32 %v4669_v21, %v4610_v11 }
  0xfb   :  { %v5111_v33 = vld [vmem:[#allocation2 + $0x12a] sm:$0xff]  ;;  %3654 = vmatmul.mubr.msk.f32.gmra.mrb[8].mxu0 %vm56_vm0, %v2749_v43  ;;  %v2215_v17 = vld [vmem:[#allocation4 + $0x150] sm:$0xff]  ;;  %v391_v22 = vadd.f32 %v359_v6, %v289_v23  ;;  %v1104_v53 = vmul.f32 %v4718_v28, %v4635_v55  ;;  %v1173_v41 = vmul.f32 %v4722_v54, %v6625_v34  ;;  %v5159_v6 = vld [vmem:[#allocation8 + $0x3] ss:$0 sm:$0xff] }
  0xfc   :  { %v126_v16 = vld [vmem:[#allocation5 + $0xc0] sm:$0xff]  ;;  %v5119_v27 = vld [vmem:[#allocation3 + $0xb0] sm:$0xff]  ;;  %v5121_v48 = vld [vmem:[#allocation3 + $0xb8] sm:$0xff]  ;;  %1478 = vst.msk [vmem:[#allocation2 + $0x129] sm:$0xff] %vm56_vm0, %v1446_v24  ;;  %v2247_v10 = vadd.f32 %v2215_v17, %v2183_v12  ;;  %v1677_v55 = vmul.f32 %v5159_v6, %v4806_v63 }
  0xfd   :  { %v6640_v2 = vld [vmem:[#allocation33_spill] sm:$0xff]  ;;  %6641 = vst [vmem:[#allocation23_spill] sm:$0xff] %v5119_v27  ;;  %159 = vst.msk [vmem:[#allocation2 + $0x139] sm:$0xff] %vm56_vm0, %v126_v16  ;;  %v1336_v35 = vld [vmem:[#allocation4 + $0x50] sm:$0xff]  ;;  %v2622_v27 = vadd.f32 %v2590_v36, %v2521_v26  ;;  %v1274_v36 = vmul.f32 %v4750_v13, %v4934_v29 }
  0xfe   :  { %v461_v50 = vmul.f32 %v4617_v30, %v6640_v2  ;;  %6642 = vst [vmem:[#allocation33_spill] sm:$0xff] %v5121_v48  ;;  %v1882_v4 = vld [vmem:[#allocation2 + $0xf1] sm:$0xff]  ;;  %602 = vst.msk [vmem:[#allocation3 + $0xb0] sm:$0xff] %vm56_vm0, %v5032_v39  ;;  %v1368_v24 = vadd.f32 %v1336_v35, %v5048_v20  ;;  %v5137_v11 = vld [vmem:[#allocation3 + $0x90] sm:$0xff]  ;;  %v2421_v39 = vmul.f32 %v4718_v28, %v4778_v25 }
  0xff   :  { %603 = vst.msk [vmem:[#allocation3 + $0xb8] sm:$0xff] %vm56_vm0, %v5043_v57  ;;  %524 = vst.msk [vmem:[#allocation4 + $0x60] sm:$0xff] %vm56_vm0, %v492_v38  ;;  %v6643_v46 = vld [vmem:[#allocation37_spill] sm:$0xff]  ;;  %v2320_v42 = vld [vmem:[#allocation2 + $0xe2] sm:$0xff]  ;;  %v2490_v57 = vmul.f32 %v4722_v54, %v4972_v61 }
 0x100   :  { %v835_v15 = vmul.f32 %v4710_v14, %v6643_v46  ;;  %v1883_v12 = vld [vmem:[#allocation2 + $0xf9] sm:$0xff]  ;;  %v2780_v43 = vld [vmem:[#allocation4 + $0x140] sm:$0xff]  ;;  %2279 = vst.msk [vmem:[#allocation4 + $0x150] sm:$0xff] %vm56_vm0, %v2247_v10  ;;  %v5144_v20 = vld [vmem:[#allocation3 + $0x78] sm:$0xff]  ;;  %v493_v16 = vadd.f32 %v461_v50, %v391_v22 }
 0x101   :  { %2355 = vst.msk [vmem:[#allocation3 + $0x90] sm:$0xff] %vm56_vm0, %v2319_v58  ;;  %v5151_v23 = vld [vmem:[#allocation3 + $0xa0] sm:$0xff]  ;;  %3701 = vmatprep.mubr.msk.f32.mxu1 %vm56_vm0, %v2780_v43  ;;  %1400 = vst.msk [vmem:[#allocation4 + $0x50] sm:$0xff] %vm56_vm0, %v1368_v24  ;;  %v2216_v25 = vld [vmem:[#allocation4 + $0x158] sm:$0xff]  ;;  %v1778_v58 = vmul.f32 %v4617_v30, %v5006_v37  ;;  %v767_v24 = vadd.f32 %v735_v56, %v666_v1  ;;  %v2522_v56 = vadd.f32 %v2490_v57, %v2421_v39 }
 0x102   :  { %6644 = vst [vmem:[#allocation37_spill] sm:$0xff] %v5151_v23  ;;  %v5155_v17 = vld [vmem:[#allocation8] ss:$0 sm:$0xff]  ;;  %v5165_v35 = vld [vmem:[#allocation3 + $0x98] sm:$0xff]  ;;  %1918 = vst.msk [vmem:[#allocation3 + $0xa0] sm:$0xff] %vm56_vm0, %v1882_v4  ;;  %v2248_v50 = vadd.f32 %v2216_v25, %v2184_v19  ;;  %v867_v23 = vadd.f32 %v835_v15, %v766_v18  ;;  %v2052_v19 = vmul.f32 %v4673_v0, %v4880_v7 }
 0x103   :  { %v1608_v38 = vmul.f32 %v5155_v17, %v4699_v60  ;;  %v5168_v10 = vld [vmem:[#allocation3 + $0xa8] sm:$0xff]  ;;  %v1983_v60 = vmul.f32 %v4669_v21, %v4796_v45  ;;  %2356 = vst.msk [vmem:[#allocation3 + $0x98] sm:$0xff] %vm56_vm0, %v2320_v42  ;;  %v5176_v48 = vld [vmem:[#allocation3 + $0xc0] sm:$0xff]  ;;  %v1337_v30 = vld [vmem:[#allocation4 + $0x58] sm:$0xff]  ;;  %v2591_v42 = vmul.f32 %v4750_v13, %v5144_v20  ;;  %v1205_v18 = vadd.f32 %v1173_v41, %v1104_v53 }
 0x104   :  { %6645 = vst [vmem:[#allocation43_spill] sm:$0xff] %v5168_v10  ;;  %v6646_v22 = vld [vmem:[#allocation38_spill] sm:$0xff]  ;;  %1919 = vst.msk [vmem:[#allocation3 + $0xa8] sm:$0xff] %vm56_vm0, %v1883_v12  ;;  %v1369_v45 = vadd.f32 %v1337_v30, %v5103_v31  ;;  %v1678_v31 = vmul.f32 %v5159_v6, %v4813_v8  ;;  %v2153_v53 = vmul.f32 %v4710_v14, %v5085_v44  ;;  %v5205_v41 = vld [vmem:[#allocation8 + $0x6] ss:$0 sm:$0xff] }
 0x105   :  { %v836_v43 = vmul.f32 %v4710_v14, %v6646_v22  ;;  %6647 = vst [vmem:[#allocation38_spill] sm:$0xff] %v5176_v48  ;;  %525 = vst.msk [vmem:[#allocation4 + $0x68] sm:$0xff] %vm56_vm0, %v493_v16  ;;  %v1709_v4 = vadd.f32 %v1677_v55, %v1608_v38  ;;  %v2781_v1 = vld [vmem:[#allocation4 + $0x148] sm:$0xff]  ;;  %v5196_v12 = vld [vmem:[#allocation3 + $0xb0] sm:$0xff]  ;;  %v2084_v16 = vadd.f32 %v2052_v19, %v1983_v60 }
 0x106   :  { %604 = vst.msk [vmem:[#allocation3 + $0xc0] sm:$0xff] %vm56_vm0, %v5089_v40  ;;  %2280 = vst.msk [vmem:[#allocation4 + $0x158] sm:$0xff] %vm56_vm0, %v2248_v50  ;;  %v5189_v26 = vld [vmem:[#allocation3 + $0xc8] sm:$0xff]  ;;  %3702 = vmatmul.mubr.msk.f32.gmra.mrb[8].mxu1 %vm56_vm0, %v2781_v1  ;;  %v1609_v40 = vmul.f32 %v5155_v17, %v4757_v52  ;;  %v5198_v39 = vld [vmem:[#allocation3 + $0xb8] sm:$0xff] }
 0x107   :  { %6648 = vst [vmem:[#allocation44_spill] sm:$0xff] %v5189_v26  ;;  %v1810_v15 = vadd.f32 %v1778_v58, %v1709_v4  ;;  %6649 = vst [vmem:[#allocation45_spill] sm:$0xff] %v5196_v12  ;;  %v899_v57 = vld [vmem:[#allocation4 + $0x60] sm:$0xff]  ;;  %v868_v25 = vadd.f32 %v836_v43, %v767_v24  ;;  %v6651_v52 = vld [vmem:[#allocation22_spill] sm:$0xff]  ;;  %v2053_v4 = vmul.f32 %v4673_v0, %v6639_v62 }
 0x108   :  { %6650 = vst [vmem:[#allocation46_spill] sm:$0xff] %v5198_v39  ;;  %605 = vst.msk [vmem:[#allocation3 + $0xc8] sm:$0xff] %vm56_vm0, %v5100_v9  ;;  %v1779_v38 = vmul.f32 %v5205_v41, %v6651_v52  ;;  %v2321_v55 = vld [vmem:[#allocation2 + $0xf2] sm:$0xff]  ;;  %v6652_v58 = vld [vmem:[#allocation31_spill] sm:$0xff]  ;;  %v931_v30 = vadd.f32 %v899_v57, %v867_v23  ;;  %v1710_v24 = vadd.f32 %v1678_v31, %v1609_v40 }
 0x109   :  { %1401 = vst.msk [vmem:[#allocation4 + $0x58] sm:$0xff] %vm56_vm0, %v1369_v45  ;;  %1041 = vst.msk [vmem:[#allocation3 + $0xb0] sm:$0xff] %vm56_vm0, %v6652_v58  ;;  %v6653_v50 = vld [vmem:[#allocation42_spill] sm:$0xff]  ;;  %v2654_v9 = vld [vmem:[#allocation4 + $0x150] sm:$0xff]  ;;  %v2623_v26 = vadd.f32 %v2591_v42, %v2522_v56  ;;  %v5237_v57 = vadd.f32 %v1274_v36, %v1205_v18 }
 0x10a   :  { %1042 = vst.msk [vmem:[#allocation3 + $0xb8] sm:$0xff] %vm56_vm0, %v6653_v50  ;;  %1842 = vst.msk [vmem:[#allocation4 + $0x160] sm:$0xff] %vm56_vm0, %v1810_v15  ;;  %v6654_v43 = vld [vmem:[#allocation35_spill] sm:$0xff]  ;;  %v2686_v45 = vadd.f32 %v2654_v9, %v2622_v27  ;;  %v6655_v48 = vld [vmem:[#allocation20_spill] sm:$0xff]  ;;  %v2491_v27 = vmul.f32 %v4722_v54, %v5050_v32  ;;  %v1811_v56 = vadd.f32 %v1779_v38, %v1710_v24 }
 0x10b   :  { %v1984_v60 = vmul.f32 %v4669_v21, %v6654_v43  ;;  %v2322_v19 = vld [vmem:[#allocation2 + $0xfa] sm:$0xff]  ;;  %v1105_v58 = vmul.f32 %v4718_v28, %v6655_v48  ;;  %v6656_v39 = vld [vmem:[#allocation25_spill] sm:$0xff]  ;;  %963 = vst.msk [vmem:[#allocation4 + $0x60] sm:$0xff] %vm56_vm0, %v931_v30  ;;  %v6658_v21 = vld [vmem:[#allocation28_spill] sm:$0xff]  ;;  %v360_v38 = vmul.f32 %v5159_v6, %v6636_v49 }
 0x10c   :  { %v2750_v1 = vld [vmem:[#allocation4 + $0x50] sm:$0xff]  ;;  %v1174_v50 = vmul.f32 %v4722_v54, %v6656_v39  ;;  %v5222_v23 = vld [vmem:[#allocation3 + $0xa0] sm:$0xff]  ;;  %v127_v15 = vld [vmem:[#allocation5 + $0xc8] sm:$0xff]  ;;  %v2422_v0 = vmul.f32 %v4718_v28, %v6658_v21  ;;  %2718 = vst.msk [vmem:[#allocation4 + $0x150] sm:$0xff] %vm56_vm0, %v2686_v45  ;;  %v2185_v45 = vadd.f32 %v2153_v53, %v2084_v16  ;;  %v2154_v21 = vmul.f32 %v4710_v14, %v5096_v5 }
 0x10d   :  { %6657 = vst [vmem:[#allocation22_spill] sm:$0xff] %v5222_v23  ;;  %3656 = vmatprep.mubr.msk.f32.mxu0 %vm56_vm0, %v2750_v1  ;;  %v6659_v42 = vld [vmem:[#allocation29_spill] sm:$0xff]  ;;  %2357 = vst.msk [vmem:[#allocation3 + $0xa0] sm:$0xff] %vm56_vm0, %v2321_v55  ;;  %v5233_v40 = vld [vmem:[#allocation3 + $0xa8] sm:$0xff] }
 0x10e   :  { %v290_v48 = vmul.f32 %v5155_v17, %v6659_v42  ;;  %6660 = vst [vmem:[#allocation31_spill] sm:$0xff] %v5233_v40  ;;  %160 = vst.msk [vmem:[#allocation2 + $0x141] sm:$0xff] %vm56_vm0, %v127_v15  ;;  %v193_v31 = vld [vmem:[#allocation2 + $0x138] sm:$0xff]  ;;  %v6661_v30 = vld [vmem:[#allocation39_spill] sm:$0xff]  ;;  %v2085_v15 = vadd.f32 %v2053_v4, %v1984_v60 }
 0x10f   :  { %v900_v9 = vld [vmem:[#allocation4 + $0x68] sm:$0xff]  ;;  %v5241_v43 = vmul.f32 %v4750_v13, %v6661_v30  ;;  %v5243_v54 = vld [vmem:[#allocation3 + $0x80] sm:$0xff]  ;;  %2358 = vst.msk [vmem:[#allocation3 + $0xa8] sm:$0xff] %vm56_vm0, %v2322_v19  ;;  %229 = vst.msk [vmem:[#allocation3 + $0xd0] sm:$0xff] %vm56_vm0, %v193_v31 }
 0x110   :  { %v6662_v55 = vld [vmem:[#allocation34_spill] sm:$0xff]  ;;  %v5250_v1 = vld [vmem:[#allocation3 + $0xc0] sm:$0xff]  ;;  %v2655_v36 = vld [vmem:[#allocation4 + $0x158] sm:$0xff]  ;;  %v932_v18 = vadd.f32 %v900_v9, %v868_v25  ;;  %1843 = vst.msk [vmem:[#allocation4 + $0x168] sm:$0xff] %vm56_vm0, %v1811_v56  ;;  %v392_v19 = vadd.f32 %v360_v38, %v290_v48  ;;  %v2592_v56 = vmul.f32 %v4750_v13, %v5243_v54 }
 0x111   :  { %v462_v24 = vmul.f32 %v5205_v41, %v6662_v55  ;;  %6663 = vst [vmem:[#allocation42_spill] sm:$0xff] %v5250_v1  ;;  %v1509_v42 = vld [vmem:[#allocation2 + $0x108] sm:$0xff]  ;;  %v1510_v12 = vld [vmem:[#allocation2 + $0x110] sm:$0xff]  ;;  %1043 = vst.msk [vmem:[#allocation3 + $0xc0] sm:$0xff] %vm56_vm0, %v5098_v47  ;;  %v2687_v40 = vadd.f32 %v2655_v36, %v2623_v26  ;;  %v1206_v47 = vadd.f32 %v1174_v50, %v1105_v58 }
 0x112   :  { %v5258_v10 = vld [vmem:[#allocation8 + $0x1] ss:$0 sm:$0xff]  ;;  %v5262_v25 = vld [vmem:[#allocation8 + $0x4] ss:$0 sm:$0xff]  ;;  %v5266_v53 = vld [vmem:[#allocation3 + $0xc8] sm:$0xff]  ;;  %964 = vst.msk [vmem:[#allocation4 + $0x68] sm:$0xff] %vm56_vm0, %v932_v18  ;;  %v2523_v26 = vadd.f32 %v2491_v27, %v2422_v0  ;;  %v2423_v50 = vmul.f32 %v4718_v28, %v4972_v61  ;;  %v361_v27 = vmul.f32 %v5159_v6, %v6640_v2 }
 0x113   :  { %v667_v31 = vmul.f32 %v5258_v10, %v6616_v3  ;;  %v736_v16 = vmul.f32 %v5262_v25, %v6643_v46  ;;  %6664 = vst [vmem:[#allocation35_spill] sm:$0xff] %v5266_v53  ;;  %v128_v14 = vld [vmem:[#allocation5 + $0xd0] sm:$0xff]  ;;  %v129_v60 = vld [vmem:[#allocation5 + $0xd8] sm:$0xff]  ;;  %v291_v3 = vmul.f32 %v5155_v17, %v6618_v51  ;;  %1044 = vst.msk [vmem:[#allocation3 + $0xc8] sm:$0xff] %vm56_vm0, %v5111_v33 }
 0x114   :  { %v2751_v4 = vld [vmem:[#allocation4 + $0x58] sm:$0xff]  ;;  %v5273_v48 = vld [vmem:[#allocation3 + $0xb0] sm:$0xff]  ;;  %161 = vst.msk [vmem:[#allocation2 + $0x151] sm:$0xff] %vm56_vm0, %v128_v14  ;;  %162 = vst.msk [vmem:[#allocation2 + $0x159] sm:$0xff] %vm56_vm0, %v129_v60  ;;  %v494_v0 = vadd.f32 %v462_v24, %v392_v19  ;;  %v668_v14 = vmul.f32 %v5258_v10, %v6621_v59  ;;  %v737_v28 = vmul.f32 %v5262_v25, %v6646_v22 }
 0x115   :  { %6665 = vst [vmem:[#allocation20_spill] sm:$0xff] %v5273_v48  ;;  %v5275_v9 = vld [vmem:[#allocation3 + $0xb8] sm:$0xff]  ;;  %3657 = vmatmul.mubr.msk.f32.gmra.mrb[10].mxu0 %vm56_vm0, %v2751_v4  ;;  %2719 = vst.msk [vmem:[#allocation4 + $0x158] sm:$0xff] %vm56_vm0, %v2687_v40  ;;  %v2217_v58 = vld [vmem:[#allocation4 + $0x160] sm:$0xff]  ;;  %v2186_v40 = vadd.f32 %v2154_v21, %v2085_v15  ;;  %v393_v21 = vadd.f32 %v361_v27, %v291_v3  ;;  %v1307_v23 = vadd.f32 %v5241_v43, %v1206_v47 }
 0x116   :  { %6666 = vst [vmem:[#allocation25_spill] sm:$0xff] %v5275_v9  ;;  %v5285_v51 = vld [vmem:[#allocation3 + $0x88] sm:$0xff]  ;;  %v6668_v38 = vld [vmem:[#allocation36_spill] sm:$0xff]  ;;  %1545 = vst.msk [vmem:[#allocation3 + $0xb0] sm:$0xff] %vm56_vm0, %v1509_v42  ;;  %v2249_v18 = vadd.f32 %v2217_v58, %v2185_v45  ;;  %v1610_v43 = vmul.f32 %v5155_v17, %v4806_v63  ;;  %v1679_v47 = vmul.f32 %v5159_v6, %v5006_v37 }
 0x117   :  { %6667 = vst [vmem:[#allocation28_spill] sm:$0xff] %v5285_v51  ;;  %v463_v33 = vmul.f32 %v5205_v41, %v6668_v38  ;;  %1546 = vst.msk [vmem:[#allocation3 + $0xb8] sm:$0xff] %vm56_vm0, %v1510_v12  ;;  %v1511_v36 = vld [vmem:[#allocation2 + $0x120] sm:$0xff]  ;;  %v130_v24 = vld [vmem:[#allocation5 + $0xe0] sm:$0xff]  ;;  %v768_v12 = vadd.f32 %v736_v16, %v667_v31  ;;  %v5311_v31 = vadd.f32 %v2592_v56, %v2523_v26 }
 0x118   :  { %v570_v61 = vld [vmem:[#allocation2 + $0x139] sm:$0xff]  ;;  %v1338_v60 = vld [vmem:[#allocation4 + $0x60] sm:$0xff]  ;;  %526 = vst.msk [vmem:[#allocation4 + $0x70] sm:$0xff] %vm56_vm0, %v494_v0  ;;  %v6669_v15 = vld [vmem:[#allocation24_spill] sm:$0xff]  ;;  %v5315_v16 = vmul.f32 %v4750_v13, %v5285_v51 }
 0x119   :  { %v131_v19 = vld [vmem:[#allocation5 + $0xe8] sm:$0xff]  ;;  %v5297_v4 = vld [vmem:[#allocation8 + $0x5] ss:$0 sm:$0xff]  ;;  %v5302_v45 = vld [vmem:[#allocation8 + $0x7] ss:$0 sm:$0xff]  ;;  %163 = vst.msk [vmem:[#allocation2 + $0x169] sm:$0xff] %vm56_vm0, %v130_v24  ;;  %v1370_v48 = vadd.f32 %v1338_v60, %v5237_v57 }
 0x11a   :  { %v2492_v42 = vmul.f32 %v5297_v4, %v5144_v20  ;;  %v837_v59 = vmul.f32 %v5302_v45, %v6669_v15  ;;  %v1512_v58 = vld [vmem:[#allocation2 + $0x128] sm:$0xff]  ;;  %v194_v53 = vld [vmem:[#allocation2 + $0x140] sm:$0xff]  ;;  %v1447_v1 = vld [vmem:[#allocation5 + $0x1c0] sm:$0xff]  ;;  %164 = vst.msk [vmem:[#allocation2 + $0x171] sm:$0xff] %vm56_vm0, %v131_v19  ;;  %v495_v19 = vadd.f32 %v463_v33, %v393_v21  ;;  %v769_v33 = vadd.f32 %v737_v28, %v668_v14 }
 0x11b   :  { %v2782_v9 = vld [vmem:[#allocation4 + $0x150] sm:$0xff]  ;;  %2281 = vst.msk [vmem:[#allocation4 + $0x160] sm:$0xff] %vm56_vm0, %v2249_v18  ;;  %v1884_v3 = vld [vmem:[#allocation2 + $0x109] sm:$0xff]  ;;  %v1885_v0 = vld [vmem:[#allocation2 + $0x111] sm:$0xff]  ;;  %v1985_v21 = vmul.f32 %v5258_v10, %v4880_v7 }
 0x11c   :  { %v5317_v27 = vld [vmem:[#allocation3 + $0xd0] sm:$0xff]  ;;  %230 = vst.msk [vmem:[#allocation3 + $0xd8] sm:$0xff] %vm56_vm0, %v194_v53  ;;  %v1448_v24 = vld [vmem:[#allocation5 + $0x1c8] sm:$0xff]  ;;  %3704 = vmatprep.mubr.msk.f32.mxu1 %vm56_vm0, %v2782_v9  ;;  %v6671_v26 = vld [vmem:[#allocation41_spill] sm:$0xff]  ;;  %v2524_v37 = vadd.f32 %v2492_v42, %v2423_v50  ;;  %v869_v51 = vadd.f32 %v837_v59, %v768_v12  ;;  %v1175_v42 = vmul.f32 %v5297_v4, %v4934_v29 }
 0x11d   :  { %6670 = vst [vmem:[#allocation29_spill] sm:$0xff] %v5317_v27  ;;  %v2218_v57 = vld [vmem:[#allocation4 + $0x168] sm:$0xff]  ;;  %v1780_v13 = vmul.f32 %v5205_v41, %v6671_v26  ;;  %v5327_v56 = vld [vmem:[#allocation3 + $0xc0] sm:$0xff]  ;;  %606 = vst.msk [vmem:[#allocation3 + $0xd0] sm:$0xff] %vm56_vm0, %v570_v61 }
 0x11e   :  { %6672 = vst [vmem:[#allocation39_spill] sm:$0xff] %v5327_v56  ;;  %v5330_v18 = vld [vmem:[#allocation2 + $0x13a] sm:$0xff]  ;;  %1402 = vst.msk [vmem:[#allocation4 + $0x60] sm:$0xff] %vm56_vm0, %v1370_v48  ;;  %v2250_v9 = vadd.f32 %v2218_v57, %v2186_v40  ;;  %v6673_v60 = vld [vmem:[#allocation17_spill] sm:$0xff]  ;;  %v1711_v48 = vadd.f32 %v1679_v47, %v1610_v43  ;;  %v2054_v40 = vmul.f32 %v5262_v25, %v5085_v44 }
 0x11f   :  { %v1449_v53 = vld [vmem:[#allocation5 + $0x1d0] sm:$0xff]  ;;  %v838_v63 = vmul.f32 %v5302_v45, %v6673_v60  ;;  %1547 = vst.msk [vmem:[#allocation3 + $0xc0] sm:$0xff] %vm56_vm0, %v1511_v36  ;;  %1479 = vst.msk [vmem:[#allocation2 + $0x139] sm:$0xff] %vm56_vm0, %v1447_v1  ;;  %v1450_v61 = vld [vmem:[#allocation5 + $0x1d8] sm:$0xff] }
 0x120   :  { %v571_v27 = vld [vmem:[#allocation2 + $0x141] sm:$0xff]  ;;  %v1339_v26 = vld [vmem:[#allocation4 + $0x68] sm:$0xff]  ;;  %527 = vst.msk [vmem:[#allocation4 + $0x78] sm:$0xff] %vm56_vm0, %v495_v19  ;;  %v195_v7 = vld [vmem:[#allocation2 + $0x150] sm:$0xff] }
 0x121   :  { %v5339_v56 = vld [vmem:[#allocation2 + $0x142] sm:$0xff]  ;;  %v5344_v14 = vld [vmem:[#allocation3 + $0xc8] sm:$0xff]  ;;  %v1371_v1 = vadd.f32 %v1339_v26, %v1307_v23  ;;  %2282 = vst.msk [vmem:[#allocation4 + $0x168] sm:$0xff] %vm56_vm0, %v2250_v9  ;;  %v5348_v28 = vld [vmem:[#allocation8 + $0x2] ss:$0 sm:$0xff]  ;;  %v1176_v23 = vmul.f32 %v5297_v4, %v6661_v30  ;;  %v2086_v9 = vadd.f32 %v2054_v40, %v1985_v21  ;;  %v2055_v21 = vmul.f32 %v5262_v25, %v5096_v5 }
 0x122   :  { %6674 = vst [vmem:[#allocation36_spill] sm:$0xff] %v5344_v14  ;;  %1480 = vst.msk [vmem:[#allocation2 + $0x141] sm:$0xff] %vm56_vm0, %v1448_v24  ;;  %v2783_v36 = vld [vmem:[#allocation4 + $0x158] sm:$0xff]  ;;  %v1106_v50 = vmul.f32 %v5348_v28, %v6625_v34  ;;  %v1107_v12 = vmul.f32 %v5348_v28, %v6656_v39  ;;  %v5356_v59 = vld [vmem:[#allocation3 + $0xb0] sm:$0xff]  ;;  %v1812_v34 = vadd.f32 %v1780_v13, %v1711_v48 }
 0x123   :  { %6675 = vst [vmem:[#allocation24_spill] sm:$0xff] %v5356_v59  ;;  %v5358_v57 = vld [vmem:[#allocation3 + $0xb8] sm:$0xff]  ;;  %1548 = vst.msk [vmem:[#allocation3 + $0xc8] sm:$0xff] %vm56_vm0, %v1512_v58  ;;  %3705 = vmatmul.mubr.msk.f32.gmra.mrb[10].mxu1 %vm56_vm0, %v2783_v36  ;;  %v1611_v24 = vmul.f32 %v5155_v17, %v4813_v8  ;;  %v1680_v39 = vmul.f32 %v5159_v6, %v6651_v52  ;;  %v196_v58 = vld [vmem:[#allocation2 + $0x158] sm:$0xff]  ;;  %v870_v13 = vadd.f32 %v838_v63, %v769_v33 }
 0x124   :  { %6676 = vst [vmem:[#allocation17_spill] sm:$0xff] %v5358_v57  ;;  %231 = vst.msk [vmem:[#allocation3 + $0xe0] sm:$0xff] %vm56_vm0, %v195_v7  ;;  %v1886_v19 = vld [vmem:[#allocation2 + $0x121] sm:$0xff]  ;;  %v5371_v43 = vld [vmem:[#allocation2 + $0x151] sm:$0xff]  ;;  %v2155_v8 = vmul.f32 %v5302_v45, %v5137_v11  ;;  %v1986_v63 = vmul.f32 %v5258_v10, %v6639_v62  ;;  %v1207_v57 = vadd.f32 %v1175_v42, %v1106_v50 }
 0x125   :  { %1920 = vst.msk [vmem:[#allocation3 + $0xb0] sm:$0xff] %vm56_vm0, %v1884_v3  ;;  %1921 = vst.msk [vmem:[#allocation3 + $0xb8] sm:$0xff] %vm56_vm0, %v1885_v0  ;;  %v5373_v47 = vld [vmem:[#allocation2 + $0x152] sm:$0xff]  ;;  %v901_v26 = vld [vmem:[#allocation4 + $0x70] sm:$0xff]  ;;  %v1712_v33 = vadd.f32 %v1680_v39, %v1611_v24  ;;  %v292_v50 = vmul.f32 %v5155_v17, %v6636_v49 }
 0x126   :  { %1403 = vst.msk [vmem:[#allocation4 + $0x68] sm:$0xff] %vm56_vm0, %v1371_v1  ;;  %v6677_v48 = vld [vmem:[#allocation21_spill] sm:$0xff]  ;;  %1481 = vst.msk [vmem:[#allocation2 + $0x151] sm:$0xff] %vm56_vm0, %v1449_v53  ;;  %v5382_v3 = vld [vmem:[#allocation2 + $0x159] sm:$0xff]  ;;  %v933_v14 = vadd.f32 %v901_v26, %v869_v51 }
 0x127   :  { %v1781_v7 = vmul.f32 %v5205_v41, %v6677_v48  ;;  %232 = vst.msk [vmem:[#allocation3 + $0xe8] sm:$0xff] %vm56_vm0, %v196_v58  ;;  %v5384_v0 = vld [vmem:[#allocation2 + $0x15a] sm:$0xff]  ;;  %v2656_v36 = vld [vmem:[#allocation4 + $0x160] sm:$0xff]  ;;  %1844 = vst.msk [vmem:[#allocation4 + $0x170] sm:$0xff] %vm56_vm0, %v1812_v34  ;;  %v2625_v58 = vadd.f32 %v5315_v16, %v2524_v37 }
 0x128   :  { %v5391_v40 = vld [vmem:[#allocation3 + $0xd8] sm:$0xff]  ;;  %1482 = vst.msk [vmem:[#allocation2 + $0x159] sm:$0xff] %vm56_vm0, %v1450_v61  ;;  %v2688_v1 = vadd.f32 %v2656_v36, %v5311_v31  ;;  %v5396_v51 = vld [vmem:[#allocation8 + $0x8] ss:$0 sm:$0xff]  ;;  %v6679_v34 = vld [vmem:[#allocation19_spill] sm:$0xff]  ;;  %v1208_v31 = vadd.f32 %v1176_v23, %v1107_v12  ;;  %v2493_v12 = vmul.f32 %v5297_v4, %v5243_v54  ;;  %v362_v23 = vmul.f32 %v5159_v6, %v6662_v55 }
 0x129   :  { %6678 = vst [vmem:[#allocation21_spill] sm:$0xff] %v5391_v40  ;;  %v197_v53 = vld [vmem:[#allocation2 + $0x168] sm:$0xff]  ;;  %v1276_v24 = vmul.f32 %v5396_v51, %v6679_v34  ;;  %v5400_v62 = vld [vmem:[#allocation3 + $0xd0] sm:$0xff]  ;;  %607 = vst.msk [vmem:[#allocation3 + $0xd8] sm:$0xff] %vm56_vm0, %v571_v27  ;;  %v1813_v16 = vadd.f32 %v1781_v7, %v1712_v33  ;;  %v669_v55 = vmul.f32 %v5258_v10, %v6643_v46 }
 0x12a   :  { %v2323_v39 = vld [vmem:[#allocation2 + $0x10a] sm:$0xff]  ;;  %6680 = vst [vmem:[#allocation19_spill] sm:$0xff] %v5400_v62  ;;  %233 = vst.msk [vmem:[#allocation3 + $0xf0] sm:$0xff] %vm56_vm0, %v197_v53  ;;  %v6681_v36 = vld [vmem:[#allocation30_spill] sm:$0xff]  ;;  %v394_v59 = vadd.f32 %v362_v23, %v292_v50  ;;  %v293_v46 = vmul.f32 %v5155_v17, %v6640_v2 }
 0x12b   :  { %v198_v26 = vld [vmem:[#allocation2 + $0x170] sm:$0xff]  ;;  %965 = vst.msk [vmem:[#allocation4 + $0x70] sm:$0xff] %vm56_vm0, %v933_v14  ;;  %v1277_v37 = vmul.f32 %v5396_v51, %v6681_v36  ;;  %1045 = vst.msk [vmem:[#allocation3 + $0xd0] sm:$0xff] %vm56_vm0, %v5330_v18  ;;  %v902_v27 = vld [vmem:[#allocation4 + $0x78] sm:$0xff]  ;;  %v2424_v14 = vmul.f32 %v5348_v28, %v5050_v32  ;;  %v2087_v32 = vadd.f32 %v2055_v21, %v1986_v63 }
 0x12c   :  { %v2752_v61 = vld [vmem:[#allocation4 + $0x60] sm:$0xff]  ;;  %234 = vst.msk [vmem:[#allocation3 + $0xf8] sm:$0xff] %vm56_vm0, %v198_v26  ;;  %2720 = vst.msk [vmem:[#allocation4 + $0x160] sm:$0xff] %vm56_vm0, %v2688_v1  ;;  %v5420_v49 = vld [vmem:[#allocation3 + $0x90] sm:$0xff]  ;;  %v934_v1 = vadd.f32 %v902_v27, %v870_v13  ;;  %v2187_v26 = vadd.f32 %v2155_v8, %v2086_v9  ;;  %v1308_v8 = vadd.f32 %v1276_v24, %v1207_v57 }
 0x12d   :  { %v5409_v42 = vld [vmem:[#allocation3 + $0xc0] sm:$0xff]  ;;  %3659 = vmatprep.mubr.msk.f32.mxu0 %vm56_vm0, %v2752_v61  ;;  %v6683_v7 = vld [vmem:[#allocation32_spill] sm:$0xff]  ;;  %v2657_v53 = vld [vmem:[#allocation4 + $0x168] sm:$0xff]  ;;  %1845 = vst.msk [vmem:[#allocation4 + $0x178] sm:$0xff] %vm56_vm0, %v1813_v16  ;;  %v2156_v61 = vmul.f32 %v5302_v45, %v5165_v35  ;;  %v5442_v63 = vadd.f32 %v1277_v37, %v1208_v31  ;;  %v2594_v21 = vmul.f32 %v5396_v51, %v5420_v49 }
 0x12e   :  { %6682 = vst [vmem:[#allocation30_spill] sm:$0xff] %v5409_v42  ;;  %v1887_v40 = vld [vmem:[#allocation2 + $0x129] sm:$0xff]  ;;  %v464_v18 = vmul.f32 %v5205_v41, %v6683_v7  ;;  %v2324_v33 = vld [vmem:[#allocation2 + $0x112] sm:$0xff]  ;;  %1922 = vst.msk [vmem:[#allocation3 + $0xc0] sm:$0xff] %vm56_vm0, %v1886_v19  ;;  %v2689_v42 = vadd.f32 %v2657_v53, %v2625_v58  ;;  %v738_v7 = vmul.f32 %v5262_v25, %v6669_v15 }
 0x12f   :  { %v5430_v62 = vld [vmem:[#allocation3 + $0xc8] sm:$0xff]  ;;  %v5436_v19 = vld [vmem:[#allocation3 + $0xb0] sm:$0xff]  ;;  %v5438_v13 = vld [vmem:[#allocation3 + $0xb8] sm:$0xff]  ;;  %966 = vst.msk [vmem:[#allocation4 + $0x78] sm:$0xff] %vm56_vm0, %v934_v1  ;;  %v363_v31 = vmul.f32 %v5159_v6, %v6668_v38  ;;  %v2188_v27 = vadd.f32 %v2156_v61, %v2087_v32 }
 0x130   :  { %6684 = vst [vmem:[#allocation47_spill] sm:$0xff] %v5430_v62  ;;  %6685 = vst [vmem:[#allocation48_spill] sm:$0xff] %v5436_v19  ;;  %v2753_v9 = vld [vmem:[#allocation4 + $0x68] sm:$0xff]  ;;  %v5450_v58 = vld [vmem:[#allocation3 + $0xe0] sm:$0xff]  ;;  %v496_v24 = vadd.f32 %v464_v18, %v394_v59  ;;  %v739_v59 = vmul.f32 %v5262_v25, %v6673_v60  ;;  %v770_v53 = vadd.f32 %v738_v7, %v669_v55 }
 0x131   :  { %6686 = vst [vmem:[#allocation49_spill] sm:$0xff] %v5438_v13  ;;  %1923 = vst.msk [vmem:[#allocation3 + $0xc8] sm:$0xff] %vm56_vm0, %v1887_v40  ;;  %3660 = vmatmul.mubr.msk.f32.gmra.mrb[12].mxu0 %vm56_vm0, %v2753_v9  ;;  %v2219_v57 = vld [vmem:[#allocation4 + $0x170] sm:$0xff]  ;;  %v2525_v40 = vadd.f32 %v2493_v12, %v2424_v14  ;;  %v6688_v37 = vld [vmem:[#allocation16_spill] sm:$0xff]  ;;  %v1108_v55 = vmul.f32 %v5348_v28, %v4934_v29  ;;  %v1177_v7 = vmul.f32 %v5297_v4, %v6679_v34 }
 0x132   :  { %2359 = vst.msk [vmem:[#allocation3 + $0xb0] sm:$0xff] %vm56_vm0, %v2323_v39  ;;  %2360 = vst.msk [vmem:[#allocation3 + $0xb8] sm:$0xff] %vm56_vm0, %v2324_v33  ;;  %v465_v16 = vmul.f32 %v5205_v41, %v6688_v37  ;;  %v1513_v2 = vld [vmem:[#allocation2 + $0x138] sm:$0xff]  ;;  %v2251_v50 = vadd.f32 %v2219_v57, %v2187_v26  ;;  %v2325_v14 = vld [vmem:[#allocation2 + $0x122] sm:$0xff]  ;;  %v395_v26 = vadd.f32 %v363_v31, %v293_v46 }
 0x133   :  { %6687 = vst [vmem:[#allocation50_spill] sm:$0xff] %v5450_v58  ;;  %2721 = vst.msk [vmem:[#allocation4 + $0x168] sm:$0xff] %vm56_vm0, %v2689_v42  ;;  %v5460_v39 = vld [vmem:[#allocation3 + $0xe8] sm:$0xff]  ;;  %v670_v42 = vmul.f32 %v5258_v10, %v6646_v22  ;;  %v2326_v12 = vld [vmem:[#allocation2 + $0x12a] sm:$0xff]  ;;  %v2626_v13 = vadd.f32 %v2594_v21, %v2525_v40 }
 0x134   :  { %608 = vst.msk [vmem:[#allocation3 + $0xe0] sm:$0xff] %vm56_vm0, %v5371_v43  ;;  %6689 = vst [vmem:[#allocation16_spill] sm:$0xff] %v5460_v39  ;;  %v5466_v23 = vld [vmem:[#allocation3 + $0xd8] sm:$0xff]  ;;  %v1340_v18 = vld [vmem:[#allocation4 + $0x70] sm:$0xff]  ;;  %v2425_v43 = vmul.f32 %v5348_v28, %v5144_v20 }
 0x135   :  { %6690 = vst [vmem:[#allocation51_spill] sm:$0xff] %v5466_v23  ;;  %609 = vst.msk [vmem:[#allocation3 + $0xe8] sm:$0xff] %vm56_vm0, %v5382_v3  ;;  %v5472_v33 = vld [vmem:[#allocation3 + $0x98] sm:$0xff]  ;;  %v6692_v22 = vld [vmem:[#allocation27_spill] sm:$0xff]  ;;  %v1372_v9 = vadd.f32 %v1340_v18, %v1308_v8  ;;  %v497_v8 = vadd.f32 %v465_v16, %v395_v26  ;;  %v1987_v26 = vmul.f32 %v5258_v10, %v5085_v44 }
 0x136   :  { %6691 = vst [vmem:[#allocation52_spill] sm:$0xff] %v5472_v33  ;;  %528 = vst.msk [vmem:[#allocation4 + $0x80] sm:$0xff] %vm56_vm0, %v496_v24  ;;  %v839_v1 = vmul.f32 %v5302_v45, %v6692_v22  ;;  %v5477_v32 = vld [vmem:[#allocation3 + $0xd0] sm:$0xff]  ;;  %v574_v61 = vld [vmem:[#allocation2 + $0x169] sm:$0xff]  ;;  %v2595_v21 = vmul.f32 %v5396_v51, %v5472_v33 }
 0x137   :  { %6693 = vst [vmem:[#allocation27_spill] sm:$0xff] %v5477_v32  ;;  %1046 = vst.msk [vmem:[#allocation3 + $0xd8] sm:$0xff] %vm56_vm0, %v5339_v56  ;;  %v2784_v3 = vld [vmem:[#allocation4 + $0x160] sm:$0xff]  ;;  %v6694_v20 = vld [vmem:[#allocation28_spill] sm:$0xff] }
 0x138   :  { %2283 = vst.msk [vmem:[#allocation4 + $0x170] sm:$0xff] %vm56_vm0, %v2251_v50  ;;  %v2494_v57 = vmul.f32 %v5297_v4, %v6694_v20  ;;  %v5488_v46 = vld [vmem:[#allocation3 + $0xc0] sm:$0xff]  ;;  %1549 = vst.msk [vmem:[#allocation3 + $0xd0] sm:$0xff] %vm56_vm0, %v1513_v2  ;;  %3707 = vmatprep.mubr.msk.f32.mxu1 %vm56_vm0, %v2784_v3  ;;  %v2220_v56 = vld [vmem:[#allocation4 + $0x178] sm:$0xff]  ;;  %v771_v3 = vadd.f32 %v739_v59, %v670_v42  ;;  %v871_v19 = vadd.f32 %v839_v1, %v770_v53 }
 0x139   :  { %6695 = vst [vmem:[#allocation28_spill] sm:$0xff] %v5488_v46  ;;  %v1451_v24 = vld [vmem:[#allocation5 + $0x1e0] sm:$0xff]  ;;  %v6696_v31 = vld [vmem:[#allocation40_spill] sm:$0xff]  ;;  %2361 = vst.msk [vmem:[#allocation3 + $0xc0] sm:$0xff] %vm56_vm0, %v2325_v14  ;;  %v2252_v2 = vadd.f32 %v2220_v56, %v2188_v27  ;;  %v2056_v42 = vmul.f32 %v5262_v25, %v5137_v11 }
 0x13a   :  { %v1612_v50 = vmul.f32 %v5155_v17, %v6696_v31  ;;  %v6697_v18 = vld [vmem:[#allocation41_spill] sm:$0xff]  ;;  %v5499_v32 = vld [vmem:[#allocation3 + $0xf0] sm:$0xff]  ;;  %v1452_v23 = vld [vmem:[#allocation5 + $0x1e8] sm:$0xff]  ;;  %1404 = vst.msk [vmem:[#allocation4 + $0x70] sm:$0xff] %vm56_vm0, %v1372_v9  ;;  %v2526_v56 = vadd.f32 %v2494_v57, %v2425_v43 }
 0x13b   :  { %v1681_v39 = vmul.f32 %v5159_v6, %v6697_v18  ;;  %v6698_v58 = vld [vmem:[#allocation37_spill] sm:$0xff]  ;;  %6699 = vst [vmem:[#allocation40_spill] sm:$0xff] %v5499_v32  ;;  %v6700_v62 = vld [vmem:[#allocation18_spill] sm:$0xff]  ;;  %610 = vst.msk [vmem:[#allocation3 + $0xf0] sm:$0xff] %vm56_vm0, %v574_v61 }
 0x13c   :  { %v1782_v29 = vmul.f32 %v5205_v41, %v6698_v58  ;;  %v840_v16 = vmul.f32 %v5302_v45, %v6700_v62  ;;  %v5506_v31 = vld [vmem:[#allocation3 + $0xc8] sm:$0xff]  ;;  %v5509_v46 = vld [vmem:[#allocation2 + $0x16a] sm:$0xff]  ;;  %529 = vst.msk [vmem:[#allocation4 + $0x88] sm:$0xff] %vm56_vm0, %v497_v8  ;;  %v1514_v44 = vld [vmem:[#allocation2 + $0x140] sm:$0xff] }
 0x13d   :  { %6701 = vst [vmem:[#allocation41_spill] sm:$0xff] %v5506_v31  ;;  %v5511_v14 = vld [vmem:[#allocation3 + $0xf8] sm:$0xff]  ;;  %v1713_v27 = vadd.f32 %v1681_v39, %v1612_v50  ;;  %2362 = vst.msk [vmem:[#allocation3 + $0xc8] sm:$0xff] %vm56_vm0, %v2326_v12  ;;  %v1888_v59 = vld [vmem:[#allocation2 + $0x139] sm:$0xff]  ;;  %v1209_v12 = vadd.f32 %v1177_v7, %v1108_v55  ;;  %v2088_v50 = vadd.f32 %v2056_v42, %v1987_v26 }
 0x13e   :  { %6702 = vst [vmem:[#allocation53_spill] sm:$0xff] %v5511_v14  ;;  %v1341_v32 = vld [vmem:[#allocation4 + $0x78] sm:$0xff]  ;;  %1483 = vst.msk [vmem:[#allocation2 + $0x169] sm:$0xff] %vm56_vm0, %v1451_v24  ;;  %v2785_v61 = vld [vmem:[#allocation4 + $0x168] sm:$0xff]  ;;  %v1613_v24 = vmul.f32 %v5155_v17, %v6651_v52  ;;  %v872_v7 = vadd.f32 %v840_v16, %v771_v3  ;;  %v1988_v16 = vmul.f32 %v5258_v10, %v5096_v5 }
 0x13f   :  { %v1373_v9 = vadd.f32 %v1341_v32, %v5442_v63  ;;  %2284 = vst.msk [vmem:[#allocation4 + $0x178] sm:$0xff] %vm56_vm0, %v2252_v2  ;;  %v6703_v40 = vld [vmem:[#allocation26_spill] sm:$0xff]  ;;  %v5524_v53 = vld [vmem:[#allocation3 + $0xe0] sm:$0xff]  ;;  %3708 = vmatmul.mubr.msk.f32.gmra.mrb[12].mxu1 %vm56_vm0, %v2785_v61  ;;  %v1814_v8 = vadd.f32 %v1782_v29, %v1713_v27  ;;  %v1682_v63 = vmul.f32 %v5159_v6, %v6677_v48  ;;  %v132_v57 = vld [vmem:[#allocation5 + $0xf0] sm:$0xff] }
 0x140   :  { %v1278_v39 = vmul.f32 %v5396_v51, %v6703_v40  ;;  %6704 = vst [vmem:[#allocation26_spill] sm:$0xff] %v5524_v53  ;;  %v575_v1 = vld [vmem:[#allocation2 + $0x171] sm:$0xff]  ;;  %1047 = vst.msk [vmem:[#allocation3 + $0xe0] sm:$0xff] %vm56_vm0, %v5373_v47  ;;  %v6707_v2 = vld [vmem:[#allocation43_spill] sm:$0xff]  ;;  %v2057_v26 = vmul.f32 %v5262_v25, %v5165_v35 }
 0x141   :  { %v5533_v43 = vld [vmem:[#allocation3 + $0xe8] sm:$0xff]  ;;  %611 = vst.msk [vmem:[#allocation3 + $0xf8] sm:$0xff] %vm56_vm0, %v575_v1  ;;  %1405 = vst.msk [vmem:[#allocation4 + $0x78] sm:$0xff] %vm56_vm0, %v1373_v9  ;;  %v903_v55 = vld [vmem:[#allocation4 + $0x80] sm:$0xff]  ;;  %v1783_v27 = vmul.f32 %v5205_v41, %v6707_v2  ;;  %v1714_v3 = vadd.f32 %v1682_v63, %v1613_v24 }
 0x142   :  { %6705 = vst [vmem:[#allocation54_spill] sm:$0xff] %v5533_v43  ;;  %v5536_v32 = vld [vmem:[#allocation2 + $0x172] sm:$0xff]  ;;  %v5543_v61 = vld [vmem:[#allocation3 + $0xd8] sm:$0xff]  ;;  %1048 = vst.msk [vmem:[#allocation3 + $0xe8] sm:$0xff] %vm56_vm0, %v5384_v0  ;;  %v935_v1 = vadd.f32 %v903_v55, %v871_v19  ;;  %v1109_v19 = vmul.f32 %v5348_v28, %v6661_v30 }
 0x143   :  { %v6706_v29 = vld [vmem:[#allocation22_spill] sm:$0xff]  ;;  %1484 = vst.msk [vmem:[#allocation2 + $0x171] sm:$0xff] %vm56_vm0, %v1452_v23  ;;  %v133_v47 = vld [vmem:[#allocation5 + $0xf8] sm:$0xff]  ;;  %165 = vst.msk [vmem:[#allocation2 + $0x181] sm:$0xff] %vm56_vm0, %v132_v57  ;;  %v2627_v23 = vadd.f32 %v2595_v21, %v2526_v56  ;;  %v1815_v56 = vadd.f32 %v1783_v27, %v1714_v3 }
 0x144   :  { %v2157_v52 = vmul.f32 %v5302_v45, %v6706_v29  ;;  %6708 = vst [vmem:[#allocation22_spill] sm:$0xff] %v5543_v61  ;;  %v2658_v9 = vld [vmem:[#allocation4 + $0x170] sm:$0xff]  ;;  %1846 = vst.msk [vmem:[#allocation4 + $0x180] sm:$0xff] %vm56_vm0, %v1814_v8  ;;  %v1178_v8 = vmul.f32 %v5297_v4, %v6681_v36  ;;  %v5563_v5 = vld [vmem:[#allocation2 + $0x198] sm:$0xff] }
 0x145   :  { %1550 = vst.msk [vmem:[#allocation3 + $0xd8] sm:$0xff] %vm56_vm0, %v1514_v44  ;;  %v5555_v42 = vld [vmem:[#allocation3 + $0xd0] sm:$0xff]  ;;  %166 = vst.msk [vmem:[#allocation2 + $0x189] sm:$0xff] %vm56_vm0, %v133_v47  ;;  %v2690_v0 = vadd.f32 %v2658_v9, %v2626_v13  ;;  %v2426_v44 = vmul.f32 %v5348_v28, %v5243_v54  ;;  %v2495_v13 = vmul.f32 %v5297_v4, %v5420_v49  ;;  %v6711_v21 = vld [vmem:[#allocation34_spill] sm:$0xff] }
 0x146   :  { %6709 = vst [vmem:[#allocation43_spill] sm:$0xff] %v5555_v42  ;;  %1924 = vst.msk [vmem:[#allocation3 + $0xd0] sm:$0xff] %vm56_vm0, %v1888_v59  ;;  %v2754_v24 = vld [vmem:[#allocation4 + $0x70] sm:$0xff]  ;;  %v294_v30 = vmul.f32 %v5155_v17, %v6711_v21  ;;  %v5578_v59 = vadd.f32 %v1278_v39, %v1209_v12  ;;  %v904_v57 = vld [vmem:[#allocation4 + $0x88] sm:$0xff]  ;;  %v2189_v12 = vadd.f32 %v2157_v52, %v2088_v50 }
 0x147   :  { %6710 = vst [vmem:[#allocation55_spill] sm:$0xff] %v5563_v5  ;;  %967 = vst.msk [vmem:[#allocation4 + $0x80] sm:$0xff] %vm56_vm0, %v935_v1  ;;  %v5572_v63 = vld [vmem:[#allocation3 + $0xf0] sm:$0xff]  ;;  %3662 = vmatprep.mubr.msk.f32.mxu0 %vm56_vm0, %v2754_v24  ;;  %v5584_v27 = vld [vmem:[#allocation3 + $0xa0] sm:$0xff]  ;;  %v936_v39 = vadd.f32 %v904_v57, %v872_v7  ;;  %v2089_v24 = vadd.f32 %v2057_v26, %v1988_v16  ;;  %v1210_v26 = vadd.f32 %v1178_v8, %v1109_v19 }
 0x148   :  { %6712 = vst [vmem:[#allocation34_spill] sm:$0xff] %v5572_v63  ;;  %237 = vst.msk [vmem:[#allocation3 + $0x110] sm:$0xff] %vm56_vm0, %v5563_v5  ;;  %v6713_v54 = vld [vmem:[#allocation15_spill] sm:$0xff]  ;;  %v6714_v47 = vld [vmem:[#allocation32_spill] sm:$0xff]  ;;  %v671_v5 = vmul.f32 %v5258_v10, %v6669_v15  ;;  %v295_v15 = vmul.f32 %v5155_v17, %v6668_v38  ;;  %v2427_v8 = vmul.f32 %v5348_v28, %v6694_v20 }
 0x149   :  { %2722 = vst.msk [vmem:[#allocation4 + $0x170] sm:$0xff] %vm56_vm0, %v2690_v0  ;;  %v5582_v55 = vmul.f32 %v5396_v51, %v6713_v54  ;;  %v364_v9 = vmul.f32 %v5159_v6, %v6714_v47  ;;  %v6715_v1 = vld [vmem:[#allocation23_spill] sm:$0xff]  ;;  %v1515_v21 = vld [vmem:[#allocation2 + $0x150] sm:$0xff]  ;;  %1049 = vst.msk [vmem:[#allocation3 + $0xf0] sm:$0xff] %vm56_vm0, %v5509_v46  ;;  %v740_v46 = vmul.f32 %v5262_v25, %v6692_v22 }
 0x14a   :  { %v466_v3 = vmul.f32 %v5205_v41, %v6715_v1  ;;  %v2659_v0 = vld [vmem:[#allocation4 + $0x178] sm:$0xff]  ;;  %1847 = vst.msk [vmem:[#allocation4 + $0x188] sm:$0xff] %vm56_vm0, %v1815_v56  ;;  %v6716_v63 = vld [vmem:[#allocation31_spill] sm:$0xff]  ;;  %v1516_v53 = vld [vmem:[#allocation2 + $0x158] sm:$0xff]  ;;  %v2596_v56 = vmul.f32 %v5396_v51, %v5584_v27  ;;  %v741_v20 = vmul.f32 %v5262_v25, %v6700_v62 }
 0x14b   :  { %v2158_v14 = vmul.f32 %v5302_v45, %v6716_v63  ;;  %v1889_v43 = vld [vmem:[#allocation2 + $0x141] sm:$0xff]  ;;  %v2691_v61 = vadd.f32 %v2659_v0, %v2627_v23  ;;  %v5595_v42 = vld [vmem:[#allocation3 + $0xa8] sm:$0xff]  ;;  %v396_v31 = vadd.f32 %v364_v9, %v294_v30  ;;  %v5601_v7 = vld [vmem:[#allocation3 + $0xe0] sm:$0xff]  ;;  %968 = vst.msk [vmem:[#allocation4 + $0x88] sm:$0xff] %vm56_vm0, %v936_v39  ;;  %v2527_v23 = vadd.f32 %v2495_v13, %v2426_v44 }
 0x14c   :  { %6717 = vst [vmem:[#allocation15_spill] sm:$0xff] %v5595_v42  ;;  %6718 = vst [vmem:[#allocation32_spill] sm:$0xff] %v5601_v7  ;;  %v5603_v50 = vld [vmem:[#allocation3 + $0xf8] sm:$0xff]  ;;  %v5605_v52 = vld [vmem:[#allocation2 + $0x1a0] sm:$0xff]  ;;  %v365_v44 = vmul.f32 %v5159_v6, %v6688_v37  ;;  %v1311_v62 = vadd.f32 %v5582_v55, %v1210_v26  ;;  %v1614_v26 = vmul.f32 %v5155_v17, %v6697_v18 }
 0x14d   :  { %6719 = vst [vmem:[#allocation23_spill] sm:$0xff] %v5603_v50  ;;  %6720 = vst [vmem:[#allocation31_spill] sm:$0xff] %v5605_v52  ;;  %v2755_v16 = vld [vmem:[#allocation4 + $0x78] sm:$0xff]  ;;  %v2327_v30 = vld [vmem:[#allocation2 + $0x13a] sm:$0xff]  ;;  %v498_v38 = vadd.f32 %v466_v3, %v396_v31  ;;  %v2190_v39 = vadd.f32 %v2158_v14, %v2089_v24  ;;  %v772_v14 = vadd.f32 %v740_v46, %v671_v5 }
 0x14e   :  { %1551 = vst.msk [vmem:[#allocation3 + $0xe0] sm:$0xff] %vm56_vm0, %v1515_v21  ;;  %v5613_v57 = vld [vmem:[#allocation3 + $0xe8] sm:$0xff]  ;;  %1050 = vst.msk [vmem:[#allocation3 + $0xf8] sm:$0xff] %vm56_vm0, %v5536_v32  ;;  %3663 = vmatmul.mubr.msk.f32.gmra.mrb[14].mxu0 %vm56_vm0, %v2755_v16  ;;  %v2221_v19 = vld [vmem:[#allocation4 + $0x180] sm:$0xff]  ;;  %v397_v24 = vadd.f32 %v365_v44, %v295_v15  ;;  %v5652_v5 = vmul.f32 %v5396_v51, %v5595_v42  ;;  %v1989_v18 = vmul.f32 %v5258_v10, %v5137_v11 }
 0x14f   :  { %6721 = vst [vmem:[#allocation56_spill] sm:$0xff] %v5613_v57  ;;  %238 = vst.msk [vmem:[#allocation3 + $0x118] sm:$0xff] %vm56_vm0, %v5605_v52  ;;  %v6722_v13 = vld [vmem:[#allocation33_spill] sm:$0xff]  ;;  %v5627_v21 = vld [vmem:[#allocation3 + $0xd8] sm:$0xff]  ;;  %v2253_v0 = vadd.f32 %v2221_v19, %v2189_v12 }
 0x150   :  { %2723 = vst.msk [vmem:[#allocation4 + $0x178] sm:$0xff] %vm56_vm0, %v2691_v61  ;;  %v467_v9 = vmul.f32 %v5205_v41, %v6722_v13  ;;  %6723 = vst [vmem:[#allocation33_spill] sm:$0xff] %v5627_v21  ;;  %v1453_v32 = vld [vmem:[#allocation5 + $0x1f0] sm:$0xff]  ;;  %v672_v61 = vmul.f32 %v5258_v10, %v6673_v60  ;;  %v1517_v3 = vld [vmem:[#allocation2 + $0x168] sm:$0xff] }
 0x151   :  { %1552 = vst.msk [vmem:[#allocation3 + $0xe8] sm:$0xff] %vm56_vm0, %v1516_v53  ;;  %v5634_v31 = vld [vmem:[#allocation3 + $0xd0] sm:$0xff]  ;;  %1925 = vst.msk [vmem:[#allocation3 + $0xd8] sm:$0xff] %vm56_vm0, %v1889_v43  ;;  %v1454_v16 = vld [vmem:[#allocation5 + $0x1f8] sm:$0xff]  ;;  %v2496_v53 = vmul.f32 %v5297_v4, %v5472_v33  ;;  %v5648_v33 = vadd.f32 %v2596_v56, %v2527_v23  ;;  %v1683_v23 = vmul.f32 %v5159_v6, %v6698_v58 }
 0x152   :  { %6724 = vst [vmem:[#allocation57_spill] sm:$0xff] %v5634_v31  ;;  %v5637_v50 = vld [vmem:[#allocation2 + $0x199] sm:$0xff]  ;;  %v1342_v57 = vld [vmem:[#allocation4 + $0x80] sm:$0xff]  ;;  %530 = vst.msk [vmem:[#allocation4 + $0x90] sm:$0xff] %vm56_vm0, %v498_v38  ;;  %v499_v55 = vadd.f32 %v467_v9, %v397_v24 }
 0x153   :  { %v6725_v12 = vld [vmem:[#allocation45_spill] sm:$0xff]  ;;  %2363 = vst.msk [vmem:[#allocation3 + $0xd0] sm:$0xff] %vm56_vm0, %v2327_v30  ;;  %v199_v43 = vld [vmem:[#allocation2 + $0x180] sm:$0xff]  ;;  %v200_v21 = vld [vmem:[#allocation2 + $0x188] sm:$0xff]  ;;  %v1374_v52 = vadd.f32 %v1342_v57, %v5578_v59  ;;  %v2528_v58 = vadd.f32 %v2496_v53, %v2427_v8  ;;  %v1110_v8 = vmul.f32 %v5348_v28, %v6679_v34  ;;  %v1179_v53 = vmul.f32 %v5297_v4, %v6703_v40 }
 0x154   :  { %v841_v60 = vmul.f32 %v5302_v45, %v6725_v12  ;;  %v1890_v19 = vld [vmem:[#allocation2 + $0x151] sm:$0xff]  ;;  %v2786_v31 = vld [vmem:[#allocation4 + $0x170] sm:$0xff]  ;;  %2285 = vst.msk [vmem:[#allocation4 + $0x180] sm:$0xff] %vm56_vm0, %v2253_v0  ;;  %235 = vst.msk [vmem:[#allocation3 + $0x100] sm:$0xff] %vm56_vm0, %v199_v43 }
 0x155   :  { %v1518_v7 = vld [vmem:[#allocation2 + $0x170] sm:$0xff]  ;;  %v1891_v46 = vld [vmem:[#allocation2 + $0x159] sm:$0xff]  ;;  %v5657_v30 = vld [vmem:[#allocation2 + $0x181] sm:$0xff]  ;;  %236 = vst.msk [vmem:[#allocation3 + $0x108] sm:$0xff] %vm56_vm0, %v200_v21  ;;  %3710 = vmatprep.mubr.msk.f32.mxu1 %vm56_vm0, %v2786_v31  ;;  %v773_v31 = vadd.f32 %v741_v20, %v672_v61 }
 0x156   :  { %v5654_v15 = vld [vmem:[#allocation3 + $0xf0] sm:$0xff]  ;;  %v2222_v59 = vld [vmem:[#allocation4 + $0x188] sm:$0xff]  ;;  %v6727_v56 = vld [vmem:[#allocation24_spill] sm:$0xff]  ;;  %1406 = vst.msk [vmem:[#allocation4 + $0x80] sm:$0xff] %vm56_vm0, %v1374_v52  ;;  %v873_v42 = vadd.f32 %v841_v60, %v772_v14  ;;  %v1715_v52 = vadd.f32 %v1683_v23, %v1614_v26  ;;  %v1111_v14 = vmul.f32 %v5348_v28, %v6681_v36  ;;  %v1684_v36 = vmul.f32 %v5159_v6, %v6707_v2 }
 0x157   :  { %6726 = vst [vmem:[#allocation45_spill] sm:$0xff] %v5654_v15  ;;  %v1784_v57 = vmul.f32 %v5205_v41, %v6727_v56  ;;  %v2328_v38 = vld [vmem:[#allocation2 + $0x142] sm:$0xff]  ;;  %1553 = vst.msk [vmem:[#allocation3 + $0xf0] sm:$0xff] %vm56_vm0, %v1517_v3  ;;  %v2254_v21 = vadd.f32 %v2222_v59, %v2190_v39  ;;  %v6728_v9 = vld [vmem:[#allocation46_spill] sm:$0xff]  ;;  %v2058_v39 = vmul.f32 %v5262_v25, %v6706_v29 }
 0x158   :  { %v5668_v44 = vld [vmem:[#allocation2 + $0x182] sm:$0xff]  ;;  %v842_v24 = vmul.f32 %v5302_v45, %v6728_v9  ;;  %v5676_v43 = vld [vmem:[#allocation2 + $0x18a] sm:$0xff]  ;;  %v1343_v56 = vld [vmem:[#allocation4 + $0x88] sm:$0xff]  ;;  %531 = vst.msk [vmem:[#allocation4 + $0x98] sm:$0xff] %vm56_vm0, %v499_v55  ;;  %v1615_v59 = vmul.f32 %v5155_v17, %v6677_v48 }
 0x159   :  { %v577_v0 = vld [vmem:[#allocation2 + $0x189] sm:$0xff]  ;;  %1485 = vst.msk [vmem:[#allocation2 + $0x181] sm:$0xff] %vm56_vm0, %v1453_v32  ;;  %v5678_v15 = vld [vmem:[#allocation3 + $0x110] sm:$0xff]  ;;  %v1375_v20 = vadd.f32 %v1343_v56, %v1311_v62  ;;  %2286 = vst.msk [vmem:[#allocation4 + $0x188] sm:$0xff] %vm56_vm0, %v2254_v21  ;;  %v1180_v62 = vmul.f32 %v5297_v4, %v6713_v54  ;;  %v1816_v34 = vadd.f32 %v1784_v57, %v1715_v52 }
 0x15a   :  { %6729 = vst [vmem:[#allocation46_spill] sm:$0xff] %v5678_v15  ;;  %v5680_v3 = vld [vmem:[#allocation2 + $0x1a1] sm:$0xff]  ;;  %v5685_v61 = vld [vmem:[#allocation3 + $0xe0] sm:$0xff]  ;;  %1486 = vst.msk [vmem:[#allocation2 + $0x189] sm:$0xff] %vm56_vm0, %v1454_v16  ;;  %v2090_v26 = vadd.f32 %v2058_v39, %v1989_v18  ;;  %v1990_v52 = vmul.f32 %v5258_v10, %v5165_v35 }
 0x15b   :  { %6730 = vst [vmem:[#allocation58_spill] sm:$0xff] %v5685_v61  ;;  %v5687_v11 = vld [vmem:[#allocation3 + $0xf8] sm:$0xff]  ;;  %614 = vst.msk [vmem:[#allocation3 + $0x110] sm:$0xff] %vm56_vm0, %v5637_v50  ;;  %v5700_v60 = vld [vmem:[#allocation3 + $0xe8] sm:$0xff]  ;;  %v742_v61 = vmul.f32 %v5262_v25, %v6725_v12 }
 0x15c   :  { %6731 = vst [vmem:[#allocation59_spill] sm:$0xff] %v5687_v11  ;;  %v2787_v32 = vld [vmem:[#allocation4 + $0x178] sm:$0xff]  ;;  %1926 = vst.msk [vmem:[#allocation3 + $0xe0] sm:$0xff] %vm56_vm0, %v1890_v19  ;;  %v874_v19 = vadd.f32 %v842_v24, %v773_v31  ;;  %v6736_v57 = vld [vmem:[#allocation17_spill] sm:$0xff]  ;;  %v2059_v31 = vmul.f32 %v5262_v25, %v6716_v63 }
 0x15d   :  { %6732 = vst [vmem:[#allocation60_spill] sm:$0xff] %v5700_v60  ;;  %1554 = vst.msk [vmem:[#allocation3 + $0xf8] sm:$0xff] %vm56_vm0, %v1518_v7  ;;  %v5703_v16 = vld [vmem:[#allocation3 + $0x118] sm:$0xff]  ;;  %3711 = vmatmul.mubr.msk.f32.gmra.mrb[14].mxu1 %vm56_vm0, %v2787_v32  ;;  %v905_v7 = vld [vmem:[#allocation4 + $0x90] sm:$0xff]  ;;  %v1785_v17 = vmul.f32 %v5205_v41, %v6736_v57  ;;  %v1211_v32 = vadd.f32 %v1179_v53, %v1110_v8 }
 0x15e   :  { %6733 = vst [vmem:[#allocation61_spill] sm:$0xff] %v5703_v16  ;;  %v5712_v55 = vld [vmem:[#allocation3 + $0xd8] sm:$0xff]  ;;  %1927 = vst.msk [vmem:[#allocation3 + $0xe8] sm:$0xff] %vm56_vm0, %v1891_v46  ;;  %v2660_v48 = vld [vmem:[#allocation4 + $0x180] sm:$0xff]  ;;  %v937_v21 = vadd.f32 %v905_v7, %v873_v42  ;;  %v1716_v46 = vadd.f32 %v1684_v36, %v1615_v59  ;;  %v1212_v36 = vadd.f32 %v1180_v62, %v1111_v14 }
 0x15f   :  { %6734 = vst [vmem:[#allocation62_spill] sm:$0xff] %v5712_v55  ;;  %615 = vst.msk [vmem:[#allocation3 + $0x118] sm:$0xff] %vm56_vm0, %v5680_v3  ;;  %v6735_v23 = vld [vmem:[#allocation48_spill] sm:$0xff]  ;;  %v5728_v24 = vld [vmem:[#allocation3 + $0x100] sm:$0xff]  ;;  %v2692_v39 = vadd.f32 %v2660_v48, %v5648_v33  ;;  %v2497_v14 = vmul.f32 %v5297_v4, %v5584_v27 }
 0x160   :  { %1407 = vst.msk [vmem:[#allocation4 + $0x88] sm:$0xff] %vm56_vm0, %v1375_v20  ;;  %v2159_v56 = vmul.f32 %v5302_v45, %v6735_v23  ;;  %2364 = vst.msk [vmem:[#allocation3 + $0xd8] sm:$0xff] %vm56_vm0, %v2328_v38  ;;  %v1892_v6 = vld [vmem:[#allocation2 + $0x169] sm:$0xff]  ;;  %v5730_v18 = vld [vmem:[#allocation3 + $0x108] sm:$0xff]  ;;  %v2629_v38 = vadd.f32 %v5652_v5, %v2528_v58  ;;  %v1817_v58 = vadd.f32 %v1785_v17, %v1716_v46 }
 0x161   :  { %1848 = vst.msk [vmem:[#allocation4 + $0x190] sm:$0xff] %vm56_vm0, %v1816_v34  ;;  %6737 = vst [vmem:[#allocation48_spill] sm:$0xff] %v5728_v24  ;;  %v6739_v20 = vld [vmem:[#allocation20_spill] sm:$0xff]  ;;  %v2329_v34 = vld [vmem:[#allocation2 + $0x152] sm:$0xff] }
 0x162   :  { %6738 = vst [vmem:[#allocation17_spill] sm:$0xff] %v5730_v18  ;;  %v1280_v42 = vmul.f32 %v5396_v51, %v6739_v20  ;;  %v5736_v59 = vld [vmem:[#allocation3 + $0xf0] sm:$0xff]  ;;  %612 = vst.msk [vmem:[#allocation3 + $0x100] sm:$0xff] %vm56_vm0, %v5657_v30  ;;  %v2756_v35 = vld [vmem:[#allocation4 + $0x80] sm:$0xff]  ;;  %v2191_v16 = vadd.f32 %v2159_v56, %v2090_v26 }
 0x163   :  { %6740 = vst [vmem:[#allocation20_spill] sm:$0xff] %v5736_v59  ;;  %613 = vst.msk [vmem:[#allocation3 + $0x108] sm:$0xff] %vm56_vm0, %v577_v0  ;;  %v6741_v7 = vld [vmem:[#allocation25_spill] sm:$0xff]  ;;  %v2330_v53 = vld [vmem:[#allocation2 + $0x15a] sm:$0xff]  ;;  %3665 = vmatprep.mubr.msk.f32.mxu0 %vm56_vm0, %v2756_v35  ;;  %v2428_v0 = vmul.f32 %v5348_v28, %v5420_v49  ;;  %v2091_v49 = vadd.f32 %v2059_v31, %v1990_v52 }
 0x164   :  { %969 = vst.msk [vmem:[#allocation4 + $0x90] sm:$0xff] %vm56_vm0, %v937_v21  ;;  %v1281_v33 = vmul.f32 %v5396_v51, %v6741_v7  ;;  %v5744_v5 = vld [vmem:[#allocation8] ss:$0 sm:$0xff]  ;;  %1928 = vst.msk [vmem:[#allocation3 + $0xf0] sm:$0xff] %vm56_vm0, %v1892_v6  ;;  %v1893_v48 = vld [vmem:[#allocation2 + $0x171] sm:$0xff]  ;;  %v1312_v52 = vadd.f32 %v1280_v42, %v1211_v32 }
 0x165   :  { %v296_v8 = vmul.f32 %v5744_v5, %v6714_v47  ;;  %2724 = vst.msk [vmem:[#allocation4 + $0x180] sm:$0xff] %vm56_vm0, %v2692_v39  ;;  %v906_v30 = vld [vmem:[#allocation4 + $0x98] sm:$0xff]  ;;  %v5755_v62 = vld [vmem:[#allocation3 + $0xb0] sm:$0xff]  ;;  %v5757_v17 = vld [vmem:[#allocation8 + $0x3] ss:$0 sm:$0xff]  ;;  %v2529_v32 = vadd.f32 %v2497_v14, %v2428_v0 }
 0x166   :  { %v366_v47 = vmul.f32 %v5757_v17, %v6715_v1  ;;  %v6742_v6 = vld [vmem:[#allocation38_spill] sm:$0xff]  ;;  %v938_v35 = vadd.f32 %v906_v30, %v874_v19  ;;  %1849 = vst.msk [vmem:[#allocation4 + $0x198] sm:$0xff] %vm56_vm0, %v1817_v58  ;;  %v6743_v15 = vld [vmem:[#allocation49_spill] sm:$0xff]  ;;  %v5770_v11 = vld [vmem:[#allocation3 + $0xf8] sm:$0xff]  ;;  %v5783_v31 = vadd.f32 %v1281_v33, %v1212_v36  ;;  %v367_v36 = vmul.f32 %v5757_v17, %v6722_v13 }
 0x167   :  { %v468_v21 = vmul.f32 %v5205_v41, %v6742_v6  ;;  %v5763_v46 = vld [vmem:[#allocation2 + $0x19a] sm:$0xff]  ;;  %v2160_v18 = vmul.f32 %v5302_v45, %v6743_v15  ;;  %v5768_v24 = vld [vmem:[#allocation3 + $0xe0] sm:$0xff]  ;;  %6745 = vst [vmem:[#allocation38_spill] sm:$0xff] %v5770_v11  ;;  %v673_v41 = vmul.f32 %v5258_v10, %v6692_v22  ;;  %1929 = vst.msk [vmem:[#allocation3 + $0xf8] sm:$0xff] %vm56_vm0, %v1893_v48 }
 0x168   :  { %v2661_v39 = vld [vmem:[#allocation4 + $0x188] sm:$0xff]  ;;  %6744 = vst [vmem:[#allocation25_spill] sm:$0xff] %v5768_v24  ;;  %v398_v60 = vadd.f32 %v366_v47, %v296_v8  ;;  %2365 = vst.msk [vmem:[#allocation3 + $0xe0] sm:$0xff] %vm56_vm0, %v2329_v34  ;;  %v5780_v26 = vld [vmem:[#allocation2 + $0x1a2] sm:$0xff]  ;;  %v2598_v22 = vmul.f32 %v5396_v51, %v5755_v62 }
 0x169   :  { %v2693_v59 = vadd.f32 %v2661_v39, %v2629_v38  ;;  %v5777_v19 = vld [vmem:[#allocation3 + $0xe8] sm:$0xff]  ;;  %970 = vst.msk [vmem:[#allocation4 + $0x98] sm:$0xff] %vm56_vm0, %v938_v35  ;;  %v297_v38 = vmul.f32 %v5744_v5, %v6688_v37  ;;  %v5790_v34 = vld [vmem:[#allocation3 + $0x110] sm:$0xff]  ;;  %v5796_v33 = vld [vmem:[#allocation8 + $0x6] ss:$0 sm:$0xff]  ;;  %v2192_v47 = vadd.f32 %v2160_v18, %v2091_v49 }
 0x16a   :  { %6746 = vst [vmem:[#allocation49_spill] sm:$0xff] %v5777_v19  ;;  %v2757_v56 = vld [vmem:[#allocation4 + $0x88] sm:$0xff]  ;;  %2366 = vst.msk [vmem:[#allocation3 + $0xe8] sm:$0xff] %vm56_vm0, %v2330_v53  ;;  %v2223_v58 = vld [vmem:[#allocation4 + $0x190] sm:$0xff]  ;;  %v500_v42 = vadd.f32 %v468_v21, %v398_v60  ;;  %v743_v60 = vmul.f32 %v5262_v25, %v6728_v9  ;;  %v2630_v11 = vadd.f32 %v2598_v22, %v2529_v32 }
 0x16b   :  { %6747 = vst [vmem:[#allocation63_spill] sm:$0xff] %v5790_v34  ;;  %3666 = vmatmul.mubr.msk.f32.gmra.mrb[16].mxu0 %vm56_vm0, %v2757_v56  ;;  %2725 = vst.msk [vmem:[#allocation4 + $0x188] sm:$0xff] %vm56_vm0, %v2693_v59  ;;  %v6748_v8 = vld [vmem:[#allocation44_spill] sm:$0xff]  ;;  %v2255_v30 = vadd.f32 %v2223_v58, %v2191_v16  ;;  %v6750_v59 = vld [vmem:[#allocation18_spill] sm:$0xff]  ;;  %v774_v16 = vadd.f32 %v742_v61, %v673_v41  ;;  %v399_v49 = vadd.f32 %v367_v36, %v297_v38 }
 0x16c   :  { %v469_v48 = vmul.f32 %v5796_v33, %v6748_v8  ;;  %v2331_v37 = vld [vmem:[#allocation2 + $0x16a] sm:$0xff]  ;;  %1053 = vst.msk [vmem:[#allocation3 + $0x110] sm:$0xff] %vm56_vm0, %v5763_v46  ;;  %v674_v0 = vmul.f32 %v5258_v10, %v6750_v59  ;;  %v5810_v21 = vld [vmem:[#allocation3 + $0x108] sm:$0xff]  ;;  %v1344_v39 = vld [vmem:[#allocation4 + $0x90] sm:$0xff]  ;;  %v1112_v61 = vmul.f32 %v5348_v28, %v6703_v40  ;;  %v1181_v41 = vmul.f32 %v5297_v4, %v6739_v20 }
 0x16d   :  { %v5802_v53 = vld [vmem:[#allocation3 + $0x118] sm:$0xff]  ;;  %v5808_v14 = vld [vmem:[#allocation3 + $0x100] sm:$0xff]  ;;  %6752 = vst [vmem:[#allocation64_spill] sm:$0xff] %v5810_v21  ;;  %532 = vst.msk [vmem:[#allocation4 + $0xa0] sm:$0xff] %vm56_vm0, %v500_v42  ;;  %v1376_v59 = vadd.f32 %v1344_v39, %v1312_v52 }
 0x16e   :  { %6749 = vst [vmem:[#allocation44_spill] sm:$0xff] %v5802_v53  ;;  %6751 = vst [vmem:[#allocation18_spill] sm:$0xff] %v5808_v14  ;;  %v6753_v35 = vld [vmem:[#allocation52_spill] sm:$0xff]  ;;  %v6754_v18 = vld [vmem:[#allocation42_spill] sm:$0xff]  ;;  %v501_v52 = vadd.f32 %v469_v48, %v399_v49 }
 0x16f   :  { %1054 = vst.msk [vmem:[#allocation3 + $0x118] sm:$0xff] %vm56_vm0, %v5780_v26  ;;  %v2429_v56 = vmul.f32 %v5348_v28, %v6753_v35  ;;  %v843_v10 = vmul.f32 %v5302_v45, %v6754_v18  ;;  %v5819_v58 = vld [vmem:[#allocation3 + $0xf0] sm:$0xff]  ;;  %1051 = vst.msk [vmem:[#allocation3 + $0x100] sm:$0xff] %vm56_vm0, %v5668_v44  ;;  %v2788_v25 = vld [vmem:[#allocation4 + $0x180] sm:$0xff] }
 0x170   :  { %6755 = vst [vmem:[#allocation52_spill] sm:$0xff] %v5819_v58  ;;  %1052 = vst.msk [vmem:[#allocation3 + $0x108] sm:$0xff] %vm56_vm0, %v5676_v43  ;;  %v6756_v35 = vld [vmem:[#allocation15_spill] sm:$0xff]  ;;  %v2332_v38 = vld [vmem:[#allocation2 + $0x172] sm:$0xff]  ;;  %3713 = vmatprep.mubr.msk.f32.mxu1 %vm56_vm0, %v2788_v25 }
 0x171   :  { %2287 = vst.msk [vmem:[#allocation4 + $0x190] sm:$0xff] %vm56_vm0, %v2255_v30  ;;  %v2498_v42 = vmul.f32 %v5297_v4, %v6756_v35  ;;  %2367 = vst.msk [vmem:[#allocation3 + $0xf0] sm:$0xff] %vm56_vm0, %v2331_v37  ;;  %v2224_v44 = vld [vmem:[#allocation4 + $0x198] sm:$0xff]  ;;  %v6757_v36 = vld [vmem:[#allocation37_spill] sm:$0xff]  ;;  %v775_v37 = vadd.f32 %v743_v60, %v674_v0  ;;  %v875_v58 = vadd.f32 %v843_v10, %v774_v16 }
 0x172   :  { %v5834_v43 = vld [vmem:[#allocation3 + $0xb8] sm:$0xff]  ;;  %v1616_v30 = vmul.f32 %v5744_v5, %v6757_v36  ;;  %v6759_v34 = vld [vmem:[#allocation30_spill] sm:$0xff]  ;;  %1408 = vst.msk [vmem:[#allocation4 + $0x90] sm:$0xff] %vm56_vm0, %v1376_v59  ;;  %v2256_v4 = vadd.f32 %v2224_v44, %v2192_v47  ;;  %v6760_v21 = vld [vmem:[#allocation35_spill] sm:$0xff]  ;;  %v1213_v59 = vadd.f32 %v1181_v41, %v1112_v61  ;;  %v1617_v44 = vmul.f32 %v5744_v5, %v6707_v2 }
 0x173   :  { %v6758_v39 = vld [vmem:[#allocation24_spill] sm:$0xff]  ;;  %v1786_v40 = vmul.f32 %v5796_v33, %v6759_v34  ;;  %v844_v25 = vmul.f32 %v5302_v45, %v6760_v21  ;;  %v5845_v14 = vld [vmem:[#allocation8 + $0x1] ss:$0 sm:$0xff]  ;;  %533 = vst.msk [vmem:[#allocation4 + $0xa8] sm:$0xff] %vm56_vm0, %v501_v52  ;;  %v5852_v24 = vld [vmem:[#allocation8 + $0x4] ss:$0 sm:$0xff]  ;;  %v2599_v22 = vmul.f32 %v5396_v51, %v5834_v43 }
 0x174   :  { %v1685_v53 = vmul.f32 %v5757_v17, %v6758_v39  ;;  %v1991_v48 = vmul.f32 %v5845_v14, %v6706_v29  ;;  %v5849_v49 = vld [vmem:[#allocation3 + $0xf8] sm:$0xff]  ;;  %v2060_v47 = vmul.f32 %v5852_v24, %v6735_v23  ;;  %v1519_v45 = vld [vmem:[#allocation2 + $0x180] sm:$0xff]  ;;  %v2789_v0 = vld [vmem:[#allocation4 + $0x188] sm:$0xff]  ;;  %2288 = vst.msk [vmem:[#allocation4 + $0x198] sm:$0xff] %vm56_vm0, %v2256_v4  ;;  %v2530_v29 = vadd.f32 %v2498_v42, %v2429_v56 }
 0x175   :  { %6761 = vst [vmem:[#allocation42_spill] sm:$0xff] %v5849_v49  ;;  %v1345_v36 = vld [vmem:[#allocation4 + $0x98] sm:$0xff]  ;;  %2368 = vst.msk [vmem:[#allocation3 + $0xf8] sm:$0xff] %vm56_vm0, %v2332_v38  ;;  %v6762_v32 = vld [vmem:[#allocation39_spill] sm:$0xff]  ;;  %3714 = vmatmul.mubr.msk.f32.gmra.mrb[16].mxu1 %vm56_vm0, %v2789_v0 }
 0x176   :  { %v1717_v19 = vadd.f32 %v1685_v53, %v1616_v30  ;;  %v1377_v60 = vadd.f32 %v1345_v36, %v5783_v31  ;;  %v1282_v53 = vmul.f32 %v5396_v51, %v6762_v32  ;;  %v1520_v16 = vld [vmem:[#allocation2 + $0x188] sm:$0xff]  ;;  %v5863_v10 = vld [vmem:[#allocation3 + $0x110] sm:$0xff]  ;;  %v1686_v31 = vmul.f32 %v5757_v17, %v6736_v57  ;;  %v907_v52 = vld [vmem:[#allocation4 + $0xa0] sm:$0xff] }
 0x177   :  { %6763 = vst [vmem:[#allocation15_spill] sm:$0xff] %v5863_v10  ;;  %v6764_v56 = vld [vmem:[#allocation55_spill] sm:$0xff]  ;;  %v5872_v42 = vld [vmem:[#allocation3 + $0x118] sm:$0xff]  ;;  %v876_v30 = vadd.f32 %v844_v25, %v775_v37  ;;  %v2092_v4 = vadd.f32 %v2060_v47, %v1991_v48  ;;  %v5875_v36 = vld [vmem:[#allocation8 + $0x7] ss:$0 sm:$0xff]  ;;  %v1992_v25 = vmul.f32 %v5845_v14, %v6716_v63  ;;  %v2061_v48 = vmul.f32 %v5852_v24, %v6743_v15 }
 0x178   :  { %v1818_v38 = vadd.f32 %v1786_v40, %v1717_v19  ;;  %1557 = vst.msk [vmem:[#allocation3 + $0x110] sm:$0xff] %vm56_vm0, %v6764_v56  ;;  %6765 = vst [vmem:[#allocation37_spill] sm:$0xff] %v5872_v42  ;;  %v6766_v61 = vld [vmem:[#allocation28_spill] sm:$0xff]  ;;  %v6767_v41 = vld [vmem:[#allocation47_spill] sm:$0xff]  ;;  %v1718_v37 = vadd.f32 %v1686_v31, %v1617_v44  ;;  %v2631_v10 = vadd.f32 %v2599_v22, %v2530_v29 }
 0x179   :  { %1409 = vst.msk [vmem:[#allocation4 + $0x98] sm:$0xff] %vm56_vm0, %v1377_v60  ;;  %v2161_v19 = vmul.f32 %v5875_v36, %v6766_v61  ;;  %v1787_v2 = vmul.f32 %v5796_v33, %v6767_v41  ;;  %v5881_v40 = vld [vmem:[#allocation3 + $0x100] sm:$0xff]  ;;  %v5883_v0 = vld [vmem:[#allocation3 + $0x108] sm:$0xff]  ;;  %v6770_v56 = vld [vmem:[#allocation31_spill] sm:$0xff]  ;;  %v939_v60 = vadd.f32 %v907_v52, %v875_v58  ;;  %v2430_v63 = vmul.f32 %v5348_v28, %v5584_v27 }
 0x17a   :  { %6768 = vst [vmem:[#allocation24_spill] sm:$0xff] %v5881_v40  ;;  %6769 = vst [vmem:[#allocation30_spill] sm:$0xff] %v5883_v0  ;;  %v2662_v42 = vld [vmem:[#allocation4 + $0x190] sm:$0xff]  ;;  %v5896_v0 = vld [vmem:[#allocation8 + $0x5] ss:$0 sm:$0xff]  ;;  %v744_v40 = vmul.f32 %v5852_v24, %v6754_v18 }
 0x17b   :  { %1558 = vst.msk [vmem:[#allocation3 + $0x118] sm:$0xff] %vm56_vm0, %v6770_v56  ;;  %1850 = vst.msk [vmem:[#allocation4 + $0x1a0] sm:$0xff] %vm56_vm0, %v1818_v38  ;;  %v2694_v47 = vadd.f32 %v2662_v42, %v2630_v11  ;;  %v1113_v56 = vmul.f32 %v5348_v28, %v6713_v54  ;;  %v1182_v58 = vmul.f32 %v5896_v0, %v6741_v7  ;;  %v2758_v38 = vld [vmem:[#allocation4 + $0x90] sm:$0xff]  ;;  %v908_v29 = vld [vmem:[#allocation4 + $0xa8] sm:$0xff] }
 0x17c   :  { %1555 = vst.msk [vmem:[#allocation3 + $0x100] sm:$0xff] %vm56_vm0, %v1519_v45  ;;  %1556 = vst.msk [vmem:[#allocation3 + $0x108] sm:$0xff] %vm56_vm0, %v1520_v16  ;;  %v2499_v45 = vmul.f32 %v5896_v0, %v5755_v62  ;;  %v1819_v16 = vadd.f32 %v1787_v2, %v1718_v37  ;;  %v298_v11 = vmul.f32 %v5744_v5, %v6715_v1  ;;  %3668 = vmatprep.mubr.msk.f32.mxu0 %vm56_vm0, %v2758_v38  ;;  %v6771_v22 = vld [vmem:[#allocation36_spill] sm:$0xff]  ;;  %v5911_v31 = vld [vmem:[#allocation3 + $0xc0] sm:$0xff] }
 0x17d   :  { %971 = vst.msk [vmem:[#allocation4 + $0xa0] sm:$0xff] %vm56_vm0, %v939_v60  ;;  %2726 = vst.msk [vmem:[#allocation4 + $0x190] sm:$0xff] %vm56_vm0, %v2694_v47  ;;  %v1314_v54 = vadd.f32 %v1282_v53, %v1213_v59  ;;  %v1283_v44 = vmul.f32 %v5396_v51, %v6771_v22  ;;  %v368_v28 = vmul.f32 %v5757_v17, %v6742_v6  ;;  %v6772_v27 = vld [vmem:[#allocation29_spill] sm:$0xff]  ;;  %v2663_v52 = vld [vmem:[#allocation4 + $0x198] sm:$0xff] }
 0x17e   :  { %v470_v42 = vmul.f32 %v5796_v33, %v6772_v27  ;;  %v940_v2 = vadd.f32 %v908_v29, %v876_v30  ;;  %v2193_v1 = vadd.f32 %v2161_v19, %v2092_v4  ;;  %1851 = vst.msk [vmem:[#allocation4 + $0x1a8] sm:$0xff] %vm56_vm0, %v1819_v16  ;;  %v2093_v60 = vadd.f32 %v2061_v48, %v1992_v25  ;;  %v6773_v37 = vld [vmem:[#allocation41_spill] sm:$0xff]  ;;  %v1894_v49 = vld [vmem:[#allocation2 + $0x181] sm:$0xff] }
 0x17f   :  { %v2162_v53 = vmul.f32 %v5875_v36, %v6773_v37  ;;  %v2695_v59 = vadd.f32 %v2663_v52, %v2631_v10  ;;  %v400_v47 = vadd.f32 %v368_v28, %v298_v11  ;;  %v675_v38 = vmul.f32 %v5845_v14, %v6725_v12  ;;  %v1895_v55 = vld [vmem:[#allocation2 + $0x189] sm:$0xff]  ;;  %v5924_v27 = vld [vmem:[#allocation3 + $0x110] sm:$0xff]  ;;  %v5929_v10 = vld [vmem:[#allocation3 + $0xc8] sm:$0xff] }
 0x180   :  { %6774 = vst [vmem:[#allocation35_spill] sm:$0xff] %v5924_v27  ;;  %v2759_v30 = vld [vmem:[#allocation4 + $0x98] sm:$0xff]  ;;  %972 = vst.msk [vmem:[#allocation4 + $0xa8] sm:$0xff] %vm56_vm0, %v940_v2  ;;  %v1214_v4 = vadd.f32 %v1182_v58, %v1113_v56  ;;  %v2531_v19 = vadd.f32 %v2499_v45, %v2430_v63  ;;  %v2600_v25 = vmul.f32 %v5396_v51, %v5911_v31  ;;  %v5939_v56 = vld [vmem:[#allocation8 + $0x2] ss:$0 sm:$0xff] }
 0x181   :  { %v299_v12 = vmul.f32 %v5744_v5, %v6722_v13  ;;  %1932 = vst.msk [vmem:[#allocation3 + $0x110] sm:$0xff] %vm56_vm0, %v5637_v50  ;;  %3669 = vmatmul.mubr.msk.f32.gmra.mrb[18].mxu0 %vm56_vm0, %v2759_v30  ;;  %2727 = vst.msk [vmem:[#allocation4 + $0x198] sm:$0xff] %vm56_vm0, %v2695_v59  ;;  %v2431_v58 = vmul.f32 %v5939_v56, %v6756_v35  ;;  %v502_v63 = vadd.f32 %v470_v42, %v400_v47  ;;  %v6776_v13 = vld [vmem:[#allocation21_spill] sm:$0xff] }
 0x182   :  { %v5935_v48 = vld [vmem:[#allocation3 + $0x118] sm:$0xff]  ;;  %v2225_v16 = vld [vmem:[#allocation4 + $0x1a0] sm:$0xff]  ;;  %v369_v45 = vmul.f32 %v5757_v17, %v6748_v8  ;;  %v471_v11 = vmul.f32 %v5796_v33, %v6776_v13  ;;  %v2194_v52 = vadd.f32 %v2162_v53, %v2093_v60  ;;  %v676_v2 = vmul.f32 %v5845_v14, %v6728_v9 }
 0x183   :  { %6775 = vst [vmem:[#allocation39_spill] sm:$0xff] %v5935_v48  ;;  %v5947_v50 = vld [vmem:[#allocation3 + $0x100] sm:$0xff]  ;;  %v5949_v29 = vld [vmem:[#allocation3 + $0x108] sm:$0xff]  ;;  %1933 = vst.msk [vmem:[#allocation3 + $0x118] sm:$0xff] %vm56_vm0, %v5680_v3  ;;  %v2257_v28 = vadd.f32 %v2225_v16, %v2193_v1  ;;  %v745_v35 = vmul.f32 %v5852_v24, %v6760_v21  ;;  %v2500_v59 = vmul.f32 %v5896_v0, %v5834_v43 }
 0x184   :  { %1930 = vst.msk [vmem:[#allocation3 + $0x100] sm:$0xff] %vm56_vm0, %v1894_v49  ;;  %1931 = vst.msk [vmem:[#allocation3 + $0x108] sm:$0xff] %vm56_vm0, %v1895_v55  ;;  %v1346_v42 = vld [vmem:[#allocation4 + $0xa0] sm:$0xff]  ;;  %v776_v47 = vadd.f32 %v744_v40, %v675_v38  ;;  %v6777_v3 = vld [vmem:[#allocation19_spill] sm:$0xff]  ;;  %v401_v60 = vadd.f32 %v369_v45, %v299_v12  ;;  %v1315_v30 = vadd.f32 %v1283_v44, %v1214_v4 }
 0x185   :  { %534 = vst.msk [vmem:[#allocation4 + $0xb0] sm:$0xff] %vm56_vm0, %v502_v63  ;;  %v845_v1 = vmul.f32 %v5875_v36, %v6777_v3  ;;  %v2790_v53 = vld [vmem:[#allocation4 + $0x190] sm:$0xff]  ;;  %v1378_v9 = vadd.f32 %v1346_v42, %v1314_v54  ;;  %2289 = vst.msk [vmem:[#allocation4 + $0x1a0] sm:$0xff] %vm56_vm0, %v2257_v28  ;;  %v2632_v16 = vadd.f32 %v2600_v25, %v2531_v19  ;;  %v2226_v49 = vld [vmem:[#allocation4 + $0x1a8] sm:$0xff] }
 0x186   :  { %v2601_v55 = vmul.f32 %v5396_v51, %v5929_v10  ;;  %3716 = vmatprep.mubr.msk.f32.mxu1 %vm56_vm0, %v2790_v53  ;;  %v503_v48 = vadd.f32 %v471_v11, %v401_v60  ;;  %v1618_v40 = vmul.f32 %v5744_v5, %v6758_v39  ;;  %v1687_v38 = vmul.f32 %v5757_v17, %v6759_v34  ;;  %v6778_v12 = vld [vmem:[#allocation43_spill] sm:$0xff]  ;;  %v2334_v60 = vld [vmem:[#allocation2 + $0x18a] sm:$0xff] }
 0x187   :  { %v1788_v54 = vmul.f32 %v5796_v33, %v6778_v12  ;;  %1410 = vst.msk [vmem:[#allocation4 + $0xa0] sm:$0xff] %vm56_vm0, %v1378_v9  ;;  %v2258_v44 = vadd.f32 %v2226_v49, %v2194_v52  ;;  %v777_v4 = vadd.f32 %v745_v35, %v676_v2  ;;  %v6779_v19 = vld [vmem:[#allocation51_spill] sm:$0xff]  ;;  %v1993_v25 = vmul.f32 %v5845_v14, %v6735_v23  ;;  %v1347_v45 = vld [vmem:[#allocation4 + $0xa8] sm:$0xff] }
 0x188   :  { %v846_v51 = vmul.f32 %v5875_v36, %v6779_v19  ;;  %v2333_v63 = vld [vmem:[#allocation2 + $0x182] sm:$0xff]  ;;  %v2532_v11 = vadd.f32 %v2500_v59, %v2431_v58  ;;  %v877_v39 = vadd.f32 %v845_v1, %v776_v47  ;;  %535 = vst.msk [vmem:[#allocation4 + $0xb8] sm:$0xff] %vm56_vm0, %v503_v48  ;;  %v1719_v28 = vadd.f32 %v1687_v38, %v1618_v40  ;;  %v6783_v40 = vld [vmem:[#allocation57_spill] sm:$0xff] }
 0x189   :  { %v2062_v42 = vmul.f32 %v5852_v24, %v6766_v61  ;;  %v5982_v53 = vld [vmem:[#allocation3 + $0x110] sm:$0xff]  ;;  %v2791_v52 = vld [vmem:[#allocation4 + $0x198] sm:$0xff]  ;;  %v1379_v2 = vadd.f32 %v1347_v45, %v1315_v30  ;;  %2290 = vst.msk [vmem:[#allocation4 + $0x1a8] sm:$0xff] %vm56_vm0, %v2258_v44  ;;  %v1114_v23 = vmul.f32 %v5939_v56, %v6739_v20  ;;  %v1183_v58 = vmul.f32 %v5896_v0, %v6762_v32 }
 0x18a   :  { %6780 = vst [vmem:[#allocation55_spill] sm:$0xff] %v5982_v53  ;;  %v1115_v48 = vmul.f32 %v5939_v56, %v6741_v7  ;;  %2371 = vst.msk [vmem:[#allocation3 + $0x110] sm:$0xff] %vm56_vm0, %v5763_v46  ;;  %v5993_v35 = vld [vmem:[#allocation3 + $0x118] sm:$0xff]  ;;  %3717 = vmatmul.mubr.msk.f32.gmra.mrb[18].mxu1 %vm56_vm0, %v2791_v52  ;;  %v1184_v59 = vmul.f32 %v5896_v0, %v6771_v22  ;;  %v1820_v47 = vadd.f32 %v1788_v54, %v1719_v28  ;;  %v6784_v54 = vld [vmem:[#allocation33_spill] sm:$0xff] }
 0x18b   :  { %6781 = vst [vmem:[#allocation28_spill] sm:$0xff] %v5993_v35  ;;  %v1619_v20 = vmul.f32 %v5744_v5, %v6736_v57  ;;  %v1688_v1 = vmul.f32 %v5757_v17, %v6767_v41  ;;  %v6002_v9 = vld [vmem:[#allocation3 + $0x100] sm:$0xff]  ;;  %v6004_v7 = vld [vmem:[#allocation3 + $0x108] sm:$0xff]  ;;  %2372 = vst.msk [vmem:[#allocation3 + $0x118] sm:$0xff] %vm56_vm0, %v5780_v26  ;;  %v878_v30 = vadd.f32 %v846_v51, %v777_v4 }
 0x18c   :  { %6782 = vst [vmem:[#allocation47_spill] sm:$0xff] %v6004_v7  ;;  %1411 = vst.msk [vmem:[#allocation4 + $0xa8] sm:$0xff] %vm56_vm0, %v1379_v2  ;;  %v909_v46 = vld [vmem:[#allocation4 + $0xb0] sm:$0xff]  ;;  %v2094_v49 = vadd.f32 %v2062_v42, %v1993_v25  ;;  %v2163_v38 = vmul.f32 %v5875_v36, %v6783_v40  ;;  %v1789_v57 = vmul.f32 %v5796_v33, %v6784_v54  ;;  %v2664_v44 = vld [vmem:[#allocation4 + $0x1a0] sm:$0xff] }
 0x18d   :  { %2369 = vst.msk [vmem:[#allocation3 + $0x100] sm:$0xff] %vm56_vm0, %v2333_v63  ;;  %2370 = vst.msk [vmem:[#allocation3 + $0x108] sm:$0xff] %vm56_vm0, %v2334_v60  ;;  %v941_v45 = vadd.f32 %v909_v46, %v877_v39  ;;  %v1720_v26 = vadd.f32 %v1688_v1, %v1619_v20  ;;  %v1994_v28 = vmul.f32 %v5845_v14, %v6743_v15  ;;  %v6020_v52 = vld [vmem:[#allocation8 + $0x8] ss:$0 sm:$0xff]  ;;  %v6785_v2 = vld [vmem:[#allocation27_spill] sm:$0xff] }
 0x18e   :  { %1852 = vst.msk [vmem:[#allocation4 + $0x1b0] sm:$0xff] %vm56_vm0, %v1820_v47  ;;  %v2063_v4 = vmul.f32 %v5852_v24, %v6773_v37  ;;  %v2696_v51 = vadd.f32 %v2664_v44, %v2632_v16  ;;  %v2633_v25 = vadd.f32 %v2601_v55, %v2532_v11  ;;  %v1215_v42 = vadd.f32 %v1183_v58, %v1114_v23  ;;  %v2760_v60 = vld [vmem:[#allocation4 + $0xa0] sm:$0xff]  ;;  %v6786_v47 = vld [vmem:[#allocation22_spill] sm:$0xff]  ;;  %v6035_v23 = vld [vmem:[#allocation3 + $0xd0] sm:$0xff] }
 0x18f   :  { %v1284_v63 = vmul.f32 %v6020_v52, %v6785_v2  ;;  %973 = vst.msk [vmem:[#allocation4 + $0xb0] sm:$0xff] %vm56_vm0, %v941_v45  ;;  %v1216_v39 = vadd.f32 %v1184_v59, %v1115_v48  ;;  %v1285_v20 = vmul.f32 %v6020_v52, %v6786_v47  ;;  %v1821_v1 = vadd.f32 %v1789_v57, %v1720_v26  ;;  %v910_v16 = vld [vmem:[#allocation4 + $0xb8] sm:$0xff]  ;;  %v6787_v58 = vld [vmem:[#allocation29_spill] sm:$0xff]  ;;  %v6788_v59 = vld [vmem:[#allocation50_spill] sm:$0xff] }
 0x190   :  { %v300_v15 = vmul.f32 %v5744_v5, %v6742_v6  ;;  %3671 = vmatprep.mubr.msk.f32.mxu0 %vm56_vm0, %v2760_v60  ;;  %2728 = vst.msk [vmem:[#allocation4 + $0x1a0] sm:$0xff] %vm56_vm0, %v2696_v51  ;;  %v2432_v55 = vmul.f32 %v5939_v56, %v5755_v62  ;;  %v2501_v11 = vmul.f32 %v5896_v0, %v5911_v31  ;;  %v2665_v6 = vld [vmem:[#allocation4 + $0x1a8] sm:$0xff] }
 0x191   :  { %v370_v48 = vmul.f32 %v5757_v17, %v6787_v58  ;;  %v472_v46 = vmul.f32 %v5796_v33, %v6788_v59  ;;  %v942_v57 = vadd.f32 %v910_v16, %v878_v30  ;;  %v2195_v44 = vadd.f32 %v2163_v38, %v2094_v49  ;;  %1853 = vst.msk [vmem:[#allocation4 + $0x1b8] sm:$0xff] %vm56_vm0, %v1821_v1  ;;  %v6789_v26 = vld [vmem:[#allocation62_spill] sm:$0xff] }
 0x192   :  { %v2095_v45 = vadd.f32 %v2063_v4, %v1994_v28  ;;  %v2164_v62 = vmul.f32 %v5875_v36, %v6789_v26  ;;  %v2697_v51 = vadd.f32 %v2665_v6, %v2633_v25  ;;  %v677_v35 = vmul.f32 %v5845_v14, %v6754_v18 }
 0x193   :  { %v402_v60 = vadd.f32 %v370_v48, %v300_v15  ;;  %v746_v53 = vmul.f32 %v5852_v24, %v6777_v3  ;;  %v2761_v27 = vld [vmem:[#allocation4 + $0xa8] sm:$0xff]  ;;  %v1316_v7 = vadd.f32 %v1284_v63, %v1215_v42  ;;  %974 = vst.msk [vmem:[#allocation4 + $0xb8] sm:$0xff] %vm56_vm0, %v942_v57  ;;  %v1317_v30 = vadd.f32 %v1285_v20, %v1216_v39  ;;  %v6790_v42 = vld [vmem:[#allocation16_spill] sm:$0xff] }
 0x194   :  { %v2602_v49 = vmul.f32 %v6020_v52, %v6035_v23  ;;  %v301_v38 = vmul.f32 %v5744_v5, %v6748_v8  ;;  %3672 = vmatmul.mubr.msk.f32.gmra.mrb[20].mxu0 %vm56_vm0, %v2761_v27  ;;  %2729 = vst.msk [vmem:[#allocation4 + $0x1a8] sm:$0xff] %vm56_vm0, %v2697_v51  ;;  %v2533_v18 = vadd.f32 %v2501_v11, %v2432_v55  ;;  %v6791_v55 = vld [vmem:[#allocation26_spill] sm:$0xff] }
 0x195   :  { %v2227_v28 = vld [vmem:[#allocation4 + $0x1b0] sm:$0xff]  ;;  %v504_v4 = vadd.f32 %v472_v46, %v402_v60  ;;  %v371_v25 = vmul.f32 %v5757_v17, %v6776_v13  ;;  %v473_v63 = vmul.f32 %v5796_v33, %v6790_v42  ;;  %v2196_v20 = vadd.f32 %v2164_v62, %v2095_v45  ;;  %v6792_v62 = vld [vmem:[#allocation58_spill] sm:$0xff] }
 0x196   :  { %v2259_v39 = vadd.f32 %v2227_v28, %v2195_v44  ;;  %v678_v1 = vmul.f32 %v5845_v14, %v6760_v21  ;;  %v747_v8 = vmul.f32 %v5852_v24, %v6779_v19  ;;  %v1348_v27 = vld [vmem:[#allocation4 + $0xb0] sm:$0xff]  ;;  %v2433_v15 = vmul.f32 %v5939_v56, %v5834_v43 }
 0x197   :  { %536 = vst.msk [vmem:[#allocation4 + $0xc0] sm:$0xff] %vm56_vm0, %v504_v4  ;;  %v778_v16 = vadd.f32 %v746_v53, %v677_v35  ;;  %v847_v11 = vmul.f32 %v5875_v36, %v6791_v55  ;;  %v403_v48 = vadd.f32 %v371_v25, %v301_v38  ;;  %v2792_v46 = vld [vmem:[#allocation4 + $0x1a0] sm:$0xff]  ;;  %v1380_v6 = vadd.f32 %v1348_v27, %v1316_v7  ;;  %v6076_v35 = vld [vmem:[#allocation3 + $0xd8] sm:$0xff]  ;;  %v6793_v38 = vld [vmem:[#allocation54_spill] sm:$0xff] }
 0x198   :  { %2291 = vst.msk [vmem:[#allocation4 + $0x1b0] sm:$0xff] %vm56_vm0, %v2259_v39  ;;  %v2502_v21 = vmul.f32 %v5896_v0, %v5929_v10  ;;  %v1116_v57 = vmul.f32 %v5939_v56, %v6762_v32  ;;  %v1185_v43 = vmul.f32 %v5896_v0, %v6785_v2  ;;  %3719 = vmatprep.mubr.msk.f32.mxu1 %vm56_vm0, %v2792_v46  ;;  %v2228_v53 = vld [vmem:[#allocation4 + $0x1b8] sm:$0xff] }
 0x199   :  { %v505_v44 = vadd.f32 %v473_v63, %v403_v48  ;;  %v1620_v7 = vmul.f32 %v5744_v5, %v6759_v34  ;;  %v1689_v45 = vmul.f32 %v5757_v17, %v6778_v12  ;;  %v1790_v51 = vmul.f32 %v5796_v33, %v6792_v62  ;;  %1412 = vst.msk [vmem:[#allocation4 + $0xb0] sm:$0xff] %vm56_vm0, %v1380_v6 }
 0x19a   :  { %v2260_v32 = vadd.f32 %v2228_v53, %v2196_v20  ;;  %v779_v60 = vadd.f32 %v747_v8, %v678_v1  ;;  %v848_v28 = vmul.f32 %v5875_v36, %v6793_v38  ;;  %v1995_v4 = vmul.f32 %v5845_v14, %v6766_v61  ;;  %v1349_v25 = vld [vmem:[#allocation4 + $0xb8] sm:$0xff] }
 0x19b   :  { %v2634_v63 = vadd.f32 %v2602_v49, %v2533_v18  ;;  %v879_v39 = vadd.f32 %v847_v11, %v778_v16  ;;  %537 = vst.msk [vmem:[#allocation4 + $0xc8] sm:$0xff] %vm56_vm0, %v505_v44  ;;  %v1721_v34 = vadd.f32 %v1689_v45, %v1620_v7  ;;  %v2064_v27 = vmul.f32 %v5852_v24, %v6783_v40  ;;  %v2793_v48 = vld [vmem:[#allocation4 + $0x1a8] sm:$0xff]  ;;  %v6794_v8 = vld [vmem:[#allocation32_spill] sm:$0xff] }
 0x19c   :  { %v1381_v46 = vadd.f32 %v1349_v25, %v1317_v30  ;;  %2292 = vst.msk [vmem:[#allocation4 + $0x1b8] sm:$0xff] %vm56_vm0, %v2260_v32  ;;  %v2534_v20 = vadd.f32 %v2502_v21, %v2433_v15  ;;  %v2603_v1 = vmul.f32 %v6020_v52, %v6076_v35  ;;  %v1286_v61 = vmul.f32 %v6020_v52, %v6794_v8  ;;  %v6795_v21 = vld [vmem:[#allocation25_spill] sm:$0xff]  ;;  %v6796_v44 = vld [vmem:[#allocation60_spill] sm:$0xff] }
 0x19d   :  { %3720 = vmatmul.mubr.msk.f32.gmra.mrb[20].mxu1 %vm56_vm0, %v2793_v48  ;;  %v1217_v49 = vadd.f32 %v1185_v43, %v1116_v57  ;;  %v1822_v18 = vadd.f32 %v1790_v51, %v1721_v34  ;;  %v1621_v16 = vmul.f32 %v5744_v5, %v6767_v41  ;;  %v1690_v11 = vmul.f32 %v5757_v17, %v6784_v54  ;;  %v6797_v48 = vld [vmem:[#allocation56_spill] sm:$0xff] }
 0x19e   :  { %1413 = vst.msk [vmem:[#allocation4 + $0xb8] sm:$0xff] %vm56_vm0, %v1381_v46  ;;  %v911_v30 = vld [vmem:[#allocation4 + $0xc0] sm:$0xff]  ;;  %v880_v15 = vadd.f32 %v848_v28, %v779_v60  ;;  %v2096_v6 = vadd.f32 %v2064_v27, %v1995_v4  ;;  %v2165_v53 = vmul.f32 %v5875_v36, %v6795_v21  ;;  %v1791_v7 = vmul.f32 %v5796_v33, %v6796_v44 }
 0x19f   :  { %v2666_v45 = vld [vmem:[#allocation4 + $0x1b0] sm:$0xff]  ;;  %v943_v57 = vadd.f32 %v911_v30, %v879_v39  ;;  %1854 = vst.msk [vmem:[#allocation4 + $0x1c0] sm:$0xff] %vm56_vm0, %v1822_v18  ;;  %v1722_v43 = vadd.f32 %v1690_v11, %v1621_v16  ;;  %v1996_v41 = vmul.f32 %v5845_v14, %v6773_v37  ;;  %v2065_v51 = vmul.f32 %v5852_v24, %v6789_v26 }
 0x1a0   :  { %v2698_v32 = vadd.f32 %v2666_v45, %v2634_v63  ;;  %v2635_v60 = vadd.f32 %v2603_v1, %v2534_v20  ;;  %v1117_v28 = vmul.f32 %v5939_v56, %v6771_v22  ;;  %v1186_v4 = vmul.f32 %v5896_v0, %v6786_v47  ;;  %v2762_v25 = vld [vmem:[#allocation4 + $0xb0] sm:$0xff]  ;;  %v6127_v20 = vld [vmem:[#allocation3 + $0xe0] sm:$0xff]  ;;  %v6798_v1 = vld [vmem:[#allocation40_spill] sm:$0xff] }
 0x1a1   :  { %975 = vst.msk [vmem:[#allocation4 + $0xc0] sm:$0xff] %vm56_vm0, %v943_v57  ;;  %v2434_v39 = vmul.f32 %v5939_v56, %v5911_v31  ;;  %v2503_v37 = vmul.f32 %v5896_v0, %v6035_v23  ;;  %v1823_v34 = vadd.f32 %v1791_v7, %v1722_v43  ;;  %v302_v63 = vmul.f32 %v5744_v5, %v6787_v58  ;;  %v6799_v7 = vld [vmem:[#allocation49_spill] sm:$0xff] }
 0x1a2   :  { %3674 = vmatprep.mubr.msk.f32.mxu0 %vm56_vm0, %v2762_v25  ;;  %2730 = vst.msk [vmem:[#allocation4 + $0x1b0] sm:$0xff] %vm56_vm0, %v2698_v32  ;;  %v1318_v22 = vadd.f32 %v1286_v61, %v1217_v49  ;;  %v912_v27 = vld [vmem:[#allocation4 + $0xc8] sm:$0xff]  ;;  %v1287_v46 = vmul.f32 %v6020_v52, %v6797_v48  ;;  %v372_v31 = vmul.f32 %v5757_v17, %v6788_v59 }
 0x1a3   :  { %v474_v18 = vmul.f32 %v5796_v33, %v6798_v1  ;;  %v2667_v16 = vld [vmem:[#allocation4 + $0x1b8] sm:$0xff]  ;;  %v944_v11 = vadd.f32 %v912_v27, %v880_v15  ;;  %v2197_v58 = vadd.f32 %v2165_v53, %v2096_v6  ;;  %1855 = vst.msk [vmem:[#allocation4 + $0x1c8] sm:$0xff] %vm56_vm0, %v1823_v34  ;;  %v2097_v30 = vadd.f32 %v2065_v51, %v1996_v41  ;;  %v6149_v51 = vld [vmem:[#allocation3 + $0xe8] sm:$0xff] }
 0x1a4   :  { %v2166_v61 = vmul.f32 %v5875_v36, %v6799_v7  ;;  %v2699_v49 = vadd.f32 %v2667_v16, %v2635_v60  ;;  %v404_v45 = vadd.f32 %v372_v31, %v302_v63  ;;  %v679_v57 = vmul.f32 %v5845_v14, %v6777_v3 }
 0x1a5   :  { %v748_v43 = vmul.f32 %v5852_v24, %v6791_v55  ;;  %v2763_v32 = vld [vmem:[#allocation4 + $0xb8] sm:$0xff]  ;;  %976 = vst.msk [vmem:[#allocation4 + $0xc8] sm:$0xff] %vm56_vm0, %v944_v11  ;;  %v1218_v25 = vadd.f32 %v1186_v4, %v1117_v28  ;;  %v2535_v15 = vadd.f32 %v2503_v37, %v2434_v39  ;;  %v2604_v6 = vmul.f32 %v6020_v52, %v6127_v20  ;;  %v6800_v4 = vld [vmem:[#allocation53_spill] sm:$0xff] }
 0x1a6   :  { %v303_v53 = vmul.f32 %v5744_v5, %v6776_v13  ;;  %3675 = vmatmul.mubr.msk.f32.gmra.mrb[22].mxu0 %vm56_vm0, %v2763_v32  ;;  %2731 = vst.msk [vmem:[#allocation4 + $0x1b8] sm:$0xff] %vm56_vm0, %v2699_v49  ;;  %v2229_v41 = vld [vmem:[#allocation4 + $0x1c0] sm:$0xff]  ;;  %v2435_v3 = vmul.f32 %v5939_v56, %v5929_v10  ;;  %v506_v60 = vadd.f32 %v474_v18, %v404_v45  ;;  %v6801_v18 = vld [vmem:[#allocation34_spill] sm:$0xff] }
 0x1a7   :  { %v373_v28 = vmul.f32 %v5757_v17, %v6790_v42  ;;  %v475_v39 = vmul.f32 %v5796_v33, %v6800_v4  ;;  %v2261_v37 = vadd.f32 %v2229_v41, %v2197_v58  ;;  %v2198_v34 = vadd.f32 %v2166_v61, %v2097_v30 }
 0x1a8   :  { %v680_v13 = vmul.f32 %v5845_v14, %v6779_v19  ;;  %v749_v63 = vmul.f32 %v5852_v24, %v6793_v38  ;;  %v1350_v27 = vld [vmem:[#allocation4 + $0xc0] sm:$0xff]  ;;  %v2504_v10 = vmul.f32 %v5896_v0, %v6076_v35  ;;  %538 = vst.msk [vmem:[#allocation4 + $0xd0] sm:$0xff] %vm56_vm0, %v506_v60  ;;  %v780_v31 = vadd.f32 %v748_v43, %v679_v57 }
 0x1a9   :  { %v849_v16 = vmul.f32 %v5875_v36, %v6801_v18  ;;  %v405_v11 = vadd.f32 %v373_v28, %v303_v53  ;;  %v2794_v49 = vld [vmem:[#allocation4 + $0x1b0] sm:$0xff]  ;;  %v1382_v58 = vadd.f32 %v1350_v27, %v1318_v22  ;;  %v1319_v30 = vadd.f32 %v1287_v46, %v1218_v25  ;;  %2293 = vst.msk [vmem:[#allocation4 + $0x1c0] sm:$0xff] %vm56_vm0, %v2261_v37  ;;  %v6802_v53 = vld [vmem:[#allocation20_spill] sm:$0xff] }
 0x1aa   :  { %v2636_v19 = vadd.f32 %v2604_v6, %v2535_v15  ;;  %v2605_v61 = vmul.f32 %v6020_v52, %v6149_v51  ;;  %3722 = vmatprep.mubr.msk.f32.mxu1 %vm56_vm0, %v2794_v49  ;;  %v2230_v45 = vld [vmem:[#allocation4 + $0x1c8] sm:$0xff]  ;;  %v1622_v57 = vmul.f32 %v5744_v5, %v6778_v12  ;;  %v1691_v43 = vmul.f32 %v5757_v17, %v6792_v62  ;;  %v6803_v15 = vld [vmem:[#allocation23_spill] sm:$0xff] }
 0x1ab   :  { %v507_v32 = vadd.f32 %v475_v39, %v405_v11  ;;  %v1792_v22 = vmul.f32 %v5796_v33, %v6802_v53  ;;  %1414 = vst.msk [vmem:[#allocation4 + $0xc0] sm:$0xff] %vm56_vm0, %v1382_v58  ;;  %v2262_v46 = vadd.f32 %v2230_v45, %v2198_v34  ;;  %v781_v25 = vadd.f32 %v749_v63, %v680_v13  ;;  %v6804_v58 = vld [vmem:[#allocation52_spill] sm:$0xff] }
 0x1ac   :  { %v850_v6 = vmul.f32 %v5875_v36, %v6803_v15  ;;  %v1997_v41 = vmul.f32 %v5845_v14, %v6783_v40  ;;  %v1351_v60 = vld [vmem:[#allocation4 + $0xc8] sm:$0xff]  ;;  %v2536_v28 = vadd.f32 %v2504_v10, %v2435_v3  ;;  %v881_v39 = vadd.f32 %v849_v16, %v780_v31 }
 0x1ad   :  { %539 = vst.msk [vmem:[#allocation4 + $0xd8] sm:$0xff] %vm56_vm0, %v507_v32  ;;  %v1723_v12 = vadd.f32 %v1691_v43, %v1622_v57  ;;  %v2066_v37 = vmul.f32 %v5852_v24, %v6795_v21  ;;  %v2795_v27 = vld [vmem:[#allocation4 + $0x1b8] sm:$0xff]  ;;  %v1383_v11 = vadd.f32 %v1351_v60, %v1319_v30  ;;  %2294 = vst.msk [vmem:[#allocation4 + $0x1c8] sm:$0xff] %vm56_vm0, %v2262_v46  ;;  %v6805_v30 = vld [vmem:[#allocation38_spill] sm:$0xff] }
 0x1ae   :  { %v1118_v34 = vmul.f32 %v5939_v56, %v6785_v2  ;;  %v1187_v13 = vmul.f32 %v5896_v0, %v6794_v8  ;;  %v1119_v40 = vmul.f32 %v5939_v56, %v6786_v47  ;;  %3723 = vmatmul.mubr.msk.f32.gmra.mrb[22].mxu1 %vm56_vm0, %v2795_v27  ;;  %v1188_v3 = vmul.f32 %v5896_v0, %v6797_v48 }
 0x1af   :  { %v1824_v63 = vadd.f32 %v1792_v22, %v1723_v12  ;;  %v1623_v10 = vmul.f32 %v5744_v5, %v6784_v54  ;;  %v1692_v31 = vmul.f32 %v5757_v17, %v6796_v44  ;;  %1415 = vst.msk [vmem:[#allocation4 + $0xc8] sm:$0xff] %vm56_vm0, %v1383_v11  ;;  %v913_v2 = vld [vmem:[#allocation4 + $0xd0] sm:$0xff]  ;;  %v882_v16 = vadd.f32 %v850_v6, %v781_v25 }
 0x1b0   :  { %v2098_v49 = vadd.f32 %v2066_v37, %v1997_v41  ;;  %v2167_v47 = vmul.f32 %v5875_v36, %v6804_v58  ;;  %v1793_v45 = vmul.f32 %v5796_v33, %v6805_v30  ;;  %v2668_v32 = vld [vmem:[#allocation4 + $0x1c0] sm:$0xff]  ;;  %v945_v57 = vadd.f32 %v913_v2, %v881_v39 }
 0x1b1   :  { %1856 = vst.msk [vmem:[#allocation4 + $0x1d0] sm:$0xff] %vm56_vm0, %v1824_v63  ;;  %v1724_v43 = vadd.f32 %v1692_v31, %v1623_v10  ;;  %v1998_v54 = vmul.f32 %v5845_v14, %v6789_v26  ;;  %v2067_v22 = vmul.f32 %v5852_v24, %v6799_v7  ;;  %v2700_v46 = vadd.f32 %v2668_v32, %v2636_v19  ;;  %v6806_v41 = vld [vmem:[#allocation45_spill] sm:$0xff] }
 0x1b2   :  { %v2637_v25 = vadd.f32 %v2605_v61, %v2536_v28  ;;  %v1219_v6 = vadd.f32 %v1187_v13, %v1118_v34  ;;  %v1288_v60 = vmul.f32 %v6020_v52, %v6806_v41  ;;  %v2764_v12 = vld [vmem:[#allocation4 + $0xc0] sm:$0xff]  ;;  %977 = vst.msk [vmem:[#allocation4 + $0xd0] sm:$0xff] %vm56_vm0, %v945_v57  ;;  %v2436_v39 = vmul.f32 %v5939_v56, %v6035_v23  ;;  %v6807_v28 = vld [vmem:[#allocation59_spill] sm:$0xff]  ;;  %v6808_v13 = vld [vmem:[#allocation48_spill] sm:$0xff] }
 0x1b3   :  { %v2505_v37 = vmul.f32 %v5896_v0, %v6127_v20  ;;  %v1825_v27 = vadd.f32 %v1793_v45, %v1724_v43  ;;  %v304_v26 = vmul.f32 %v5744_v5, %v6788_v59  ;;  %3677 = vmatprep.mubr.msk.f32.mxu0 %vm56_vm0, %v2764_v12  ;;  %2732 = vst.msk [vmem:[#allocation4 + $0x1c0] sm:$0xff] %vm56_vm0, %v2700_v46  ;;  %v6219_v34 = vld [vmem:[#allocation3 + $0xf0] sm:$0xff]  ;;  %v6809_v45 = vld [vmem:[#allocation42_spill] sm:$0xff] }
 0x1b4   :  { %v914_v19 = vld [vmem:[#allocation4 + $0xd8] sm:$0xff]  ;;  %v1220_v61 = vadd.f32 %v1188_v3, %v1119_v40  ;;  %v1289_v11 = vmul.f32 %v6020_v52, %v6807_v28  ;;  %v374_v23 = vmul.f32 %v5757_v17, %v6798_v1  ;;  %v476_v63 = vmul.f32 %v5796_v33, %v6808_v13  ;;  %v2669_v10 = vld [vmem:[#allocation4 + $0x1c8] sm:$0xff] }
 0x1b5   :  { %v946_v31 = vadd.f32 %v914_v19, %v882_v16  ;;  %v2199_v59 = vadd.f32 %v2167_v47, %v2098_v49  ;;  %1857 = vst.msk [vmem:[#allocation4 + $0x1d8] sm:$0xff] %vm56_vm0, %v1825_v27  ;;  %v2099_v2 = vadd.f32 %v2067_v22, %v1998_v54  ;;  %v2168_v40 = vmul.f32 %v5875_v36, %v6809_v45  ;;  %v3643_v27 = vpop.f32.mrb[0].mxu0 }
 0x1b6   :  { %v2701_v3 = vadd.f32 %v2669_v10, %v2637_v25  ;;  %v406_v32 = vadd.f32 %v374_v23, %v304_v26  ;;  %v681_v57 = vmul.f32 %v5845_v14, %v6791_v55  ;;  %v750_v43 = vmul.f32 %v5852_v24, %v6801_v18  ;;  %v2765_v46 = vld [vmem:[#allocation4 + $0xc8] sm:$0xff]  ;;  %v6810_v25 = vld [vmem:[#allocation17_spill] sm:$0xff]  ;;  %3390 = vst [vmem:[#allocation11 + $0x8] sm:$0xff] %v3643_v27 }
 0x1b7   :  { %v1320_v12 = vadd.f32 %v1288_v60, %v1219_v6  ;;  %978 = vst.msk [vmem:[#allocation4 + $0xd8] sm:$0xff] %vm56_vm0, %v946_v31  ;;  %v2537_v16 = vadd.f32 %v2505_v37, %v2436_v39  ;;  %v2606_v49 = vmul.f32 %v6020_v52, %v6219_v34  ;;  %v305_v47 = vmul.f32 %v5744_v5, %v6790_v42  ;;  %v6280_v27 = vld [vmem:[#allocation8] ss:$0 sm:$0xff] }
 0x1b8   :  { %3678 = vmatmul.mubr.msk.f32.gmra.mrb[24].mxu0 %vm56_vm0, %v2765_v46  ;;  %2733 = vst.msk [vmem:[#allocation4 + $0x1c8] sm:$0xff] %vm56_vm0, %v2701_v3  ;;  %v2231_v54 = vld [vmem:[#allocation4 + $0x1d0] sm:$0xff]  ;;  %v508_v55 = vadd.f32 %v476_v63, %v406_v32  ;;  %v375_v22 = vmul.f32 %v5757_v17, %v6800_v4  ;;  %v477_v6 = vmul.f32 %v5796_v33, %v6810_v25  ;;  %v6811_v63 = vld [vmem:[#allocation18_spill] sm:$0xff]  ;;  %v3070_v3 = vpop.f32.mrb[1].mxu0 }
 0x1b9   :  { %v2263_v60 = vadd.f32 %v2231_v54, %v2199_v59  ;;  %v2200_v39 = vadd.f32 %v2168_v40, %v2099_v2  ;;  %v682_v37 = vmul.f32 %v5845_v14, %v6793_v38  ;;  %v751_v42 = vmul.f32 %v5852_v24, %v6803_v15  ;;  %v1352_v26 = vld [vmem:[#allocation4 + $0xd0] sm:$0xff]  ;;  %3389 = vst [vmem:[#allocation11] sm:$0xff] %v3070_v3 }
 0x1ba   :  { %v1321_v19 = vadd.f32 %v1289_v11, %v1220_v61  ;;  %540 = vst.msk [vmem:[#allocation4 + $0xe0] sm:$0xff] %vm56_vm0, %v508_v55  ;;  %v782_v23 = vadd.f32 %v750_v43, %v681_v57  ;;  %v851_v10 = vmul.f32 %v5875_v36, %v6811_v63  ;;  %v407_v31 = vadd.f32 %v375_v22, %v305_v47  ;;  %v2796_v59 = vld [vmem:[#allocation4 + $0x1c0] sm:$0xff]  ;;  %v6255_v11 = vld [vmem:[#allocation3 + $0xf8] sm:$0xff] }
 0x1bb   :  { %v1384_v2 = vadd.f32 %v1352_v26, %v1320_v12  ;;  %2295 = vst.msk [vmem:[#allocation4 + $0x1d0] sm:$0xff] %vm56_vm0, %v2263_v60  ;;  %v2638_v38 = vadd.f32 %v2606_v49, %v2537_v16  ;;  %v2437_v40 = vmul.f32 %v5939_v56, %v6076_v35  ;;  %v2506_v61 = vmul.f32 %v5896_v0, %v6149_v51  ;;  %v6812_v49 = vld [vmem:[#allocation64_spill] sm:$0xff] }
 0x1bc   :  { %3725 = vmatprep.mubr.msk.f32.mxu1 %vm56_vm0, %v2796_v59  ;;  %v2232_v32 = vld [vmem:[#allocation4 + $0x1d8] sm:$0xff]  ;;  %v509_v57 = vadd.f32 %v477_v6, %v407_v31  ;;  %v1624_v43 = vmul.f32 %v5744_v5, %v6792_v62  ;;  %v1693_v46 = vmul.f32 %v5757_v17, %v6802_v53  ;;  %v1794_v12 = vmul.f32 %v5796_v33, %v5947_v50 }
 0x1bd   :  { %1416 = vst.msk [vmem:[#allocation4 + $0xd0] sm:$0xff] %vm56_vm0, %v1384_v2  ;;  %v2264_v35 = vadd.f32 %v2232_v32, %v2200_v39  ;;  %v783_v16 = vadd.f32 %v751_v42, %v682_v37  ;;  %v852_v47 = vmul.f32 %v5875_v36, %v6812_v49  ;;  %v1999_v54 = vmul.f32 %v5845_v14, %v6795_v21 }
 0x1be   :  { %v1353_v55 = vld [vmem:[#allocation4 + $0xd8] sm:$0xff]  ;;  %v2607_v5 = vmul.f32 %v6020_v52, %v6255_v11  ;;  %v883_v62 = vadd.f32 %v851_v10, %v782_v23  ;;  %541 = vst.msk [vmem:[#allocation4 + $0xe8] sm:$0xff] %vm56_vm0, %v509_v57  ;;  %v1725_v17 = vadd.f32 %v1693_v46, %v1624_v43  ;;  %v2068_v22 = vmul.f32 %v5852_v24, %v6804_v58  ;;  %v6284_v23 = vld [vmem:[#allocation8 + $0x3] ss:$0 sm:$0xff] }
 0x1bf   :  { %v2797_v6 = vld [vmem:[#allocation4 + $0x1c8] sm:$0xff]  ;;  %v1385_v60 = vadd.f32 %v1353_v55, %v1321_v19  ;;  %2296 = vst.msk [vmem:[#allocation4 + $0x1d8] sm:$0xff] %vm56_vm0, %v2264_v35  ;;  %v2538_v39 = vadd.f32 %v2506_v61, %v2437_v40  ;;  %v1120_v37 = vmul.f32 %v5939_v56, %v6794_v8  ;;  %v1189_v21 = vmul.f32 %v5896_v0, %v6806_v41 }
 0x1c0   :  { %3726 = vmatmul.mubr.msk.f32.gmra.mrb[24].mxu1 %vm56_vm0, %v2797_v6  ;;  %v1826_v42 = vadd.f32 %v1794_v12, %v1725_v17  ;;  %v1625_v26 = vmul.f32 %v6280_v27, %v6796_v44  ;;  %v1694_v19 = vmul.f32 %v6284_v23, %v6805_v30  ;;  %v884_v8 = vadd.f32 %v852_v47, %v783_v16  ;;  %v6813_v12 = vld [vmem:[#allocation24_spill] sm:$0xff]  ;;  %v6814_v17 = vld [vmem:[#allocation46_spill] sm:$0xff] }
 0x1c1   :  { %1417 = vst.msk [vmem:[#allocation4 + $0xd8] sm:$0xff] %vm56_vm0, %v1385_v60  ;;  %v915_v10 = vld [vmem:[#allocation4 + $0xe0] sm:$0xff]  ;;  %v2100_v31 = vadd.f32 %v2068_v22, %v1999_v54  ;;  %v2169_v3 = vmul.f32 %v5875_v36, %v6002_v9  ;;  %v1795_v59 = vmul.f32 %v5796_v33, %v5949_v29  ;;  %v2000_v61 = vmul.f32 %v5845_v14, %v6799_v7 }
 0x1c2   :  { %v2670_v2 = vld [vmem:[#allocation4 + $0x1d0] sm:$0xff]  ;;  %v947_v40 = vadd.f32 %v915_v10, %v883_v62  ;;  %1858 = vst.msk [vmem:[#allocation4 + $0x1e0] sm:$0xff] %vm56_vm0, %v1826_v42  ;;  %v1726_v44 = vadd.f32 %v1694_v19, %v1625_v26  ;;  %v2069_v32 = vmul.f32 %v5852_v24, %v6809_v45  ;;  %v2639_v43 = vadd.f32 %v2607_v5, %v2538_v39  ;;  %v6317_v39 = vld [vmem:[#allocation3 + $0x100] sm:$0xff]  ;;  %v3646_v42 = vpop.f32.mrb[2].mxu0 }
 0x1c3   :  { %v2702_v57 = vadd.f32 %v2670_v2, %v2638_v38  ;;  %v1221_v46 = vadd.f32 %v1189_v21, %v1120_v37  ;;  %v1290_v35 = vmul.f32 %v6020_v52, %v6813_v12  ;;  %v1121_v47 = vmul.f32 %v5939_v56, %v6797_v48  ;;  %v6815_v21 = vld [vmem:[#allocation47_spill] sm:$0xff]  ;;  %3392 = vst [vmem:[#allocation11 + $0x18] sm:$0xff] %v3646_v42  ;;  %v3080_v10 = vpop.f32.mrb[3].mxu0 }
 0x1c4   :  { %v2766_v16 = vld [vmem:[#allocation4 + $0xd0] sm:$0xff]  ;;  %979 = vst.msk [vmem:[#allocation4 + $0xe0] sm:$0xff] %vm56_vm0, %v947_v40  ;;  %v1190_v54 = vmul.f32 %v5896_v0, %v6807_v28  ;;  %v1827_v55 = vadd.f32 %v1795_v59, %v1726_v44  ;;  %v306_v7 = vmul.f32 %v6280_v27, %v6798_v1  ;;  %v2438_v5 = vmul.f32 %v5939_v56, %v6127_v20  ;;  %v6816_v59 = vld [vmem:[#allocation30_spill] sm:$0xff] }
 0x1c5   :  { %3680 = vmatprep.mubr.msk.f32.mxu0 %vm56_vm0, %v2766_v16  ;;  %2734 = vst.msk [vmem:[#allocation4 + $0x1d0] sm:$0xff] %vm56_vm0, %v2702_v57  ;;  %v916_v38 = vld [vmem:[#allocation4 + $0xe8] sm:$0xff]  ;;  %v2507_v62 = vmul.f32 %v5896_v0, %v6219_v34  ;;  %v376_v48 = vmul.f32 %v6284_v23, %v6808_v13  ;;  %v478_v22 = vmul.f32 %v5796_v33, %v6814_v17  ;;  %3391 = vst [vmem:[#allocation11 + $0x10] sm:$0xff] %v3080_v10  ;;  %v6817_v57 = vld [vmem:[#allocation61_spill] sm:$0xff] }
 0x1c6   :  { %v2671_v6 = vld [vmem:[#allocation4 + $0x1d8] sm:$0xff]  ;;  %v948_v60 = vadd.f32 %v916_v38, %v884_v8  ;;  %v2201_v1 = vadd.f32 %v2169_v3, %v2100_v31  ;;  %1859 = vst.msk [vmem:[#allocation4 + $0x1e8] sm:$0xff] %vm56_vm0, %v1827_v55  ;;  %v2101_v37 = vadd.f32 %v2069_v32, %v2000_v61  ;;  %v2170_v20 = vmul.f32 %v5875_v36, %v6815_v21  ;;  %v3797_v32 = vld [vmem:[#allocation8 + $0x6] ss:$0 sm:$0xff] }
 0x1c7   :  { %v2703_v26 = vadd.f32 %v2671_v6, %v2639_v43  ;;  %v408_v19 = vadd.f32 %v376_v48, %v306_v7  ;;  %v683_v13 = vmul.f32 %v5845_v14, %v6801_v18  ;;  %v752_v33 = vmul.f32 %v5852_v24, %v6811_v63  ;;  %v6818_v7 = vld [vmem:[#allocation63_spill] sm:$0xff] }
 0x1c8   :  { %v2767_v8 = vld [vmem:[#allocation4 + $0xd8] sm:$0xff]  ;;  %v1322_v31 = vadd.f32 %v1290_v35, %v1221_v46  ;;  %980 = vst.msk [vmem:[#allocation4 + $0xe8] sm:$0xff] %vm56_vm0, %v948_v60  ;;  %v1222_v3 = vadd.f32 %v1190_v54, %v1121_v47  ;;  %v1291_v2 = vmul.f32 %v6020_v52, %v6816_v59  ;;  %v307_v40 = vmul.f32 %v6280_v27, %v6800_v4  ;;  %v6819_v60 = vld [vmem:[#allocation35_spill] sm:$0xff] }
 0x1c9   :  { %3681 = vmatmul.mubr.msk.f32.gmra.mrb[26].mxu0 %vm56_vm0, %v2767_v8  ;;  %2735 = vst.msk [vmem:[#allocation4 + $0x1d8] sm:$0xff] %vm56_vm0, %v2703_v26  ;;  %v2233_v18 = vld [vmem:[#allocation4 + $0x1e0] sm:$0xff]  ;;  %v2608_v63 = vmul.f32 %v6020_v52, %v6317_v39  ;;  %v510_v44 = vadd.f32 %v478_v22, %v408_v19  ;;  %v377_v61 = vmul.f32 %v6284_v23, %v6810_v25 }
 0x1ca   :  { %v479_v43 = vmul.f32 %v3797_v32, %v6817_v57  ;;  %v2265_v46 = vadd.f32 %v2233_v18, %v2201_v1  ;;  %v2202_v35 = vadd.f32 %v2170_v20, %v2101_v37  ;;  %v684_v4 = vmul.f32 %v5845_v14, %v6803_v15  ;;  %v6820_v20 = vld [vmem:[#allocation44_spill] sm:$0xff]  ;;  %v3798_v26 = vld [vmem:[#allocation8 + $0x1] ss:$0 sm:$0xff]  ;;  %v3799_v8 = vld [vmem:[#allocation8 + $0x4] ss:$0 sm:$0xff] }
 0x1cb   :  { %v753_v16 = vmul.f32 %v5852_v24, %v6812_v49  ;;  %v1354_v47 = vld [vmem:[#allocation4 + $0xe0] sm:$0xff]  ;;  %v2539_v54 = vadd.f32 %v2507_v62, %v2438_v5  ;;  %542 = vst.msk [vmem:[#allocation4 + $0xf0] sm:$0xff] %vm56_vm0, %v510_v44  ;;  %v784_v55 = vadd.f32 %v752_v33, %v683_v13  ;;  %v853_v38 = vmul.f32 %v5875_v36, %v6818_v7  ;;  %v6351_v49 = vld [vmem:[#allocation3 + $0x108] sm:$0xff] }
 0x1cc   :  { %v409_v25 = vadd.f32 %v377_v61, %v307_v40  ;;  %v2798_v48 = vld [vmem:[#allocation4 + $0x1d0] sm:$0xff]  ;;  %v1386_v17 = vadd.f32 %v1354_v47, %v1322_v31  ;;  %v1323_v22 = vadd.f32 %v1291_v2, %v1222_v3  ;;  %2297 = vst.msk [vmem:[#allocation4 + $0x1e0] sm:$0xff] %vm56_vm0, %v2265_v46  ;;  %v2439_v14 = vmul.f32 %v5939_v56, %v6149_v51  ;;  %v3649_v40 = vpop.f32.mrb[4].mxu0  ;;  %v3691_v61 = vpop.f32.mrb[0].mxu1 }
 0x1cd   :  { %v2508_v24 = vmul.f32 %v5896_v0, %v6255_v11  ;;  %3728 = vmatprep.mubr.msk.f32.mxu1 %vm56_vm0, %v2798_v48  ;;  %v2234_v15 = vld [vmem:[#allocation4 + $0x1e8] sm:$0xff]  ;;  %v1626_v62 = vmul.f32 %v6280_v27, %v6802_v53  ;;  %v1695_v6 = vmul.f32 %v6284_v23, %v5947_v50  ;;  %v1796_v1 = vmul.f32 %v3797_v32, %v6819_v60  ;;  %v3090_v57 = vpop.f32.mrb[5].mxu0  ;;  %v6822_v47 = vld [vmem:[#allocation39_spill] sm:$0xff] }
 0x1ce   :  { %v511_v5 = vadd.f32 %v479_v43, %v409_v25  ;;  %1418 = vst.msk [vmem:[#allocation4 + $0xe0] sm:$0xff] %vm56_vm0, %v1386_v17  ;;  %v2266_v51 = vadd.f32 %v2234_v15, %v2202_v35  ;;  %v785_v37 = vadd.f32 %v753_v16, %v684_v4  ;;  %v854_v42 = vmul.f32 %v5875_v36, %v6820_v20  ;;  %v3800_v35 = vld [vmem:[#allocation8 + $0x7] ss:$0 sm:$0xff]  ;;  %v6821_v4 = vld [vmem:[#allocation55_spill] sm:$0xff]  ;;  %v3801_v25 = vld [vmem:[#allocation8 + $0x5] ss:$0 sm:$0xff] }
 0x1cf   :  { %v2001_v19 = vmul.f32 %v3798_v26, %v6804_v58  ;;  %v1355_v13 = vld [vmem:[#allocation4 + $0xe8] sm:$0xff]  ;;  %v2640_v33 = vadd.f32 %v2608_v63, %v2539_v54  ;;  %v885_v10 = vadd.f32 %v853_v38, %v784_v55  ;;  %v1727_v53 = vadd.f32 %v1695_v6, %v1626_v62  ;;  %3394 = vst [vmem:[#allocation11 + $0x28] sm:$0xff] %v3649_v40 }
 0x1d0   :  { %543 = vst.msk [vmem:[#allocation4 + $0xf8] sm:$0xff] %vm56_vm0, %v511_v5  ;;  %v2070_v50 = vmul.f32 %v3799_v8, %v6002_v9  ;;  %v2799_v31 = vld [vmem:[#allocation4 + $0x1d8] sm:$0xff]  ;;  %v1387_v3 = vadd.f32 %v1355_v13, %v1323_v22  ;;  %2298 = vst.msk [vmem:[#allocation4 + $0x1e8] sm:$0xff] %vm56_vm0, %v2266_v51  ;;  %v2540_v2 = vadd.f32 %v2508_v24, %v2439_v14  ;;  %v6823_v22 = vld [vmem:[#allocation15_spill] sm:$0xff] }
 0x1d1   :  { %v2609_v36 = vmul.f32 %v6020_v52, %v6351_v49  ;;  %v1122_v58 = vmul.f32 %v5939_v56, %v6806_v41  ;;  %3729 = vmatmul.mubr.msk.f32.gmra.mrb[26].mxu1 %vm56_vm0, %v2799_v31  ;;  %v1191_v18 = vmul.f32 %v5896_v0, %v6813_v12  ;;  %v1828_v63 = vadd.f32 %v1796_v1, %v1727_v53  ;;  %v3230_v12 = vpop.f32.mrb[1].mxu1  ;;  %v6825_v1 = vld [vmem:[#allocation37_spill] sm:$0xff] }
 0x1d2   :  { %v1627_v9 = vmul.f32 %v6280_v27, %v6805_v30  ;;  %v1696_v44 = vmul.f32 %v6284_v23, %v5949_v29  ;;  %1419 = vst.msk [vmem:[#allocation4 + $0xe8] sm:$0xff] %vm56_vm0, %v1387_v3  ;;  %v917_v43 = vld [vmem:[#allocation4 + $0xf0] sm:$0xff]  ;;  %v886_v41 = vadd.f32 %v854_v42, %v785_v37  ;;  %v2102_v46 = vadd.f32 %v2070_v50, %v2001_v19  ;;  %v3694_v40 = vpop.f32.mrb[2].mxu1 }
 0x1d3   :  { %v2171_v16 = vmul.f32 %v3800_v35, %v6821_v4  ;;  %v1797_v0 = vmul.f32 %v3797_v32, %v6822_v47  ;;  %3422 = vst [vmem:[#allocation11 + $0x108] sm:$0xff] %v3691_v61  ;;  %3393 = vst [vmem:[#allocation11 + $0x20] sm:$0xff] %v3090_v57  ;;  %v2672_v30 = vld [vmem:[#allocation4 + $0x1e0] sm:$0xff]  ;;  %v949_v27 = vadd.f32 %v917_v43, %v885_v10  ;;  %v2573_v19 = vld [vmem:[#allocation3 + $0x110] sm:$0xff] }
 0x1d4   :  { %1860 = vst.msk [vmem:[#allocation4 + $0x1f0] sm:$0xff] %vm56_vm0, %v1828_v63  ;;  %v1728_v29 = vadd.f32 %v1696_v44, %v1627_v9  ;;  %v2002_v23 = vmul.f32 %v3798_v26, %v6809_v45  ;;  %v2071_v54 = vmul.f32 %v3799_v8, %v6815_v21  ;;  %3421 = vst [vmem:[#allocation11 + $0x100] sm:$0xff] %v3230_v12  ;;  %v3240_v63 = vpop.f32.mrb[3].mxu1 }
 0x1d5   :  { %v2704_v55 = vadd.f32 %v2672_v30, %v2640_v33  ;;  %v2641_v7 = vadd.f32 %v2609_v36, %v2540_v2  ;;  %v1123_v38 = vmul.f32 %v5939_v56, %v6807_v28  ;;  %v1192_v32 = vmul.f32 %v3801_v25, %v6816_v59  ;;  %v2768_v48 = vld [vmem:[#allocation4 + $0xe0] sm:$0xff]  ;;  %981 = vst.msk [vmem:[#allocation4 + $0xf0] sm:$0xff] %vm56_vm0, %v949_v27  ;;  %v6824_v59 = vld [vmem:[#allocation28_spill] sm:$0xff]  ;;  %v3697_v4 = vpop.f32.mrb[4].mxu1  ;;  %v3652_v30 = vpop.f32.mrb[6].mxu0 }
 0x1d6   :  { %v1223_v17 = vadd.f32 %v1191_v18, %v1122_v58  ;;  %v1292_v14 = vmul.f32 %v6020_v52, %v6823_v22  ;;  %v1829_v24 = vadd.f32 %v1797_v0, %v1728_v29  ;;  %3683 = vmatprep.mubr.msk.f32.mxu0 %vm56_vm0, %v2768_v48  ;;  %v2203_v5 = vadd.f32 %v2171_v16, %v2102_v46  ;;  %v2574_v58 = vld [vmem:[#allocation3 + $0x118] sm:$0xff]  ;;  %v3250_v16 = vpop.f32.mrb[5].mxu1  ;;  %v3100_v27 = vpop.f32.mrb[7].mxu0 }
 0x1d7   :  { %2736 = vst.msk [vmem:[#allocation4 + $0x1e0] sm:$0xff] %vm56_vm0, %v2704_v55  ;;  %v918_v45 = vld [vmem:[#allocation4 + $0xf8] sm:$0xff]  ;;  %v2673_v21 = vld [vmem:[#allocation4 + $0x1e8] sm:$0xff]  ;;  %v2103_v28 = vadd.f32 %v2071_v54, %v2002_v23  ;;  %v2172_v62 = vmul.f32 %v3800_v35, %v6824_v59  ;;  %v1224_v60 = vadd.f32 %v1192_v32, %v1123_v38  ;;  %v1293_v51 = vmul.f32 %v6020_v52, %v6825_v1  ;;  %v3700_v23 = vpop.f32.mrb[6].mxu1  ;;  %v3655_v55 = vpop.f32.mrb[8].mxu0 }
 0x1d8   :  { %v950_v15 = vadd.f32 %v918_v45, %v886_v41  ;;  %1861 = vst.msk [vmem:[#allocation4 + $0x1f8] sm:$0xff] %vm56_vm0, %v1829_v24  ;;  %v2705_v6 = vadd.f32 %v2673_v21, %v2641_v7  ;;  %v1324_v20 = vadd.f32 %v1292_v14, %v1223_v17  ;;  %v2440_v42 = vmul.f32 %v5939_v56, %v6219_v34  ;;  %v3802_v56 = vld [vmem:[#allocation8 + $0x2] ss:$0 sm:$0xff]  ;;  %v3260_v54 = vpop.f32.mrb[7].mxu1  ;;  %v3110_v7 = vpop.f32.mrb[9].mxu0 }
 0x1d9   :  { %v2769_v37 = vld [vmem:[#allocation4 + $0xe8] sm:$0xff]  ;;  %v2509_v26 = vmul.f32 %v3801_v25, %v6317_v39  ;;  %v2204_v10 = vadd.f32 %v2172_v62, %v2103_v28  ;;  %v1325_v8 = vadd.f32 %v1293_v51, %v1224_v60  ;;  %v2610_v50 = vmul.f32 %v6020_v52, %v2573_v19  ;;  %3424 = vst [vmem:[#allocation11 + $0x118] sm:$0xff] %v3694_v40  ;;  %v3703_v38 = vpop.f32.mrb[8].mxu1 }
 0x1da   :  { %982 = vst.msk [vmem:[#allocation4 + $0xf8] sm:$0xff] %vm56_vm0, %v950_v15  ;;  %3684 = vmatmul.mubr.msk.f32.gmra.mrb[28].mxu0 %vm56_vm0, %v2769_v37  ;;  %2737 = vst.msk [vmem:[#allocation4 + $0x1e8] sm:$0xff] %vm56_vm0, %v2705_v6  ;;  %v2441_v34 = vmul.f32 %v3802_v56, %v6255_v11  ;;  %v2510_v39 = vmul.f32 %v3801_v25, %v6351_v49  ;;  %v2611_v49 = vmul.f32 %v6020_v52, %v2574_v58  ;;  %v3270_v25 = vpop.f32.mrb[9].mxu1 }
 0x1db   :  { %v2235_v13 = vld [vmem:[#allocation4 + $0x1f0] sm:$0xff]  ;;  %v2541_v2 = vadd.f32 %v2509_v26, %v2440_v42  ;;  %3423 = vst [vmem:[#allocation11 + $0x110] sm:$0xff] %v3240_v63  ;;  %3426 = vst [vmem:[#allocation11 + $0x128] sm:$0xff] %v3697_v4 }
 0x1dc   :  { %v2267_v33 = vadd.f32 %v2235_v13, %v2203_v5  ;;  %v1356_v53 = vld [vmem:[#allocation4 + $0xf0] sm:$0xff]  ;;  %v2542_v11 = vadd.f32 %v2510_v39, %v2441_v34  ;;  %3425 = vst [vmem:[#allocation11 + $0x120] sm:$0xff] %v3250_v16  ;;  %3396 = vst [vmem:[#allocation11 + $0x38] sm:$0xff] %v3652_v30 }
 0x1dd   :  { %v1388_v3 = vadd.f32 %v1356_v53, %v1324_v20  ;;  %v2642_v57 = vadd.f32 %v2610_v50, %v2541_v2  ;;  %3395 = vst [vmem:[#allocation11 + $0x30] sm:$0xff] %v3100_v27  ;;  %3428 = vst [vmem:[#allocation11 + $0x138] sm:$0xff] %v3700_v23 }
 0x1de   :  { %v2800_v31 = vld [vmem:[#allocation4 + $0x1e0] sm:$0xff]  ;;  %2299 = vst.msk [vmem:[#allocation4 + $0x1f0] sm:$0xff] %vm56_vm0, %v2267_v33  ;;  %v2643_v46 = vadd.f32 %v2611_v49, %v2542_v11  ;;  %3427 = vst [vmem:[#allocation11 + $0x130] sm:$0xff] %v3260_v54 }
 0x1df   :  { %3731 = vmatprep.mubr.msk.f32.mxu1 %vm56_vm0, %v2800_v31  ;;  %v2236_v36 = vld [vmem:[#allocation4 + $0x1f8] sm:$0xff]  ;;  %1420 = vst.msk [vmem:[#allocation4 + $0xf0] sm:$0xff] %vm56_vm0, %v1388_v3  ;;  %3398 = vst [vmem:[#allocation11 + $0x48] sm:$0xff] %v3655_v55 }
 0x1e0   :  { %v2268_v18 = vadd.f32 %v2236_v36, %v2204_v10  ;;  %3397 = vst [vmem:[#allocation11 + $0x40] sm:$0xff] %v3110_v7  ;;  %3430 = vst [vmem:[#allocation11 + $0x148] sm:$0xff] %v3703_v38 }
 0x1e1   :  { %v1357_v9 = vld [vmem:[#allocation4 + $0xf8] sm:$0xff]  ;;  %v2801_v44 = vld [vmem:[#allocation4 + $0x1e8] sm:$0xff]  ;;  %3429 = vst [vmem:[#allocation11 + $0x140] sm:$0xff] %v3270_v25 }
 0x1e2   :  { %v1389_v61 = vadd.f32 %v1357_v9, %v1325_v8  ;;  %2300 = vst.msk [vmem:[#allocation4 + $0x1f8] sm:$0xff] %vm56_vm0, %v2268_v18  ;;  %3732 = vmatmul.mubr.msk.f32.gmra.mrb[28].mxu1 %vm56_vm0, %v2801_v44 }
 0x1e4   :  { %1421 = vst.msk [vmem:[#allocation4 + $0xf8] sm:$0xff] %vm56_vm0, %v1389_v61 }
 0x1e5   :  { %v2674_v43 = vld [vmem:[#allocation4 + $0x1f0] sm:$0xff] }
 0x1e6   :  { %v2706_v41 = vadd.f32 %v2674_v43, %v2642_v57  ;;  %v2770_v35 = vld [vmem:[#allocation4 + $0xf0] sm:$0xff] }
 0x1e7   :  { %3686 = vmatprep.mubr.msk.f32.mxu0 %vm56_vm0, %v2770_v35 }
 0x1e8   :  { %2738 = vst.msk [vmem:[#allocation4 + $0x1f0] sm:$0xff] %vm56_vm0, %v2706_v41  ;;  %v3658_v32 = vpop.f32.mrb[10].mxu0 }
 0x1e9   :  { %v2675_v47 = vld [vmem:[#allocation4 + $0x1f8] sm:$0xff]  ;;  %3400 = vst [vmem:[#allocation11 + $0x58] sm:$0xff] %v3658_v32  ;;  %v3120_v48 = vpop.f32.mrb[11].mxu0 }
 0x1ea   :  { %v2707_v0 = vadd.f32 %v2675_v47, %v2643_v46  ;;  %3399 = vst [vmem:[#allocation11 + $0x50] sm:$0xff] %v3120_v48 }
 0x1eb   :  { %v2771_v12 = vld [vmem:[#allocation4 + $0xf8] sm:$0xff] }
 0x1ec   :  { %3687 = vmatmul.mubr.msk.f32.gmra.mrb[30].mxu0 %vm56_vm0, %v2771_v12  ;;  %2739 = vst.msk [vmem:[#allocation4 + $0x1f8] sm:$0xff] %vm56_vm0, %v2707_v0 }
 0x1ef   :  { %v2802_v52 = vld [vmem:[#allocation4 + $0x1f0] sm:$0xff] }
 0x1f0   :  { %3734 = vmatprep.mubr.msk.f32.mxu1 %vm56_vm0, %v2802_v52 }
 0x1f3   :  { %v2803_v29 = vld [vmem:[#allocation4 + $0x1f8] sm:$0xff] }
 0x1f4   :  { %3735 = vmatmul.mubr.msk.f32.gmra.mrb[30].mxu1 %vm56_vm0, %v2803_v29 }
 0x1f6   :  { %v3706_v17 = vpop.f32.mrb[10].mxu1 }
 0x1f7   :  { %3432 = vst [vmem:[#allocation11 + $0x158] sm:$0xff] %v3706_v17  ;;  %v3280_v22 = vpop.f32.mrb[11].mxu1 }
 0x1f8   :  { %3431 = vst [vmem:[#allocation11 + $0x150] sm:$0xff] %v3280_v22 }
 0x204   :  { %v3661_v14 = vpop.f32.mrb[12].mxu0 }
 0x205   :  { %3402 = vst [vmem:[#allocation11 + $0x68] sm:$0xff] %v3661_v14  ;;  %v3130_v24 = vpop.f32.mrb[13].mxu0 }
 0x206   :  { %3401 = vst [vmem:[#allocation11 + $0x60] sm:$0xff] %v3130_v24 }
 0x212   :  { %v3709_v45 = vpop.f32.mrb[12].mxu1 }
 0x213   :  { %3434 = vst [vmem:[#allocation11 + $0x168] sm:$0xff] %v3709_v45  ;;  %v3290_v21 = vpop.f32.mrb[13].mxu1 }
 0x214   :  { %3433 = vst [vmem:[#allocation11 + $0x160] sm:$0xff] %v3290_v21 }
 0x221   :  { %v3664_v15 = vpop.f32.mrb[14].mxu0 }
 0x222   :  { %3404 = vst [vmem:[#allocation11 + $0x78] sm:$0xff] %v3664_v15  ;;  %v3140_v5 = vpop.f32.mrb[15].mxu0 }
 0x223   :  { %3403 = vst [vmem:[#allocation11 + $0x70] sm:$0xff] %v3140_v5 }
 0x230   :  { %v3712_v28 = vpop.f32.mrb[14].mxu1 }
 0x231   :  { %3436 = vst [vmem:[#allocation11 + $0x178] sm:$0xff] %v3712_v28  ;;  %v3300_v59 = vpop.f32.mrb[15].mxu1 }
 0x232   :  { %3435 = vst [vmem:[#allocation11 + $0x170] sm:$0xff] %v3300_v59 }
 0x23e   :  { %v3667_v62 = vpop.f32.mrb[16].mxu0 }
 0x23f   :  { %3406 = vst [vmem:[#allocation11 + $0x88] sm:$0xff] %v3667_v62  ;;  %v3150_v6 = vpop.f32.mrb[17].mxu0 }
 0x240   :  { %3405 = vst [vmem:[#allocation11 + $0x80] sm:$0xff] %v3150_v6 }
 0x248   :  { %v3715_v60 = vpop.f32.mrb[16].mxu1 }
 0x249   :  { %3438 = vst [vmem:[#allocation11 + $0x188] sm:$0xff] %v3715_v60  ;;  %v3310_v1 = vpop.f32.mrb[17].mxu1 }
 0x24a   :  { %3437 = vst [vmem:[#allocation11 + $0x180] sm:$0xff] %v3310_v1 }
 0x254   :  { %v3670_v51 = vpop.f32.mrb[18].mxu0 }
 0x255   :  { %3408 = vst [vmem:[#allocation11 + $0x98] sm:$0xff] %v3670_v51  ;;  %v3160_v37 = vpop.f32.mrb[19].mxu0 }
 0x256   :  { %3407 = vst [vmem:[#allocation11 + $0x90] sm:$0xff] %v3160_v37 }
 0x25d   :  { %v3718_v20 = vpop.f32.mrb[18].mxu1 }
 0x25e   :  { %3440 = vst [vmem:[#allocation11 + $0x198] sm:$0xff] %v3718_v20  ;;  %v3320_v42 = vpop.f32.mrb[19].mxu1 }
 0x25f   :  { %3439 = vst [vmem:[#allocation11 + $0x190] sm:$0xff] %v3320_v42 }
 0x267   :  { %v3673_v26 = vpop.f32.mrb[20].mxu0 }
 0x268   :  { %3410 = vst [vmem:[#allocation11 + $0xa8] sm:$0xff] %v3673_v26  ;;  %v3170_v19 = vpop.f32.mrb[21].mxu0 }
 0x269   :  { %3409 = vst [vmem:[#allocation11 + $0xa0] sm:$0xff] %v3170_v19 }
 0x270   :  { %v3721_v13 = vpop.f32.mrb[20].mxu1 }
 0x271   :  { %3442 = vst [vmem:[#allocation11 + $0x1a8] sm:$0xff] %v3721_v13  ;;  %v3330_v33 = vpop.f32.mrb[21].mxu1 }
 0x272   :  { %3441 = vst [vmem:[#allocation11 + $0x1a0] sm:$0xff] %v3330_v33 }
 0x279   :  { %v3676_v10 = vpop.f32.mrb[22].mxu0 }
 0x27a   :  { %3412 = vst [vmem:[#allocation11 + $0xb8] sm:$0xff] %v3676_v10  ;;  %v3180_v53 = vpop.f32.mrb[23].mxu0 }
 0x27b   :  { %3411 = vst [vmem:[#allocation11 + $0xb0] sm:$0xff] %v3180_v53 }
 0x281   :  { %v3724_v8 = vpop.f32.mrb[22].mxu1 }
 0x282   :  { %3444 = vst [vmem:[#allocation11 + $0x1b8] sm:$0xff] %v3724_v8  ;;  %v3340_v50 = vpop.f32.mrb[23].mxu1 }
 0x283   :  { %3443 = vst [vmem:[#allocation11 + $0x1b0] sm:$0xff] %v3340_v50 }
 0x28b   :  { %v3679_v31 = vpop.f32.mrb[24].mxu0 }
 0x28c   :  { %3414 = vst [vmem:[#allocation11 + $0xc8] sm:$0xff] %v3679_v31  ;;  %v3190_v3 = vpop.f32.mrb[25].mxu0 }
 0x28d   :  { %3413 = vst [vmem:[#allocation11 + $0xc0] sm:$0xff] %v3190_v3 }
 0x293   :  { %v3727_v2 = vpop.f32.mrb[24].mxu1 }
 0x294   :  { %3446 = vst [vmem:[#allocation11 + $0x1c8] sm:$0xff] %v3727_v2  ;;  %v3350_v56 = vpop.f32.mrb[25].mxu1 }
 0x295   :  { %3445 = vst [vmem:[#allocation11 + $0x1c0] sm:$0xff] %v3350_v56 }
 0x29c   :  { %v3682_v34 = vpop.f32.mrb[26].mxu0 }
 0x29d   :  { %3416 = vst [vmem:[#allocation11 + $0xd8] sm:$0xff] %v3682_v34  ;;  %v3200_v39 = vpop.f32.mrb[27].mxu0 }
 0x29e   :  { %3415 = vst [vmem:[#allocation11 + $0xd0] sm:$0xff] %v3200_v39 }
 0x2a4   :  { %v3730_v36 = vpop.f32.mrb[26].mxu1 }
 0x2a5   :  { %3448 = vst [vmem:[#allocation11 + $0x1d8] sm:$0xff] %v3730_v36  ;;  %v3360_v58 = vpop.f32.mrb[27].mxu1 }
 0x2a6   :  { %3447 = vst [vmem:[#allocation11 + $0x1d0] sm:$0xff] %v3360_v58 }
 0x2ad   :  { %v3685_v40 = vpop.f32.mrb[28].mxu0 }
 0x2ae   :  { %3418 = vst [vmem:[#allocation11 + $0xe8] sm:$0xff] %v3685_v40  ;;  %v3210_v18 = vpop.f32.mrb[29].mxu0 }
 0x2af   :  { %3417 = vst [vmem:[#allocation11 + $0xe0] sm:$0xff] %v3210_v18 }
 0x2b5   :  { %v3733_v63 = vpop.f32.mrb[28].mxu1 }
 0x2b6   :  { %3450 = vst [vmem:[#allocation11 + $0x1e8] sm:$0xff] %v3733_v63  ;;  %v3370_v9 = vpop.f32.mrb[29].mxu1 }
 0x2b7   :  { %3449 = vst [vmem:[#allocation11 + $0x1e0] sm:$0xff] %v3370_v9 }
 0x2bf   :  { %v3688_v44 = vpop.f32.mrb[30].mxu0 }
 0x2c0   :  { %3420 = vst [vmem:[#allocation11 + $0xf8] sm:$0xff] %v3688_v44  ;;  %v3220_v61 = vpop.f32.mrb[31].mxu0 }
 0x2c1   :  { %3419 = vst [vmem:[#allocation11 + $0xf0] sm:$0xff] %v3220_v61 }
 0x2c7   :  { %v3736_v57 = vpop.f32.mrb[30].mxu1 }
 0x2c8   :  { %3452 = vst [vmem:[#allocation11 + $0x1f8] sm:$0xff] %v3736_v57  ;;  %v3380_v11 = vpop.f32.mrb[31].mxu1 }
 0x2c9   :  { %3451 = vst [vmem:[#allocation11 + $0x1f0] sm:$0xff] %v3380_v11 }
 0x2ca   :  { %3880 = shalt.err (!%p3877_p0)
}
 0x2cb   :  { %s3881_s27 = scalar_lea.hbm %s6434_s3, 8192 }
 0x2cc   :  { %p3882_p1 = scmp.ne.s32.totalorder %s6434_s3, %s3881_s27  ;;  %p3885_p2 = scmp.lt.u32.totalorder %s3881_s27, %s6434_s3 }
 0x2ce   :  { %p3887_p3 = pnand %p3885_p2, %p3882_p1 }
 0x2d0   :  { %3890 = shalt.err (!%p3887_p3)
}
 0x2d1   :  { %3464 = dma.vmem_to_hbm [thread:$0]  %s3459_s21, 8192, %s6434_s3, [#allocation7], %s3899_s24, %s3899_s24, %s3900_s25  }
 0x2d2   :  { %3895 = dma.done.wait [#allocation7], 8192  }
 0x2d3   :  { %3896 = vsyncadd [#allocation7], 4294959104 }
 0x2d4   :  { %3468 = vsyncpa [#allocation6], 1 }
 0x2d5   :  { %3469 = vsyncpa [#allocation9], 1 }
 0x2d6   :  { %3470 = vsyncpa [#allocation7], 1 }

</bundles_post_ra>
